<compile_context>
chip_gen: v5e
topology: v5e:2x2
jax: 0.10.0
libtpu: 0.0.40
codegen_flags: <defaults>
</compile_context>

<pallas_src>
import jax
import jax.numpy as jnp
from jax.experimental import pallas as pl
from jax.experimental.pallas import tpu as pltpu

# ---- tiny T5 config ----
VOCAB = 128
D_MODEL = 32
N_HEADS = 4
D_KV = 8
INNER = N_HEADS * D_KV
D_FF = 64
N_LAYERS = 2
REL_BUCKETS = 8
REL_MAX_DIST = 16
EPS = 1e-6
NEG_INF = -1e9
PAD_ID = 0
DEC_START = 0
STATS_LANES = 128          # lane-dense per-batch loss-stats block


# ---------------- in-kernel helpers ----------------

def _rms_normalize(x):
    var = jnp.mean(x * x, axis=-1, keepdims=True)
    return x * jax.lax.rsqrt(var + EPS)


def _dot(a, b):
    # 2-D matmul, bf16 MXU operands, f32 accumulate.
    return jnp.dot(a.astype(jnp.bfloat16), b.astype(jnp.bfloat16),
                   preferred_element_type=jnp.float32)


def _dot_tb(a, b):
    # 2-D a @ b.T (contract last dims of both operands).
    return jax.lax.dot_general(a.astype(jnp.bfloat16), b.astype(jnp.bfloat16),
                               (((1,), (1,)), ((), ())),
                               preferred_element_type=jnp.float32)


def _bdot(a, b):
    # head-batched matmul: [H, M, K] @ [H, K, N] -> [H, M, N]
    return jax.lax.dot_general(a.astype(jnp.bfloat16), b.astype(jnp.bfloat16),
                               (((2,), (1,)), ((0,), (0,))),
                               preferred_element_type=jnp.float32)


def _bdot_tb(a, b):
    # head-batched a @ b^T: [H, M, K] @ [H, N, K] -> [H, M, N]
    return jax.lax.dot_general(a.astype(jnp.bfloat16), b.astype(jnp.bfloat16),
                               (((2,), (2,)), ((0,), (0,))),
                               preferred_element_type=jnp.float32)


def _softmax_last(s):
    m = jnp.max(s, axis=-1, keepdims=True)
    p = jnp.exp(s - m)
    return p * pl.reciprocal(jnp.sum(p, axis=-1, keepdims=True), approx=True)


def _attention(q, k, v, bias, wo_h):
    # q: [H,T,Dk], k/v: [H,S,Dk], bias broadcastable to [H,T,S], wo_h: [H,Dk,D]
    s = _bdot_tb(q, k) + bias              # T5: no 1/sqrt(d) scaling; f32 scores
    p = _softmax_last(s)
    o = _bdot(p, v)                        # [H, T, Dk]
    # sum_h (o_h @ Wo_h) == concat(heads) @ Wo  -> [T, D]
    return jnp.sum(_bdot(o, wo_h), axis=0)


def _self_attn_block(x, ln, wqkv3h, wo_h, bias):
    # x: [T, D]; wqkv3h: [3H, D, Dk]; wo_h: [H, Dk, D]; bias: [H, T, T] (or bcast)
    h = (_rms_normalize(x) * ln).astype(jnp.bfloat16)
    hb = jnp.broadcast_to(h[None], (3 * N_HEADS,) + h.shape)
    qkv = _bdot(hb, wqkv3h)                # [3H, T, Dk]
    q = qkv[:N_HEADS]
    k = qkv[N_HEADS:2 * N_HEADS]
    v = qkv[2 * N_HEADS:]
    return x + _attention(q, k, v, bias, wo_h)


def _cross_attn_block(x, memb, ln, wq_h, wkv2h, wo_h, bias):
    # x: [T, D]; memb: [2H, S, D] bf16; wq_h: [H, D, Dk]; wkv2h: [2H, D, Dk]
    h = (_rms_normalize(x) * ln).astype(jnp.bfloat16)
    hb = jnp.broadcast_to(h[None], (N_HEADS,) + h.shape)
    q = _bdot(hb, wq_h)                    # [H, T, Dk]
    kv = _bdot(memb, wkv2h)                # [2H, S, Dk]
    return x + _attention(q, kv[:N_HEADS], kv[N_HEADS:], bias, wo_h)


def _ffn_block(x, ln, wi, wo):
    h = _rms_normalize(x) * ln
    a = jnp.maximum(_dot(h, wi), 0.0)      # ReLU (T5 DenseReluDense)
    return x + _dot(a, wo)


# ---------------- the fused forward kernel ----------------

def _t5_forward_kernel(
        x_enc_ref, x_dec_ref, enc_kbias_ref, labels_ref, enc_pos_ref, dec_bias_ref,
        e_ln1_ref, e_wqkv_ref, e_wo_ref, e_ln2_ref, e_wi_ref, e_woff_ref, e_fln_ref,
        d_ln1_ref, d_wqkv_ref, d_wo_ref, d_ln2_ref, d_wq_ref, d_wkv_ref, d_woc_ref,
        d_ln3_ref, d_wi_ref, d_woff_ref, d_fln_ref, emb_ref,
        logits_ref, stats_ref):
    # ---------------- encoder ----------------
    x = x_enc_ref[0]                                       # [Ts, D] f32
    enc_bias = enc_pos_ref[...] + enc_kbias_ref[0]         # [H,Ts,Ts] + [1,Ts]
    for l in range(N_LAYERS):                              # statically unrolled
        x = _self_attn_block(x, e_ln1_ref[l], e_wqkv_ref[l], e_wo_ref[l], enc_bias)
        x = _ffn_block(x, e_ln2_ref[l], e_wi_ref[l], e_woff_ref[l])
    mem = _rms_normalize(x) * e_fln_ref[...]               # encoder final RMSNorm (fused)
    memb = jnp.broadcast_to(mem.astype(jnp.bfloat16)[None],
                            (2 * N_HEADS,) + mem.shape)    # hoisted out of dec loop

    # ---------------- decoder ----------------
    y = x_dec_ref[0]                                       # [Tt, D] f32
    dec_self_bias = dec_bias_ref[...]                      # pos bias + causal, [H,Tt,Tt]
    cross_bias = enc_kbias_ref[0]                          # [1, Ts] -> bcast to [H,Tt,Ts]
    for l in range(N_LAYERS):
        y = _self_attn_block(y, d_ln1_ref[l], d_wqkv_ref[l], d_wo_ref[l], dec_self_bias)
        y = _cross_attn_block(y, memb, d_ln2_ref[l], d_wq_ref[l], d_wkv_ref[l],
                              d_woc_ref[l], cross_bias)
        y = _ffn_block(y, d_ln3_ref[l], d_wi_ref[l], d_woff_ref[l])

    # -------- LM head (tied embeddings; d_model^-0.5 pre-folded into d_fln) + NLL --------
    h = _rms_normalize(y) * d_fln_ref[...]                 # [Tt, D]
    z = _dot_tb(h, emb_ref[...])                           # [Tt, V]
    m = jnp.max(z, axis=-1, keepdims=True)
    lse = jnp.log(jnp.sum(jnp.exp(z - m), axis=-1, keepdims=True)) + m
    lab = labels_ref[0]                                    # [Tt, 1] int32
    ids = jax.lax.broadcasted_iota(jnp.int32, z.shape, 1)
    tgt = jnp.sum(jnp.where(ids == lab, z, 0.0), axis=-1, keepdims=True)
    valid = (lab != -100).astype(jnp.float32)              # [Tt, 1]
    nll_sum = jnp.sum((lse - tgt) * valid, axis=0, keepdims=True)   # [1, 1]
    valid_sum = jnp.sum(valid, axis=0, keepdims=True)               # [1, 1]

    logits_ref[0] = z                                      # lane-dense [Tt, V] store
    lane = jax.lax.broadcasted_iota(jnp.int32, (1, STATS_LANES), 1)
    stats_ref[0] = jnp.where(lane == 0, nll_sum,
                             jnp.where(lane == 1, valid_sum, 0.0))


def pallas_t5_forward(params, x_enc, x_dec, enc_kbias, enc_pos, dec_bias, labels3):
    B, _, _ = x_enc.shape
    Tt = x_dec.shape[1]
    V = params['shared'].shape[0]

    def batch_spec(shape):
        nd = len(shape)
        return pl.BlockSpec((1,) + tuple(shape[1:]),
                            lambda b: (b,) + (0,) * (nd - 1))

    def full_spec(arr):
        nd = arr.ndim
        return pl.BlockSpec(tuple(arr.shape), lambda b: (0,) * nd)

    # fold the tied-embedding d_model^-0.5 rescale into the final decoder LN weight
    dec_fln_scaled = params['dec_final_ln'] * (D_MODEL ** -0.5)

    weight_args = (
        params['enc_ln1'], params['enc_wqkv'], params['enc_wo'],
        params['enc_ln2'], params['enc_wi'], params['enc_wo_ff'],
        params['enc_final_ln'],
        params['dec_ln1'], params['dec_wqkv'], params['dec_wo'],
        params['dec_ln2'], params['dec_wq'], params['dec_wkv'], params['dec_wo_c'],
        params['dec_ln3'], params['dec_wi'], params['dec_wo_ff'],
        dec_fln_scaled, params['shared'],
    )

    in_specs = (
        [batch_spec(x_enc.shape), batch_spec(x_dec.shape),
         batch_spec(enc_kbias.shape), batch_spec(labels3.shape),
         full_spec(enc_pos), full_spec(dec_bias)]
        + [full_spec(w) for w in weight_args]
    )

    logits, stats = pl.pallas_call(
        _t5_forward_kernel,
        out_shape=(jax.ShapeDtypeStruct((B, Tt, V), jnp.float32),
                   jax.ShapeDtypeStruct((B, 1, STATS_LANES), jnp.float32)),
        grid=(B,),
        in_specs=in_specs,
        out_specs=(pl.BlockSpec((1, Tt, V), lambda b: (b, 0, 0)),
                   pl.BlockSpec((1, 1, STATS_LANES), lambda b: (b, 0, 0))),
        compiler_params=pltpu.CompilerParams(dimension_semantics=("parallel",)),
    )(x_enc, x_dec, enc_kbias, labels3, enc_pos, dec_bias, *weight_args)
    return logits, stats


# ---------------- JAX glue (T5 structure) ----------------

def relative_position_bucket(relative_position, bidirectional, num_buckets, max_distance):
    relative_buckets = jnp.zeros_like(relative_position)
    if bidirectional:
        num_buckets //= 2
        relative_buckets = relative_buckets + (relative_position > 0).astype(jnp.int32) * num_buckets
        relative_position = jnp.abs(relative_position)
    else:
        relative_position = -jnp.minimum(relative_position, 0)
    max_exact = num_buckets // 2
    is_small = relative_position < max_exact
    rp_f = jnp.maximum(relative_position.astype(jnp.float32), 1.0)
    rel_if_large = max_exact + (
        jnp.log(rp_f / max_exact) / jnp.log(max_distance / max_exact) * (num_buckets - max_exact)
    ).astype(jnp.int32)
    rel_if_large = jnp.minimum(rel_if_large, num_buckets - 1)
    relative_buckets = relative_buckets + jnp.where(is_small, relative_position, rel_if_large)
    return relative_buckets


def compute_position_bias(table, q_len, k_len, bidirectional):
    ctx = jnp.arange(q_len)[:, None]
    mem = jnp.arange(k_len)[None, :]
    rel = mem - ctx
    buckets = relative_position_bucket(rel, bidirectional, REL_BUCKETS, REL_MAX_DIST)
    bias = table[buckets]                    # [Tq, Tk, H]
    return jnp.transpose(bias, (2, 0, 1))    # [H, Tq, Tk]


def t5_forward(params, input_ids, attention_mask, labels):
    """Training-mode forward: returns (loss, logits) like T5ForConditionalGeneration."""
    B, T_src = input_ids.shape
    T_tgt = labels.shape[1]

    # shift labels right -> decoder_input_ids (decoder_start_token_id = pad = 0)
    dec_in = jnp.concatenate(
        [jnp.full((B, 1), DEC_START, jnp.int32), labels[:, :-1]], axis=1)
    dec_in = jnp.where(dec_in == -100, PAD_ID, dec_in)

    # integer glue (embedding gather, bucketing, masks) stays in plain JAX
    x_enc = params['shared'][input_ids]                                          # [B, Ts, D]
    x_dec = params['shared'][dec_in]                                             # [B, Tt, D]
    enc_kbias = (1.0 - attention_mask.astype(jnp.float32))[:, None, :] * NEG_INF  # [B, 1, Ts]
    enc_pos = compute_position_bias(params['enc_rel'], T_src, T_src, bidirectional=True)
    causal = (1.0 - jnp.tril(jnp.ones((T_tgt, T_tgt), jnp.float32)))[None] * NEG_INF
    dec_bias = compute_position_bias(params['dec_rel'], T_tgt, T_tgt, bidirectional=False) + causal
    labels3 = labels.astype(jnp.int32)[:, :, None]                               # [B, Tt, 1]

    logits, stats = pallas_t5_forward(params, x_enc, x_dec, enc_kbias, enc_pos,
                                      dec_bias, labels3)
    loss = jnp.sum(stats[:, 0, 0]) / jnp.maximum(jnp.sum(stats[:, 0, 1]), 1.0)
    return loss, logits


# ---------------- deterministic parameter init (head-stacked layout) ----------------

def init_params(key):
    keys = jax.random.split(key, 32)
    it = iter(keys)

    def nrm(shape, scale):
        return jax.random.normal(next(it), shape, jnp.float32) * scale

    def qkv_stack():
        # T5 init scales; heads on a leading axis -> [L, 3H, D, Dk]
        wq = nrm((N_LAYERS, N_HEADS, D_MODEL, D_KV), (D_MODEL * D_KV) ** -0.5)
        wk = nrm((N_LAYERS, N_HEADS, D_MODEL, D_KV), D_MODEL ** -0.5)
        wv = nrm((N_LAYERS, N_HEADS, D_MODEL, D_KV), D_MODEL ** -0.5)
        return jnp.concatenate([wq, wk, wv], axis=1)

    def kv_stack():
        wk = nrm((N_LAYERS, N_HEADS, D_MODEL, D_KV), D_MODEL ** -0.5)
        wv = nrm((N_LAYERS, N_HEADS, D_MODEL, D_KV), D_MODEL ** -0.5)
        return jnp.concatenate([wk, wv], axis=1)          # [L, 2H, D, Dk]

    ones_ln = lambda: jnp.ones((N_LAYERS, 1, D_MODEL), jnp.float32)

    params = {
        'shared': nrm((VOCAB, D_MODEL), 1.0),
        'enc_rel': nrm((REL_BUCKETS, N_HEADS), 0.05),
        'dec_rel': nrm((REL_BUCKETS, N_HEADS), 0.05),
        # encoder
        'enc_ln1': ones_ln(),
        'enc_wqkv': qkv_stack(),
        'enc_wo': nrm((N_LAYERS, N_HEADS, D_KV, D_MODEL), INNER ** -0.5),
        'enc_ln2': ones_ln(),
        'enc_wi': nrm((N_LAYERS, D_MODEL, D_FF), D_MODEL ** -0.5),
        'enc_wo_ff': nrm((N_LAYERS, D_FF, D_MODEL), D_FF ** -0.5),
        'enc_final_ln': jnp.ones((1, D_MODEL), jnp.float32),
        # decoder
        'dec_ln1': ones_ln(),
        'dec_wqkv': qkv_stack(),
        'dec_wo': nrm((N_LAYERS, N_HEADS, D_KV, D_MODEL), INNER ** -0.5),
        'dec_ln2': ones_ln(),
        'dec_wq': nrm((N_LAYERS, N_HEADS, D_MODEL, D_KV), (D_MODEL * D_KV) ** -0.5),
        'dec_wkv': kv_stack(),
        'dec_wo_c': nrm((N_LAYERS, N_HEADS, D_KV, D_MODEL), INNER ** -0.5),
        'dec_ln3': ones_ln(),
        'dec_wi': nrm((N_LAYERS, D_MODEL, D_FF), D_MODEL ** -0.5),
        'dec_wo_ff': nrm((N_LAYERS, D_FF, D_MODEL), D_FF ** -0.5),
        'dec_final_ln': jnp.ones((1, D_MODEL), jnp.float32),
    }
    return params


if __name__ == "__main__":
    key = jax.random.PRNGKey(0)
    pkey, ikey, lkey = jax.random.split(key, 3)
    params = init_params(pkey)

    B, T_SRC, T_TGT = 2, 8, 8
    input_ids = jax.random.randint(ikey, (B, T_SRC), 1, VOCAB, dtype=jnp.int32)
    attention_mask = jnp.ones((B, T_SRC), jnp.int32).at[1, 6:].set(0)  # pad tail of example 1
    input_ids = jnp.where(attention_mask == 0, PAD_ID, input_ids)
    labels = jax.random.randint(lkey, (B, T_TGT), 1, VOCAB, dtype=jnp.int32)
    labels = labels.at[0, 6:].set(-100)  # ignored positions, like tokenizer pad -> -100

    loss, logits = jax.jit(t5_forward)(params, input_ids, attention_mask, labels)
    jax.block_until_ready((loss, logits))
    assert logits.shape == (B, T_TGT, VOCAB)
    assert jnp.isfinite(loss)
    print("KERNEL_OK")
</pallas_src>

<mosaic_0001>
module attributes {stable_mosaic.version = 11 : i64} {
  func.func @_t5_forward_kernel(%arg0: i32, %arg1: memref<1x8x32xf32, #tpu.memory_space<vmem>>, %arg2: memref<1x8x32xf32, #tpu.memory_space<vmem>>, %arg3: memref<1x1x8xf32, #tpu.memory_space<vmem>>, %arg4: memref<1x8x1xi32, #tpu.memory_space<vmem>>, %arg5: memref<4x8x8xf32, #tpu.memory_space<vmem>>, %arg6: memref<4x8x8xf32, #tpu.memory_space<vmem>>, %arg7: memref<2x1x32xf32, #tpu.memory_space<vmem>>, %arg8: memref<2x12x32x8xf32, #tpu.memory_space<vmem>>, %arg9: memref<2x4x8x32xf32, #tpu.memory_space<vmem>>, %arg10: memref<2x1x32xf32, #tpu.memory_space<vmem>>, %arg11: memref<2x32x64xf32, #tpu.memory_space<vmem>>, %arg12: memref<2x64x32xf32, #tpu.memory_space<vmem>>, %arg13: memref<1x32xf32, #tpu.memory_space<vmem>>, %arg14: memref<2x1x32xf32, #tpu.memory_space<vmem>>, %arg15: memref<2x12x32x8xf32, #tpu.memory_space<vmem>>, %arg16: memref<2x4x8x32xf32, #tpu.memory_space<vmem>>, %arg17: memref<2x1x32xf32, #tpu.memory_space<vmem>>, %arg18: memref<2x4x32x8xf32, #tpu.memory_space<vmem>>, %arg19: memref<2x8x32x8xf32, #tpu.memory_space<vmem>>, %arg20: memref<2x4x8x32xf32, #tpu.memory_space<vmem>>, %arg21: memref<2x1x32xf32, #tpu.memory_space<vmem>>, %arg22: memref<2x32x64xf32, #tpu.memory_space<vmem>>, %arg23: memref<2x64x32xf32, #tpu.memory_space<vmem>>, %arg24: memref<1x32xf32, #tpu.memory_space<vmem>>, %arg25: memref<128x32xf32, #tpu.memory_space<vmem>>, %arg26: memref<1x8x128xf32, #tpu.memory_space<vmem>>, %arg27: memref<1x1x128xf32, #tpu.memory_space<vmem>>) attributes {dimension_semantics = [#tpu.dimension_semantics<parallel>], iteration_bounds = array<i64: 2>, scalar_prefetch = 0 : i64, scratch_operands = 0 : i64, tpu.core_type = #tpu.core_type<tc>, window_params = [{transform_indices = @transform_0, window_bounds = array<i64: 1, 8, 32>}, {transform_indices = @transform_1, window_bounds = array<i64: 1, 8, 32>}, {transform_indices = @transform_2, window_bounds = array<i64: 1, 1, 8>}, {transform_indices = @transform_3, window_bounds = array<i64: 1, 8, 1>}, {pipeline_mode = #tpu.pipeline_mode<synchronous>, transform_indices = @transform_4, window_bounds = array<i64: 4, 8, 8>}, {pipeline_mode = #tpu.pipeline_mode<synchronous>, transform_indices = @transform_5, window_bounds = array<i64: 4, 8, 8>}, {pipeline_mode = #tpu.pipeline_mode<synchronous>, transform_indices = @transform_6, window_bounds = array<i64: 2, 1, 32>}, {pipeline_mode = #tpu.pipeline_mode<synchronous>, transform_indices = @transform_7, window_bounds = array<i64: 2, 12, 32, 8>}, {pipeline_mode = #tpu.pipeline_mode<synchronous>, transform_indices = @transform_8, window_bounds = array<i64: 2, 4, 8, 32>}, {pipeline_mode = #tpu.pipeline_mode<synchronous>, transform_indices = @transform_9, window_bounds = array<i64: 2, 1, 32>}, {pipeline_mode = #tpu.pipeline_mode<synchronous>, transform_indices = @transform_10, window_bounds = array<i64: 2, 32, 64>}, {pipeline_mode = #tpu.pipeline_mode<synchronous>, transform_indices = @transform_11, window_bounds = array<i64: 2, 64, 32>}, {pipeline_mode = #tpu.pipeline_mode<synchronous>, transform_indices = @transform_12, window_bounds = array<i64: 1, 32>}, {pipeline_mode = #tpu.pipeline_mode<synchronous>, transform_indices = @transform_13, window_bounds = array<i64: 2, 1, 32>}, {pipeline_mode = #tpu.pipeline_mode<synchronous>, transform_indices = @transform_14, window_bounds = array<i64: 2, 12, 32, 8>}, {pipeline_mode = #tpu.pipeline_mode<synchronous>, transform_indices = @transform_15, window_bounds = array<i64: 2, 4, 8, 32>}, {pipeline_mode = #tpu.pipeline_mode<synchronous>, transform_indices = @transform_16, window_bounds = array<i64: 2, 1, 32>}, {pipeline_mode = #tpu.pipeline_mode<synchronous>, transform_indices = @transform_17, window_bounds = array<i64: 2, 4, 32, 8>}, {pipeline_mode = #tpu.pipeline_mode<synchronous>, transform_indices = @transform_18, window_bounds = array<i64: 2, 8, 32, 8>}, {pipeline_mode = #tpu.pipeline_mode<synchronous>, transform_indices = @transform_19, window_bounds = array<i64: 2, 4, 8, 32>}, {pipeline_mode = #tpu.pipeline_mode<synchronous>, transform_indices = @transform_20, window_bounds = array<i64: 2, 1, 32>}, {pipeline_mode = #tpu.pipeline_mode<synchronous>, transform_indices = @transform_21, window_bounds = array<i64: 2, 32, 64>}, {pipeline_mode = #tpu.pipeline_mode<synchronous>, transform_indices = @transform_22, window_bounds = array<i64: 2, 64, 32>}, {pipeline_mode = #tpu.pipeline_mode<synchronous>, transform_indices = @transform_23, window_bounds = array<i64: 1, 32>}, {pipeline_mode = #tpu.pipeline_mode<synchronous>, transform_indices = @transform_24, window_bounds = array<i64: 128, 32>}, {transform_indices = @transform_25, window_bounds = array<i64: 1, 8, 128>}, {transform_indices = @transform_26, window_bounds = array<i64: 1, 1, 128>}]} {
    %c0 = arith.constant 0 : index
    %c0_0 = arith.constant 0 : index
    %c0_1 = arith.constant 0 : index
    %0 = vector.load %arg1[%c0, %c0_0, %c0_1] : memref<1x8x32xf32, #tpu.memory_space<vmem>>, vector<1x8x32xf32>
    %1 = vector.shape_cast %0 : vector<1x8x32xf32> to vector<8x32xf32>
    %c0_2 = arith.constant 0 : index
    %c0_3 = arith.constant 0 : index
    %c0_4 = arith.constant 0 : index
    %2 = vector.load %arg5[%c0_2, %c0_3, %c0_4] : memref<4x8x8xf32, #tpu.memory_space<vmem>>, vector<4x8x8xf32>
    %c0_5 = arith.constant 0 : index
    %c0_6 = arith.constant 0 : index
    %c0_7 = arith.constant 0 : index
    %3 = vector.load %arg3[%c0_5, %c0_6, %c0_7] : memref<1x1x8xf32, #tpu.memory_space<vmem>>, vector<1x1x8xf32>
    %4 = vector.shape_cast %3 : vector<1x1x8xf32> to vector<1x8xf32>
    %5 = vector.shape_cast %4 : vector<1x8xf32> to vector<1x1x8xf32>
    %6 = vector.broadcast %5 : vector<1x1x8xf32> to vector<4x8x8xf32>
    %7 = arith.addf %2, %6 : vector<4x8x8xf32>
    %c0_8 = arith.constant 0 : index
    %c0_9 = arith.constant 0 : index
    %c0_10 = arith.constant 0 : index
    %8 = vector.load %arg7[%c0_8, %c0_9, %c0_10] : memref<2x1x32xf32, #tpu.memory_space<vmem>>, vector<1x1x32xf32>
    %9 = vector.shape_cast %8 : vector<1x1x32xf32> to vector<1x32xf32>
    %c0_11 = arith.constant 0 : index
    %c0_12 = arith.constant 0 : index
    %c0_13 = arith.constant 0 : index
    %c0_14 = arith.constant 0 : index
    %10 = vector.load %arg8[%c0_11, %c0_12, %c0_13, %c0_14] : memref<2x12x32x8xf32, #tpu.memory_space<vmem>>, vector<1x12x32x8xf32>
    %11 = vector.shape_cast %10 : vector<1x12x32x8xf32> to vector<12x32x8xf32>
    %c0_15 = arith.constant 0 : index
    %c0_16 = arith.constant 0 : index
    %c0_17 = arith.constant 0 : index
    %c0_18 = arith.constant 0 : index
    %12 = vector.load %arg9[%c0_15, %c0_16, %c0_17, %c0_18] : memref<2x4x8x32xf32, #tpu.memory_space<vmem>>, vector<1x4x8x32xf32>
    %13 = vector.shape_cast %12 : vector<1x4x8x32xf32> to vector<4x8x32xf32>
    %14 = arith.mulf %1, %1 : vector<8x32xf32>
    %cst = arith.constant dense<0.000000e+00> : vector<8xf32>
    %15 = vector.multi_reduction <add>, %14, %cst [1] : vector<8x32xf32> to vector<8xf32>
    %16 = vector.shape_cast %15 : vector<8xf32> to vector<8x1xf32>
    %cst_19 = arith.constant 3.200000e+01 : f32
    %17 = vector.broadcast %cst_19 : f32 to vector<8x1xf32>
    %18 = arith.divf %16, %17 : vector<8x1xf32>
    %cst_20 = arith.constant 9.99999997E-7 : f32
    %19 = vector.broadcast %cst_20 : f32 to vector<8x1xf32>
    %20 = arith.addf %18, %19 : vector<8x1xf32>
    %21 = math.rsqrt %20 : vector<8x1xf32>
    %22 = vector.broadcast %21 : vector<8x1xf32> to vector<8x32xf32>
    %23 = arith.mulf %1, %22 : vector<8x32xf32>
    %24 = vector.broadcast %9 : vector<1x32xf32> to vector<8x32xf32>
    %25 = arith.mulf %23, %24 : vector<8x32xf32>
    %26 = arith.truncf %25 : vector<8x32xf32> to vector<8x32xbf16>
    %27 = vector.shape_cast %26 : vector<8x32xbf16> to vector<1x8x32xbf16>
    %28 = vector.shape_cast %27 : vector<1x8x32xbf16> to vector<1x8x32xbf16>
    %29 = vector.broadcast %28 : vector<1x8x32xbf16> to vector<12x8x32xbf16>
    %30 = arith.truncf %11 : vector<12x32x8xf32> to vector<12x32x8xbf16>
    %cst_21 = arith.constant dense<0.000000e+00> : vector<12x8x8xf32>
    %31 = tpu.matmul %29, %30, %cst_21 {dimension_numbers = #tpu.dot_dimension_numbers<[2], [1], [1], [2], [0, 0, 0, 1, 1, 2], [0], [0]>} : vector<12x8x32xbf16>, vector<12x32x8xbf16>, vector<12x8x8xf32> -> vector<12x8x8xf32>
    %32 = vector.extract_strided_slice %31 {offsets = [0, 0, 0], sizes = [4, 8, 8], strides = [1, 1, 1]} : vector<12x8x8xf32> to vector<4x8x8xf32>
    %33 = vector.extract_strided_slice %31 {offsets = [4, 0, 0], sizes = [4, 8, 8], strides = [1, 1, 1]} : vector<12x8x8xf32> to vector<4x8x8xf32>
    %34 = vector.extract_strided_slice %31 {offsets = [8, 0, 0], sizes = [4, 8, 8], strides = [1, 1, 1]} : vector<12x8x8xf32> to vector<4x8x8xf32>
    %35 = arith.truncf %32 : vector<4x8x8xf32> to vector<4x8x8xbf16>
    %36 = arith.truncf %33 : vector<4x8x8xf32> to vector<4x8x8xbf16>
    %cst_22 = arith.constant dense<0.000000e+00> : vector<4x8x8xf32>
    %37 = tpu.matmul %35, %36, %cst_22 {dimension_numbers = #tpu.dot_dimension_numbers<[2], [2], [1], [1], [0, 0, 0, 1, 1, 1], [0], [0]>} : vector<4x8x8xbf16>, vector<4x8x8xbf16>, vector<4x8x8xf32> -> vector<4x8x8xf32>
    %38 = arith.addf %37, %7 : vector<4x8x8xf32>
    %cst_23 = arith.constant dense<0xFF800000> : vector<4x8xf32>
    %39 = vector.multi_reduction <maximumf>, %38, %cst_23 [2] : vector<4x8x8xf32> to vector<4x8xf32>
    %40 = vector.shape_cast %39 : vector<4x8xf32> to vector<4x8x1xf32>
    %41 = vector.broadcast %40 : vector<4x8x1xf32> to vector<4x8x8xf32>
    %42 = arith.subf %38, %41 : vector<4x8x8xf32>
    %43 = math.exp %42 : vector<4x8x8xf32>
    %cst_24 = arith.constant dense<0.000000e+00> : vector<4x8xf32>
    %44 = vector.multi_reduction <add>, %43, %cst_24 [2] : vector<4x8x8xf32> to vector<4x8xf32>
    %45 = vector.shape_cast %44 : vector<4x8xf32> to vector<4x8x1xf32>
    %46 = tpu.reciprocal %45 {approx = true} : vector<4x8x1xf32> -> vector<4x8x1xf32>
    %47 = vector.broadcast %46 : vector<4x8x1xf32> to vector<4x8x8xf32>
    %48 = arith.mulf %43, %47 : vector<4x8x8xf32>
    %49 = arith.truncf %48 : vector<4x8x8xf32> to vector<4x8x8xbf16>
    %50 = arith.truncf %34 : vector<4x8x8xf32> to vector<4x8x8xbf16>
    %cst_25 = arith.constant dense<0.000000e+00> : vector<4x8x8xf32>
    %51 = tpu.matmul %49, %50, %cst_25 {dimension_numbers = #tpu.dot_dimension_numbers<[2], [1], [1], [2], [0, 0, 0, 1, 1, 2], [0], [0]>} : vector<4x8x8xbf16>, vector<4x8x8xbf16>, vector<4x8x8xf32> -> vector<4x8x8xf32>
    %52 = arith.truncf %51 : vector<4x8x8xf32> to vector<4x8x8xbf16>
    %53 = arith.truncf %13 : vector<4x8x32xf32> to vector<4x8x32xbf16>
    %cst_26 = arith.constant dense<0.000000e+00> : vector<4x8x32xf32>
    %54 = tpu.matmul %52, %53, %cst_26 {dimension_numbers = #tpu.dot_dimension_numbers<[2], [1], [1], [2], [0, 0, 0, 1, 1, 2], [0], [0]>} : vector<4x8x8xbf16>, vector<4x8x32xbf16>, vector<4x8x32xf32> -> vector<4x8x32xf32>
    %cst_27 = arith.constant dense<0.000000e+00> : vector<8x32xf32>
    %55 = vector.multi_reduction <add>, %54, %cst_27 [0] : vector<4x8x32xf32> to vector<8x32xf32>
    %56 = arith.addf %1, %55 : vector<8x32xf32>
    %c0_28 = arith.constant 0 : index
    %c0_29 = arith.constant 0 : index
    %c0_30 = arith.constant 0 : index
    %57 = vector.load %arg10[%c0_28, %c0_29, %c0_30] : memref<2x1x32xf32, #tpu.memory_space<vmem>>, vector<1x1x32xf32>
    %58 = vector.shape_cast %57 : vector<1x1x32xf32> to vector<1x32xf32>
    %c0_31 = arith.constant 0 : index
    %c0_32 = arith.constant 0 : index
    %c0_33 = arith.constant 0 : index
    %59 = vector.load %arg11[%c0_31, %c0_32, %c0_33] : memref<2x32x64xf32, #tpu.memory_space<vmem>>, vector<1x32x64xf32>
    %60 = vector.shape_cast %59 : vector<1x32x64xf32> to vector<32x64xf32>
    %c0_34 = arith.constant 0 : index
    %c0_35 = arith.constant 0 : index
    %c0_36 = arith.constant 0 : index
    %61 = vector.load %arg12[%c0_34, %c0_35, %c0_36] : memref<2x64x32xf32, #tpu.memory_space<vmem>>, vector<1x64x32xf32>
    %62 = vector.shape_cast %61 : vector<1x64x32xf32> to vector<64x32xf32>
    %63 = arith.mulf %56, %56 : vector<8x32xf32>
    %cst_37 = arith.constant dense<0.000000e+00> : vector<8xf32>
    %64 = vector.multi_reduction <add>, %63, %cst_37 [1] : vector<8x32xf32> to vector<8xf32>
    %65 = vector.shape_cast %64 : vector<8xf32> to vector<8x1xf32>
    %cst_38 = arith.constant 3.200000e+01 : f32
    %66 = vector.broadcast %cst_38 : f32 to vector<8x1xf32>
    %67 = arith.divf %65, %66 : vector<8x1xf32>
    %cst_39 = arith.constant 9.99999997E-7 : f32
    %68 = vector.broadcast %cst_39 : f32 to vector<8x1xf32>
    %69 = arith.addf %67, %68 : vector<8x1xf32>
    %70 = math.rsqrt %69 : vector<8x1xf32>
    %71 = vector.broadcast %70 : vector<8x1xf32> to vector<8x32xf32>
    %72 = arith.mulf %56, %71 : vector<8x32xf32>
    %73 = vector.broadcast %58 : vector<1x32xf32> to vector<8x32xf32>
    %74 = arith.mulf %72, %73 : vector<8x32xf32>
    %75 = arith.truncf %74 : vector<8x32xf32> to vector<8x32xbf16>
    %76 = arith.truncf %60 : vector<32x64xf32> to vector<32x64xbf16>
    %cst_40 = arith.constant dense<0.000000e+00> : vector<8x64xf32>
    %77 = tpu.matmul %75, %76, %cst_40 {dimension_numbers = #tpu.dot_dimension_numbers<[1], [0], [0], [1], [0, 0, 1, 1], [], []>} : vector<8x32xbf16>, vector<32x64xbf16>, vector<8x64xf32> -> vector<8x64xf32>
    %cst_41 = arith.constant 0.000000e+00 : f32
    %78 = vector.broadcast %cst_41 : f32 to vector<8x64xf32>
    %79 = arith.maximumf %77, %78 : vector<8x64xf32>
    %80 = arith.truncf %79 : vector<8x64xf32> to vector<8x64xbf16>
    %81 = arith.truncf %62 : vector<64x32xf32> to vector<64x32xbf16>
    %cst_42 = arith.constant dense<0.000000e+00> : vector<8x32xf32>
    %82 = tpu.matmul %80, %81, %cst_42 {dimension_numbers = #tpu.dot_dimension_numbers<[1], [0], [0], [1], [0, 0, 1, 1], [], []>} : vector<8x64xbf16>, vector<64x32xbf16>, vector<8x32xf32> -> vector<8x32xf32>
    %83 = arith.addf %56, %82 : vector<8x32xf32>
    %c1 = arith.constant 1 : index
    %c0_43 = arith.constant 0 : index
    %c0_44 = arith.constant 0 : index
    %84 = vector.load %arg7[%c1, %c0_43, %c0_44] : memref<2x1x32xf32, #tpu.memory_space<vmem>>, vector<1x1x32xf32>
    %85 = vector.shape_cast %84 : vector<1x1x32xf32> to vector<1x32xf32>
    %c1_45 = arith.constant 1 : index
    %c0_46 = arith.constant 0 : index
    %c0_47 = arith.constant 0 : index
    %c0_48 = arith.constant 0 : index
    %86 = vector.load %arg8[%c1_45, %c0_46, %c0_47, %c0_48] : memref<2x12x32x8xf32, #tpu.memory_space<vmem>>, vector<1x12x32x8xf32>
    %87 = vector.shape_cast %86 : vector<1x12x32x8xf32> to vector<12x32x8xf32>
    %c1_49 = arith.constant 1 : index
    %c0_50 = arith.constant 0 : index
    %c0_51 = arith.constant 0 : index
    %c0_52 = arith.constant 0 : index
    %88 = vector.load %arg9[%c1_49, %c0_50, %c0_51, %c0_52] : memref<2x4x8x32xf32, #tpu.memory_space<vmem>>, vector<1x4x8x32xf32>
    %89 = vector.shape_cast %88 : vector<1x4x8x32xf32> to vector<4x8x32xf32>
    %90 = arith.mulf %83, %83 : vector<8x32xf32>
    %cst_53 = arith.constant dense<0.000000e+00> : vector<8xf32>
    %91 = vector.multi_reduction <add>, %90, %cst_53 [1] : vector<8x32xf32> to vector<8xf32>
    %92 = vector.shape_cast %91 : vector<8xf32> to vector<8x1xf32>
    %cst_54 = arith.constant 3.200000e+01 : f32
    %93 = vector.broadcast %cst_54 : f32 to vector<8x1xf32>
    %94 = arith.divf %92, %93 : vector<8x1xf32>
    %cst_55 = arith.constant 9.99999997E-7 : f32
    %95 = vector.broadcast %cst_55 : f32 to vector<8x1xf32>
    %96 = arith.addf %94, %95 : vector<8x1xf32>
    %97 = math.rsqrt %96 : vector<8x1xf32>
    %98 = vector.broadcast %97 : vector<8x1xf32> to vector<8x32xf32>
    %99 = arith.mulf %83, %98 : vector<8x32xf32>
    %100 = vector.broadcast %85 : vector<1x32xf32> to vector<8x32xf32>
    %101 = arith.mulf %99, %100 : vector<8x32xf32>
    %102 = arith.truncf %101 : vector<8x32xf32> to vector<8x32xbf16>
    %103 = vector.shape_cast %102 : vector<8x32xbf16> to vector<1x8x32xbf16>
    %104 = vector.shape_cast %103 : vector<1x8x32xbf16> to vector<1x8x32xbf16>
    %105 = vector.broadcast %104 : vector<1x8x32xbf16> to vector<12x8x32xbf16>
    %106 = arith.truncf %87 : vector<12x32x8xf32> to vector<12x32x8xbf16>
    %cst_56 = arith.constant dense<0.000000e+00> : vector<12x8x8xf32>
    %107 = tpu.matmul %105, %106, %cst_56 {dimension_numbers = #tpu.dot_dimension_numbers<[2], [1], [1], [2], [0, 0, 0, 1, 1, 2], [0], [0]>} : vector<12x8x32xbf16>, vector<12x32x8xbf16>, vector<12x8x8xf32> -> vector<12x8x8xf32>
    %108 = vector.extract_strided_slice %107 {offsets = [0, 0, 0], sizes = [4, 8, 8], strides = [1, 1, 1]} : vector<12x8x8xf32> to vector<4x8x8xf32>
    %109 = vector.extract_strided_slice %107 {offsets = [4, 0, 0], sizes = [4, 8, 8], strides = [1, 1, 1]} : vector<12x8x8xf32> to vector<4x8x8xf32>
    %110 = vector.extract_strided_slice %107 {offsets = [8, 0, 0], sizes = [4, 8, 8], strides = [1, 1, 1]} : vector<12x8x8xf32> to vector<4x8x8xf32>
    %111 = arith.truncf %108 : vector<4x8x8xf32> to vector<4x8x8xbf16>
    %112 = arith.truncf %109 : vector<4x8x8xf32> to vector<4x8x8xbf16>
    %cst_57 = arith.constant dense<0.000000e+00> : vector<4x8x8xf32>
    %113 = tpu.matmul %111, %112, %cst_57 {dimension_numbers = #tpu.dot_dimension_numbers<[2], [2], [1], [1], [0, 0, 0, 1, 1, 1], [0], [0]>} : vector<4x8x8xbf16>, vector<4x8x8xbf16>, vector<4x8x8xf32> -> vector<4x8x8xf32>
    %114 = arith.addf %113, %7 : vector<4x8x8xf32>
    %cst_58 = arith.constant dense<0xFF800000> : vector<4x8xf32>
    %115 = vector.multi_reduction <maximumf>, %114, %cst_58 [2] : vector<4x8x8xf32> to vector<4x8xf32>
    %116 = vector.shape_cast %115 : vector<4x8xf32> to vector<4x8x1xf32>
    %117 = vector.broadcast %116 : vector<4x8x1xf32> to vector<4x8x8xf32>
    %118 = arith.subf %114, %117 : vector<4x8x8xf32>
    %119 = math.exp %118 : vector<4x8x8xf32>
    %cst_59 = arith.constant dense<0.000000e+00> : vector<4x8xf32>
    %120 = vector.multi_reduction <add>, %119, %cst_59 [2] : vector<4x8x8xf32> to vector<4x8xf32>
    %121 = vector.shape_cast %120 : vector<4x8xf32> to vector<4x8x1xf32>
    %122 = tpu.reciprocal %121 {approx = true} : vector<4x8x1xf32> -> vector<4x8x1xf32>
    %123 = vector.broadcast %122 : vector<4x8x1xf32> to vector<4x8x8xf32>
    %124 = arith.mulf %119, %123 : vector<4x8x8xf32>
    %125 = arith.truncf %124 : vector<4x8x8xf32> to vector<4x8x8xbf16>
    %126 = arith.truncf %110 : vector<4x8x8xf32> to vector<4x8x8xbf16>
    %cst_60 = arith.constant dense<0.000000e+00> : vector<4x8x8xf32>
    %127 = tpu.matmul %125, %126, %cst_60 {dimension_numbers = #tpu.dot_dimension_numbers<[2], [1], [1], [2], [0, 0, 0, 1, 1, 2], [0], [0]>} : vector<4x8x8xbf16>, vector<4x8x8xbf16>, vector<4x8x8xf32> -> vector<4x8x8xf32>
    %128 = arith.truncf %127 : vector<4x8x8xf32> to vector<4x8x8xbf16>
    %129 = arith.truncf %89 : vector<4x8x32xf32> to vector<4x8x32xbf16>
    %cst_61 = arith.constant dense<0.000000e+00> : vector<4x8x32xf32>
    %130 = tpu.matmul %128, %129, %cst_61 {dimension_numbers = #tpu.dot_dimension_numbers<[2], [1], [1], [2], [0, 0, 0, 1, 1, 2], [0], [0]>} : vector<4x8x8xbf16>, vector<4x8x32xbf16>, vector<4x8x32xf32> -> vector<4x8x32xf32>
    %cst_62 = arith.constant dense<0.000000e+00> : vector<8x32xf32>
    %131 = vector.multi_reduction <add>, %130, %cst_62 [0] : vector<4x8x32xf32> to vector<8x32xf32>
    %132 = arith.addf %83, %131 : vector<8x32xf32>
    %c1_63 = arith.constant 1 : index
    %c0_64 = arith.constant 0 : index
    %c0_65 = arith.constant 0 : index
    %133 = vector.load %arg10[%c1_63, %c0_64, %c0_65] : memref<2x1x32xf32, #tpu.memory_space<vmem>>, vector<1x1x32xf32>
    %134 = vector.shape_cast %133 : vector<1x1x32xf32> to vector<1x32xf32>
    %c1_66 = arith.constant 1 : index
    %c0_67 = arith.constant 0 : index
    %c0_68 = arith.constant 0 : index
    %135 = vector.load %arg11[%c1_66, %c0_67, %c0_68] : memref<2x32x64xf32, #tpu.memory_space<vmem>>, vector<1x32x64xf32>
    %136 = vector.shape_cast %135 : vector<1x32x64xf32> to vector<32x64xf32>
    %c1_69 = arith.constant 1 : index
    %c0_70 = arith.constant 0 : index
    %c0_71 = arith.constant 0 : index
    %137 = vector.load %arg12[%c1_69, %c0_70, %c0_71] : memref<2x64x32xf32, #tpu.memory_space<vmem>>, vector<1x64x32xf32>
    %138 = vector.shape_cast %137 : vector<1x64x32xf32> to vector<64x32xf32>
    %139 = arith.mulf %132, %132 : vector<8x32xf32>
    %cst_72 = arith.constant dense<0.000000e+00> : vector<8xf32>
    %140 = vector.multi_reduction <add>, %139, %cst_72 [1] : vector<8x32xf32> to vector<8xf32>
    %141 = vector.shape_cast %140 : vector<8xf32> to vector<8x1xf32>
    %cst_73 = arith.constant 3.200000e+01 : f32
    %142 = vector.broadcast %cst_73 : f32 to vector<8x1xf32>
    %143 = arith.divf %141, %142 : vector<8x1xf32>
    %cst_74 = arith.constant 9.99999997E-7 : f32
    %144 = vector.broadcast %cst_74 : f32 to vector<8x1xf32>
    %145 = arith.addf %143, %144 : vector<8x1xf32>
    %146 = math.rsqrt %145 : vector<8x1xf32>
    %147 = vector.broadcast %146 : vector<8x1xf32> to vector<8x32xf32>
    %148 = arith.mulf %132, %147 : vector<8x32xf32>
    %149 = vector.broadcast %134 : vector<1x32xf32> to vector<8x32xf32>
    %150 = arith.mulf %148, %149 : vector<8x32xf32>
    %151 = arith.truncf %150 : vector<8x32xf32> to vector<8x32xbf16>
    %152 = arith.truncf %136 : vector<32x64xf32> to vector<32x64xbf16>
    %cst_75 = arith.constant dense<0.000000e+00> : vector<8x64xf32>
    %153 = tpu.matmul %151, %152, %cst_75 {dimension_numbers = #tpu.dot_dimension_numbers<[1], [0], [0], [1], [0, 0, 1, 1], [], []>} : vector<8x32xbf16>, vector<32x64xbf16>, vector<8x64xf32> -> vector<8x64xf32>
    %cst_76 = arith.constant 0.000000e+00 : f32
    %154 = vector.broadcast %cst_76 : f32 to vector<8x64xf32>
    %155 = arith.maximumf %153, %154 : vector<8x64xf32>
    %156 = arith.truncf %155 : vector<8x64xf32> to vector<8x64xbf16>
    %157 = arith.truncf %138 : vector<64x32xf32> to vector<64x32xbf16>
    %cst_77 = arith.constant dense<0.000000e+00> : vector<8x32xf32>
    %158 = tpu.matmul %156, %157, %cst_77 {dimension_numbers = #tpu.dot_dimension_numbers<[1], [0], [0], [1], [0, 0, 1, 1], [], []>} : vector<8x64xbf16>, vector<64x32xbf16>, vector<8x32xf32> -> vector<8x32xf32>
    %159 = arith.addf %132, %158 : vector<8x32xf32>
    %160 = arith.mulf %159, %159 : vector<8x32xf32>
    %cst_78 = arith.constant dense<0.000000e+00> : vector<8xf32>
    %161 = vector.multi_reduction <add>, %160, %cst_78 [1] : vector<8x32xf32> to vector<8xf32>
    %162 = vector.shape_cast %161 : vector<8xf32> to vector<8x1xf32>
    %cst_79 = arith.constant 3.200000e+01 : f32
    %163 = vector.broadcast %cst_79 : f32 to vector<8x1xf32>
    %164 = arith.divf %162, %163 : vector<8x1xf32>
    %cst_80 = arith.constant 9.99999997E-7 : f32
    %165 = vector.broadcast %cst_80 : f32 to vector<8x1xf32>
    %166 = arith.addf %164, %165 : vector<8x1xf32>
    %167 = math.rsqrt %166 : vector<8x1xf32>
    %168 = vector.broadcast %167 : vector<8x1xf32> to vector<8x32xf32>
    %169 = arith.mulf %159, %168 : vector<8x32xf32>
    %c0_81 = arith.constant 0 : index
    %c0_82 = arith.constant 0 : index
    %170 = vector.load %arg13[%c0_81, %c0_82] : memref<1x32xf32, #tpu.memory_space<vmem>>, vector<1x32xf32>
    %171 = vector.broadcast %170 : vector<1x32xf32> to vector<8x32xf32>
    %172 = arith.mulf %169, %171 : vector<8x32xf32>
    %173 = arith.truncf %172 : vector<8x32xf32> to vector<8x32xbf16>
    %174 = vector.shape_cast %173 : vector<8x32xbf16> to vector<1x8x32xbf16>
    %175 = vector.shape_cast %174 : vector<1x8x32xbf16> to vector<1x8x32xbf16>
    %176 = vector.broadcast %175 : vector<1x8x32xbf16> to vector<8x8x32xbf16>
    %c0_83 = arith.constant 0 : index
    %c0_84 = arith.constant 0 : index
    %c0_85 = arith.constant 0 : index
    %177 = vector.load %arg2[%c0_83, %c0_84, %c0_85] : memref<1x8x32xf32, #tpu.memory_space<vmem>>, vector<1x8x32xf32>
    %178 = vector.shape_cast %177 : vector<1x8x32xf32> to vector<8x32xf32>
    %c0_86 = arith.constant 0 : index
    %c0_87 = arith.constant 0 : index
    %c0_88 = arith.constant 0 : index
    %179 = vector.load %arg6[%c0_86, %c0_87, %c0_88] : memref<4x8x8xf32, #tpu.memory_space<vmem>>, vector<4x8x8xf32>
    %c0_89 = arith.constant 0 : index
    %c0_90 = arith.constant 0 : index
    %c0_91 = arith.constant 0 : index
    %180 = vector.load %arg3[%c0_89, %c0_90, %c0_91] : memref<1x1x8xf32, #tpu.memory_space<vmem>>, vector<1x1x8xf32>
    %181 = vector.shape_cast %180 : vector<1x1x8xf32> to vector<1x8xf32>
    %c0_92 = arith.constant 0 : index
    %c0_93 = arith.constant 0 : index
    %c0_94 = arith.constant 0 : index
    %182 = vector.load %arg14[%c0_92, %c0_93, %c0_94] : memref<2x1x32xf32, #tpu.memory_space<vmem>>, vector<1x1x32xf32>
    %183 = vector.shape_cast %182 : vector<1x1x32xf32> to vector<1x32xf32>
    %c0_95 = arith.constant 0 : index
    %c0_96 = arith.constant 0 : index
    %c0_97 = arith.constant 0 : index
    %c0_98 = arith.constant 0 : index
    %184 = vector.load %arg15[%c0_95, %c0_96, %c0_97, %c0_98] : memref<2x12x32x8xf32, #tpu.memory_space<vmem>>, vector<1x12x32x8xf32>
    %185 = vector.shape_cast %184 : vector<1x12x32x8xf32> to vector<12x32x8xf32>
    %c0_99 = arith.constant 0 : index
    %c0_100 = arith.constant 0 : index
    %c0_101 = arith.constant 0 : index
    %c0_102 = arith.constant 0 : index
    %186 = vector.load %arg16[%c0_99, %c0_100, %c0_101, %c0_102] : memref<2x4x8x32xf32, #tpu.memory_space<vmem>>, vector<1x4x8x32xf32>
    %187 = vector.shape_cast %186 : vector<1x4x8x32xf32> to vector<4x8x32xf32>
    %188 = arith.mulf %178, %178 : vector<8x32xf32>
    %cst_103 = arith.constant dense<0.000000e+00> : vector<8xf32>
    %189 = vector.multi_reduction <add>, %188, %cst_103 [1] : vector<8x32xf32> to vector<8xf32>
    %190 = vector.shape_cast %189 : vector<8xf32> to vector<8x1xf32>
    %cst_104 = arith.constant 3.200000e+01 : f32
    %191 = vector.broadcast %cst_104 : f32 to vector<8x1xf32>
    %192 = arith.divf %190, %191 : vector<8x1xf32>
    %cst_105 = arith.constant 9.99999997E-7 : f32
    %193 = vector.broadcast %cst_105 : f32 to vector<8x1xf32>
    %194 = arith.addf %192, %193 : vector<8x1xf32>
    %195 = math.rsqrt %194 : vector<8x1xf32>
    %196 = vector.broadcast %195 : vector<8x1xf32> to vector<8x32xf32>
    %197 = arith.mulf %178, %196 : vector<8x32xf32>
    %198 = vector.broadcast %183 : vector<1x32xf32> to vector<8x32xf32>
    %199 = arith.mulf %197, %198 : vector<8x32xf32>
    %200 = arith.truncf %199 : vector<8x32xf32> to vector<8x32xbf16>
    %201 = vector.shape_cast %200 : vector<8x32xbf16> to vector<1x8x32xbf16>
    %202 = vector.shape_cast %201 : vector<1x8x32xbf16> to vector<1x8x32xbf16>
    %203 = vector.broadcast %202 : vector<1x8x32xbf16> to vector<12x8x32xbf16>
    %204 = arith.truncf %185 : vector<12x32x8xf32> to vector<12x32x8xbf16>
    %cst_106 = arith.constant dense<0.000000e+00> : vector<12x8x8xf32>
    %205 = tpu.matmul %203, %204, %cst_106 {dimension_numbers = #tpu.dot_dimension_numbers<[2], [1], [1], [2], [0, 0, 0, 1, 1, 2], [0], [0]>} : vector<12x8x32xbf16>, vector<12x32x8xbf16>, vector<12x8x8xf32> -> vector<12x8x8xf32>
    %206 = vector.extract_strided_slice %205 {offsets = [0, 0, 0], sizes = [4, 8, 8], strides = [1, 1, 1]} : vector<12x8x8xf32> to vector<4x8x8xf32>
    %207 = vector.extract_strided_slice %205 {offsets = [4, 0, 0], sizes = [4, 8, 8], strides = [1, 1, 1]} : vector<12x8x8xf32> to vector<4x8x8xf32>
    %208 = vector.extract_strided_slice %205 {offsets = [8, 0, 0], sizes = [4, 8, 8], strides = [1, 1, 1]} : vector<12x8x8xf32> to vector<4x8x8xf32>
    %209 = arith.truncf %206 : vector<4x8x8xf32> to vector<4x8x8xbf16>
    %210 = arith.truncf %207 : vector<4x8x8xf32> to vector<4x8x8xbf16>
    %cst_107 = arith.constant dense<0.000000e+00> : vector<4x8x8xf32>
    %211 = tpu.matmul %209, %210, %cst_107 {dimension_numbers = #tpu.dot_dimension_numbers<[2], [2], [1], [1], [0, 0, 0, 1, 1, 1], [0], [0]>} : vector<4x8x8xbf16>, vector<4x8x8xbf16>, vector<4x8x8xf32> -> vector<4x8x8xf32>
    %212 = arith.addf %211, %179 : vector<4x8x8xf32>
    %cst_108 = arith.constant dense<0xFF800000> : vector<4x8xf32>
    %213 = vector.multi_reduction <maximumf>, %212, %cst_108 [2] : vector<4x8x8xf32> to vector<4x8xf32>
    %214 = vector.shape_cast %213 : vector<4x8xf32> to vector<4x8x1xf32>
    %215 = vector.broadcast %214 : vector<4x8x1xf32> to vector<4x8x8xf32>
    %216 = arith.subf %212, %215 : vector<4x8x8xf32>
    %217 = math.exp %216 : vector<4x8x8xf32>
    %cst_109 = arith.constant dense<0.000000e+00> : vector<4x8xf32>
    %218 = vector.multi_reduction <add>, %217, %cst_109 [2] : vector<4x8x8xf32> to vector<4x8xf32>
    %219 = vector.shape_cast %218 : vector<4x8xf32> to vector<4x8x1xf32>
    %220 = tpu.reciprocal %219 {approx = true} : vector<4x8x1xf32> -> vector<4x8x1xf32>
    %221 = vector.broadcast %220 : vector<4x8x1xf32> to vector<4x8x8xf32>
    %222 = arith.mulf %217, %221 : vector<4x8x8xf32>
    %223 = arith.truncf %222 : vector<4x8x8xf32> to vector<4x8x8xbf16>
    %224 = arith.truncf %208 : vector<4x8x8xf32> to vector<4x8x8xbf16>
    %cst_110 = arith.constant dense<0.000000e+00> : vector<4x8x8xf32>
    %225 = tpu.matmul %223, %224, %cst_110 {dimension_numbers = #tpu.dot_dimension_numbers<[2], [1], [1], [2], [0, 0, 0, 1, 1, 2], [0], [0]>} : vector<4x8x8xbf16>, vector<4x8x8xbf16>, vector<4x8x8xf32> -> vector<4x8x8xf32>
    %226 = arith.truncf %225 : vector<4x8x8xf32> to vector<4x8x8xbf16>
    %227 = arith.truncf %187 : vector<4x8x32xf32> to vector<4x8x32xbf16>
    %cst_111 = arith.constant dense<0.000000e+00> : vector<4x8x32xf32>
    %228 = tpu.matmul %226, %227, %cst_111 {dimension_numbers = #tpu.dot_dimension_numbers<[2], [1], [1], [2], [0, 0, 0, 1, 1, 2], [0], [0]>} : vector<4x8x8xbf16>, vector<4x8x32xbf16>, vector<4x8x32xf32> -> vector<4x8x32xf32>
    %cst_112 = arith.constant dense<0.000000e+00> : vector<8x32xf32>
    %229 = vector.multi_reduction <add>, %228, %cst_112 [0] : vector<4x8x32xf32> to vector<8x32xf32>
    %230 = arith.addf %178, %229 : vector<8x32xf32>
    %c0_113 = arith.constant 0 : index
    %c0_114 = arith.constant 0 : index
    %c0_115 = arith.constant 0 : index
    %231 = vector.load %arg17[%c0_113, %c0_114, %c0_115] : memref<2x1x32xf32, #tpu.memory_space<vmem>>, vector<1x1x32xf32>
    %232 = vector.shape_cast %231 : vector<1x1x32xf32> to vector<1x32xf32>
    %c0_116 = arith.constant 0 : index
    %c0_117 = arith.constant 0 : index
    %c0_118 = arith.constant 0 : index
    %c0_119 = arith.constant 0 : index
    %233 = vector.load %arg18[%c0_116, %c0_117, %c0_118, %c0_119] : memref<2x4x32x8xf32, #tpu.memory_space<vmem>>, vector<1x4x32x8xf32>
    %234 = vector.shape_cast %233 : vector<1x4x32x8xf32> to vector<4x32x8xf32>
    %c0_120 = arith.constant 0 : index
    %c0_121 = arith.constant 0 : index
    %c0_122 = arith.constant 0 : index
    %c0_123 = arith.constant 0 : index
    %235 = vector.load %arg19[%c0_120, %c0_121, %c0_122, %c0_123] : memref<2x8x32x8xf32, #tpu.memory_space<vmem>>, vector<1x8x32x8xf32>
    %236 = vector.shape_cast %235 : vector<1x8x32x8xf32> to vector<8x32x8xf32>
    %c0_124 = arith.constant 0 : index
    %c0_125 = arith.constant 0 : index
    %c0_126 = arith.constant 0 : index
    %c0_127 = arith.constant 0 : index
    %237 = vector.load %arg20[%c0_124, %c0_125, %c0_126, %c0_127] : memref<2x4x8x32xf32, #tpu.memory_space<vmem>>, vector<1x4x8x32xf32>
    %238 = vector.shape_cast %237 : vector<1x4x8x32xf32> to vector<4x8x32xf32>
    %239 = arith.mulf %230, %230 : vector<8x32xf32>
    %cst_128 = arith.constant dense<0.000000e+00> : vector<8xf32>
    %240 = vector.multi_reduction <add>, %239, %cst_128 [1] : vector<8x32xf32> to vector<8xf32>
    %241 = vector.shape_cast %240 : vector<8xf32> to vector<8x1xf32>
    %cst_129 = arith.constant 3.200000e+01 : f32
    %242 = vector.broadcast %cst_129 : f32 to vector<8x1xf32>
    %243 = arith.divf %241, %242 : vector<8x1xf32>
    %cst_130 = arith.constant 9.99999997E-7 : f32
    %244 = vector.broadcast %cst_130 : f32 to vector<8x1xf32>
    %245 = arith.addf %243, %244 : vector<8x1xf32>
    %246 = math.rsqrt %245 : vector<8x1xf32>
    %247 = vector.broadcast %246 : vector<8x1xf32> to vector<8x32xf32>
    %248 = arith.mulf %230, %247 : vector<8x32xf32>
    %249 = vector.broadcast %232 : vector<1x32xf32> to vector<8x32xf32>
    %250 = arith.mulf %248, %249 : vector<8x32xf32>
    %251 = arith.truncf %250 : vector<8x32xf32> to vector<8x32xbf16>
    %252 = vector.shape_cast %251 : vector<8x32xbf16> to vector<1x8x32xbf16>
    %253 = vector.shape_cast %252 : vector<1x8x32xbf16> to vector<1x8x32xbf16>
    %254 = vector.broadcast %253 : vector<1x8x32xbf16> to vector<4x8x32xbf16>
    %255 = arith.truncf %234 : vector<4x32x8xf32> to vector<4x32x8xbf16>
    %cst_131 = arith.constant dense<0.000000e+00> : vector<4x8x8xf32>
    %256 = tpu.matmul %254, %255, %cst_131 {dimension_numbers = #tpu.dot_dimension_numbers<[2], [1], [1], [2], [0, 0, 0, 1, 1, 2], [0], [0]>} : vector<4x8x32xbf16>, vector<4x32x8xbf16>, vector<4x8x8xf32> -> vector<4x8x8xf32>
    %257 = arith.truncf %236 : vector<8x32x8xf32> to vector<8x32x8xbf16>
    %cst_132 = arith.constant dense<0.000000e+00> : vector<8x8x8xf32>
    %258 = tpu.matmul %176, %257, %cst_132 {dimension_numbers = #tpu.dot_dimension_numbers<[2], [1], [1], [2], [0, 0, 0, 1, 1, 2], [0], [0]>} : vector<8x8x32xbf16>, vector<8x32x8xbf16>, vector<8x8x8xf32> -> vector<8x8x8xf32>
    %259 = vector.extract_strided_slice %258 {offsets = [0, 0, 0], sizes = [4, 8, 8], strides = [1, 1, 1]} : vector<8x8x8xf32> to vector<4x8x8xf32>
    %260 = vector.extract_strided_slice %258 {offsets = [4, 0, 0], sizes = [4, 8, 8], strides = [1, 1, 1]} : vector<8x8x8xf32> to vector<4x8x8xf32>
    %261 = arith.truncf %256 : vector<4x8x8xf32> to vector<4x8x8xbf16>
    %262 = arith.truncf %259 : vector<4x8x8xf32> to vector<4x8x8xbf16>
    %cst_133 = arith.constant dense<0.000000e+00> : vector<4x8x8xf32>
    %263 = tpu.matmul %261, %262, %cst_133 {dimension_numbers = #tpu.dot_dimension_numbers<[2], [2], [1], [1], [0, 0, 0, 1, 1, 1], [0], [0]>} : vector<4x8x8xbf16>, vector<4x8x8xbf16>, vector<4x8x8xf32> -> vector<4x8x8xf32>
    %264 = vector.shape_cast %181 : vector<1x8xf32> to vector<1x1x8xf32>
    %265 = vector.broadcast %264 : vector<1x1x8xf32> to vector<4x8x8xf32>
    %266 = arith.addf %263, %265 : vector<4x8x8xf32>
    %cst_134 = arith.constant dense<0xFF800000> : vector<4x8xf32>
    %267 = vector.multi_reduction <maximumf>, %266, %cst_134 [2] : vector<4x8x8xf32> to vector<4x8xf32>
    %268 = vector.shape_cast %267 : vector<4x8xf32> to vector<4x8x1xf32>
    %269 = vector.broadcast %268 : vector<4x8x1xf32> to vector<4x8x8xf32>
    %270 = arith.subf %266, %269 : vector<4x8x8xf32>
    %271 = math.exp %270 : vector<4x8x8xf32>
    %cst_135 = arith.constant dense<0.000000e+00> : vector<4x8xf32>
    %272 = vector.multi_reduction <add>, %271, %cst_135 [2] : vector<4x8x8xf32> to vector<4x8xf32>
    %273 = vector.shape_cast %272 : vector<4x8xf32> to vector<4x8x1xf32>
    %274 = tpu.reciprocal %273 {approx = true} : vector<4x8x1xf32> -> vector<4x8x1xf32>
    %275 = vector.broadcast %274 : vector<4x8x1xf32> to vector<4x8x8xf32>
    %276 = arith.mulf %271, %275 : vector<4x8x8xf32>
    %277 = arith.truncf %276 : vector<4x8x8xf32> to vector<4x8x8xbf16>
    %278 = arith.truncf %260 : vector<4x8x8xf32> to vector<4x8x8xbf16>
    %cst_136 = arith.constant dense<0.000000e+00> : vector<4x8x8xf32>
    %279 = tpu.matmul %277, %278, %cst_136 {dimension_numbers = #tpu.dot_dimension_numbers<[2], [1], [1], [2], [0, 0, 0, 1, 1, 2], [0], [0]>} : vector<4x8x8xbf16>, vector<4x8x8xbf16>, vector<4x8x8xf32> -> vector<4x8x8xf32>
    %280 = arith.truncf %279 : vector<4x8x8xf32> to vector<4x8x8xbf16>
    %281 = arith.truncf %238 : vector<4x8x32xf32> to vector<4x8x32xbf16>
    %cst_137 = arith.constant dense<0.000000e+00> : vector<4x8x32xf32>
    %282 = tpu.matmul %280, %281, %cst_137 {dimension_numbers = #tpu.dot_dimension_numbers<[2], [1], [1], [2], [0, 0, 0, 1, 1, 2], [0], [0]>} : vector<4x8x8xbf16>, vector<4x8x32xbf16>, vector<4x8x32xf32> -> vector<4x8x32xf32>
    %cst_138 = arith.constant dense<0.000000e+00> : vector<8x32xf32>
    %283 = vector.multi_reduction <add>, %282, %cst_138 [0] : vector<4x8x32xf32> to vector<8x32xf32>
    %284 = arith.addf %230, %283 : vector<8x32xf32>
    %c0_139 = arith.constant 0 : index
    %c0_140 = arith.constant 0 : index
    %c0_141 = arith.constant 0 : index
    %285 = vector.load %arg21[%c0_139, %c0_140, %c0_141] : memref<2x1x32xf32, #tpu.memory_space<vmem>>, vector<1x1x32xf32>
    %286 = vector.shape_cast %285 : vector<1x1x32xf32> to vector<1x32xf32>
    %c0_142 = arith.constant 0 : index
    %c0_143 = arith.constant 0 : index
    %c0_144 = arith.constant 0 : index
    %287 = vector.load %arg22[%c0_142, %c0_143, %c0_144] : memref<2x32x64xf32, #tpu.memory_space<vmem>>, vector<1x32x64xf32>
    %288 = vector.shape_cast %287 : vector<1x32x64xf32> to vector<32x64xf32>
    %c0_145 = arith.constant 0 : index
    %c0_146 = arith.constant 0 : index
    %c0_147 = arith.constant 0 : index
    %289 = vector.load %arg23[%c0_145, %c0_146, %c0_147] : memref<2x64x32xf32, #tpu.memory_space<vmem>>, vector<1x64x32xf32>
    %290 = vector.shape_cast %289 : vector<1x64x32xf32> to vector<64x32xf32>
    %291 = arith.mulf %284, %284 : vector<8x32xf32>
    %cst_148 = arith.constant dense<0.000000e+00> : vector<8xf32>
    %292 = vector.multi_reduction <add>, %291, %cst_148 [1] : vector<8x32xf32> to vector<8xf32>
    %293 = vector.shape_cast %292 : vector<8xf32> to vector<8x1xf32>
    %cst_149 = arith.constant 3.200000e+01 : f32
    %294 = vector.broadcast %cst_149 : f32 to vector<8x1xf32>
    %295 = arith.divf %293, %294 : vector<8x1xf32>
    %cst_150 = arith.constant 9.99999997E-7 : f32
    %296 = vector.broadcast %cst_150 : f32 to vector<8x1xf32>
    %297 = arith.addf %295, %296 : vector<8x1xf32>
    %298 = math.rsqrt %297 : vector<8x1xf32>
    %299 = vector.broadcast %298 : vector<8x1xf32> to vector<8x32xf32>
    %300 = arith.mulf %284, %299 : vector<8x32xf32>
    %301 = vector.broadcast %286 : vector<1x32xf32> to vector<8x32xf32>
    %302 = arith.mulf %300, %301 : vector<8x32xf32>
    %303 = arith.truncf %302 : vector<8x32xf32> to vector<8x32xbf16>
    %304 = arith.truncf %288 : vector<32x64xf32> to vector<32x64xbf16>
    %cst_151 = arith.constant dense<0.000000e+00> : vector<8x64xf32>
    %305 = tpu.matmul %303, %304, %cst_151 {dimension_numbers = #tpu.dot_dimension_numbers<[1], [0], [0], [1], [0, 0, 1, 1], [], []>} : vector<8x32xbf16>, vector<32x64xbf16>, vector<8x64xf32> -> vector<8x64xf32>
    %cst_152 = arith.constant 0.000000e+00 : f32
    %306 = vector.broadcast %cst_152 : f32 to vector<8x64xf32>
    %307 = arith.maximumf %305, %306 : vector<8x64xf32>
    %308 = arith.truncf %307 : vector<8x64xf32> to vector<8x64xbf16>
    %309 = arith.truncf %290 : vector<64x32xf32> to vector<64x32xbf16>
    %cst_153 = arith.constant dense<0.000000e+00> : vector<8x32xf32>
    %310 = tpu.matmul %308, %309, %cst_153 {dimension_numbers = #tpu.dot_dimension_numbers<[1], [0], [0], [1], [0, 0, 1, 1], [], []>} : vector<8x64xbf16>, vector<64x32xbf16>, vector<8x32xf32> -> vector<8x32xf32>
    %311 = arith.addf %284, %310 : vector<8x32xf32>
    %c1_154 = arith.constant 1 : index
    %c0_155 = arith.constant 0 : index
    %c0_156 = arith.constant 0 : index
    %312 = vector.load %arg14[%c1_154, %c0_155, %c0_156] : memref<2x1x32xf32, #tpu.memory_space<vmem>>, vector<1x1x32xf32>
    %313 = vector.shape_cast %312 : vector<1x1x32xf32> to vector<1x32xf32>
    %c1_157 = arith.constant 1 : index
    %c0_158 = arith.constant 0 : index
    %c0_159 = arith.constant 0 : index
    %c0_160 = arith.constant 0 : index
    %314 = vector.load %arg15[%c1_157, %c0_158, %c0_159, %c0_160] : memref<2x12x32x8xf32, #tpu.memory_space<vmem>>, vector<1x12x32x8xf32>
    %315 = vector.shape_cast %314 : vector<1x12x32x8xf32> to vector<12x32x8xf32>
    %c1_161 = arith.constant 1 : index
    %c0_162 = arith.constant 0 : index
    %c0_163 = arith.constant 0 : index
    %c0_164 = arith.constant 0 : index
    %316 = vector.load %arg16[%c1_161, %c0_162, %c0_163, %c0_164] : memref<2x4x8x32xf32, #tpu.memory_space<vmem>>, vector<1x4x8x32xf32>
    %317 = vector.shape_cast %316 : vector<1x4x8x32xf32> to vector<4x8x32xf32>
    %318 = arith.mulf %311, %311 : vector<8x32xf32>
    %cst_165 = arith.constant dense<0.000000e+00> : vector<8xf32>
    %319 = vector.multi_reduction <add>, %318, %cst_165 [1] : vector<8x32xf32> to vector<8xf32>
    %320 = vector.shape_cast %319 : vector<8xf32> to vector<8x1xf32>
    %cst_166 = arith.constant 3.200000e+01 : f32
    %321 = vector.broadcast %cst_166 : f32 to vector<8x1xf32>
    %322 = arith.divf %320, %321 : vector<8x1xf32>
    %cst_167 = arith.constant 9.99999997E-7 : f32
    %323 = vector.broadcast %cst_167 : f32 to vector<8x1xf32>
    %324 = arith.addf %322, %323 : vector<8x1xf32>
    %325 = math.rsqrt %324 : vector<8x1xf32>
    %326 = vector.broadcast %325 : vector<8x1xf32> to vector<8x32xf32>
    %327 = arith.mulf %311, %326 : vector<8x32xf32>
    %328 = vector.broadcast %313 : vector<1x32xf32> to vector<8x32xf32>
    %329 = arith.mulf %327, %328 : vector<8x32xf32>
    %330 = arith.truncf %329 : vector<8x32xf32> to vector<8x32xbf16>
    %331 = vector.shape_cast %330 : vector<8x32xbf16> to vector<1x8x32xbf16>
    %332 = vector.shape_cast %331 : vector<1x8x32xbf16> to vector<1x8x32xbf16>
    %333 = vector.broadcast %332 : vector<1x8x32xbf16> to vector<12x8x32xbf16>
    %334 = arith.truncf %315 : vector<12x32x8xf32> to vector<12x32x8xbf16>
    %cst_168 = arith.constant dense<0.000000e+00> : vector<12x8x8xf32>
    %335 = tpu.matmul %333, %334, %cst_168 {dimension_numbers = #tpu.dot_dimension_numbers<[2], [1], [1], [2], [0, 0, 0, 1, 1, 2], [0], [0]>} : vector<12x8x32xbf16>, vector<12x32x8xbf16>, vector<12x8x8xf32> -> vector<12x8x8xf32>
    %336 = vector.extract_strided_slice %335 {offsets = [0, 0, 0], sizes = [4, 8, 8], strides = [1, 1, 1]} : vector<12x8x8xf32> to vector<4x8x8xf32>
    %337 = vector.extract_strided_slice %335 {offsets = [4, 0, 0], sizes = [4, 8, 8], strides = [1, 1, 1]} : vector<12x8x8xf32> to vector<4x8x8xf32>
    %338 = vector.extract_strided_slice %335 {offsets = [8, 0, 0], sizes = [4, 8, 8], strides = [1, 1, 1]} : vector<12x8x8xf32> to vector<4x8x8xf32>
    %339 = arith.truncf %336 : vector<4x8x8xf32> to vector<4x8x8xbf16>
    %340 = arith.truncf %337 : vector<4x8x8xf32> to vector<4x8x8xbf16>
    %cst_169 = arith.constant dense<0.000000e+00> : vector<4x8x8xf32>
    %341 = tpu.matmul %339, %340, %cst_169 {dimension_numbers = #tpu.dot_dimension_numbers<[2], [2], [1], [1], [0, 0, 0, 1, 1, 1], [0], [0]>} : vector<4x8x8xbf16>, vector<4x8x8xbf16>, vector<4x8x8xf32> -> vector<4x8x8xf32>
    %342 = arith.addf %341, %179 : vector<4x8x8xf32>
    %cst_170 = arith.constant dense<0xFF800000> : vector<4x8xf32>
    %343 = vector.multi_reduction <maximumf>, %342, %cst_170 [2] : vector<4x8x8xf32> to vector<4x8xf32>
    %344 = vector.shape_cast %343 : vector<4x8xf32> to vector<4x8x1xf32>
    %345 = vector.broadcast %344 : vector<4x8x1xf32> to vector<4x8x8xf32>
    %346 = arith.subf %342, %345 : vector<4x8x8xf32>
    %347 = math.exp %346 : vector<4x8x8xf32>
    %cst_171 = arith.constant dense<0.000000e+00> : vector<4x8xf32>
    %348 = vector.multi_reduction <add>, %347, %cst_171 [2] : vector<4x8x8xf32> to vector<4x8xf32>
    %349 = vector.shape_cast %348 : vector<4x8xf32> to vector<4x8x1xf32>
    %350 = tpu.reciprocal %349 {approx = true} : vector<4x8x1xf32> -> vector<4x8x1xf32>
    %351 = vector.broadcast %350 : vector<4x8x1xf32> to vector<4x8x8xf32>
    %352 = arith.mulf %347, %351 : vector<4x8x8xf32>
    %353 = arith.truncf %352 : vector<4x8x8xf32> to vector<4x8x8xbf16>
    %354 = arith.truncf %338 : vector<4x8x8xf32> to vector<4x8x8xbf16>
    %cst_172 = arith.constant dense<0.000000e+00> : vector<4x8x8xf32>
    %355 = tpu.matmul %353, %354, %cst_172 {dimension_numbers = #tpu.dot_dimension_numbers<[2], [1], [1], [2], [0, 0, 0, 1, 1, 2], [0], [0]>} : vector<4x8x8xbf16>, vector<4x8x8xbf16>, vector<4x8x8xf32> -> vector<4x8x8xf32>
    %356 = arith.truncf %355 : vector<4x8x8xf32> to vector<4x8x8xbf16>
    %357 = arith.truncf %317 : vector<4x8x32xf32> to vector<4x8x32xbf16>
    %cst_173 = arith.constant dense<0.000000e+00> : vector<4x8x32xf32>
    %358 = tpu.matmul %356, %357, %cst_173 {dimension_numbers = #tpu.dot_dimension_numbers<[2], [1], [1], [2], [0, 0, 0, 1, 1, 2], [0], [0]>} : vector<4x8x8xbf16>, vector<4x8x32xbf16>, vector<4x8x32xf32> -> vector<4x8x32xf32>
    %cst_174 = arith.constant dense<0.000000e+00> : vector<8x32xf32>
    %359 = vector.multi_reduction <add>, %358, %cst_174 [0] : vector<4x8x32xf32> to vector<8x32xf32>
    %360 = arith.addf %311, %359 : vector<8x32xf32>
    %c1_175 = arith.constant 1 : index
    %c0_176 = arith.constant 0 : index
    %c0_177 = arith.constant 0 : index
    %361 = vector.load %arg17[%c1_175, %c0_176, %c0_177] : memref<2x1x32xf32, #tpu.memory_space<vmem>>, vector<1x1x32xf32>
    %362 = vector.shape_cast %361 : vector<1x1x32xf32> to vector<1x32xf32>
    %c1_178 = arith.constant 1 : index
    %c0_179 = arith.constant 0 : index
    %c0_180 = arith.constant 0 : index
    %c0_181 = arith.constant 0 : index
    %363 = vector.load %arg18[%c1_178, %c0_179, %c0_180, %c0_181] : memref<2x4x32x8xf32, #tpu.memory_space<vmem>>, vector<1x4x32x8xf32>
    %364 = vector.shape_cast %363 : vector<1x4x32x8xf32> to vector<4x32x8xf32>
    %c1_182 = arith.constant 1 : index
    %c0_183 = arith.constant 0 : index
    %c0_184 = arith.constant 0 : index
    %c0_185 = arith.constant 0 : index
    %365 = vector.load %arg19[%c1_182, %c0_183, %c0_184, %c0_185] : memref<2x8x32x8xf32, #tpu.memory_space<vmem>>, vector<1x8x32x8xf32>
    %366 = vector.shape_cast %365 : vector<1x8x32x8xf32> to vector<8x32x8xf32>
    %c1_186 = arith.constant 1 : index
    %c0_187 = arith.constant 0 : index
    %c0_188 = arith.constant 0 : index
    %c0_189 = arith.constant 0 : index
    %367 = vector.load %arg20[%c1_186, %c0_187, %c0_188, %c0_189] : memref<2x4x8x32xf32, #tpu.memory_space<vmem>>, vector<1x4x8x32xf32>
    %368 = vector.shape_cast %367 : vector<1x4x8x32xf32> to vector<4x8x32xf32>
    %369 = arith.mulf %360, %360 : vector<8x32xf32>
    %cst_190 = arith.constant dense<0.000000e+00> : vector<8xf32>
    %370 = vector.multi_reduction <add>, %369, %cst_190 [1] : vector<8x32xf32> to vector<8xf32>
    %371 = vector.shape_cast %370 : vector<8xf32> to vector<8x1xf32>
    %cst_191 = arith.constant 3.200000e+01 : f32
    %372 = vector.broadcast %cst_191 : f32 to vector<8x1xf32>
    %373 = arith.divf %371, %372 : vector<8x1xf32>
    %cst_192 = arith.constant 9.99999997E-7 : f32
    %374 = vector.broadcast %cst_192 : f32 to vector<8x1xf32>
    %375 = arith.addf %373, %374 : vector<8x1xf32>
    %376 = math.rsqrt %375 : vector<8x1xf32>
    %377 = vector.broadcast %376 : vector<8x1xf32> to vector<8x32xf32>
    %378 = arith.mulf %360, %377 : vector<8x32xf32>
    %379 = vector.broadcast %362 : vector<1x32xf32> to vector<8x32xf32>
    %380 = arith.mulf %378, %379 : vector<8x32xf32>
    %381 = arith.truncf %380 : vector<8x32xf32> to vector<8x32xbf16>
    %382 = vector.shape_cast %381 : vector<8x32xbf16> to vector<1x8x32xbf16>
    %383 = vector.shape_cast %382 : vector<1x8x32xbf16> to vector<1x8x32xbf16>
    %384 = vector.broadcast %383 : vector<1x8x32xbf16> to vector<4x8x32xbf16>
    %385 = arith.truncf %364 : vector<4x32x8xf32> to vector<4x32x8xbf16>
    %cst_193 = arith.constant dense<0.000000e+00> : vector<4x8x8xf32>
    %386 = tpu.matmul %384, %385, %cst_193 {dimension_numbers = #tpu.dot_dimension_numbers<[2], [1], [1], [2], [0, 0, 0, 1, 1, 2], [0], [0]>} : vector<4x8x32xbf16>, vector<4x32x8xbf16>, vector<4x8x8xf32> -> vector<4x8x8xf32>
    %387 = arith.truncf %366 : vector<8x32x8xf32> to vector<8x32x8xbf16>
    %cst_194 = arith.constant dense<0.000000e+00> : vector<8x8x8xf32>
    %388 = tpu.matmul %176, %387, %cst_194 {dimension_numbers = #tpu.dot_dimension_numbers<[2], [1], [1], [2], [0, 0, 0, 1, 1, 2], [0], [0]>} : vector<8x8x32xbf16>, vector<8x32x8xbf16>, vector<8x8x8xf32> -> vector<8x8x8xf32>
    %389 = vector.extract_strided_slice %388 {offsets = [0, 0, 0], sizes = [4, 8, 8], strides = [1, 1, 1]} : vector<8x8x8xf32> to vector<4x8x8xf32>
    %390 = vector.extract_strided_slice %388 {offsets = [4, 0, 0], sizes = [4, 8, 8], strides = [1, 1, 1]} : vector<8x8x8xf32> to vector<4x8x8xf32>
    %391 = arith.truncf %386 : vector<4x8x8xf32> to vector<4x8x8xbf16>
    %392 = arith.truncf %389 : vector<4x8x8xf32> to vector<4x8x8xbf16>
    %cst_195 = arith.constant dense<0.000000e+00> : vector<4x8x8xf32>
    %393 = tpu.matmul %391, %392, %cst_195 {dimension_numbers = #tpu.dot_dimension_numbers<[2], [2], [1], [1], [0, 0, 0, 1, 1, 1], [0], [0]>} : vector<4x8x8xbf16>, vector<4x8x8xbf16>, vector<4x8x8xf32> -> vector<4x8x8xf32>
    %394 = vector.shape_cast %181 : vector<1x8xf32> to vector<1x1x8xf32>
    %395 = vector.broadcast %394 : vector<1x1x8xf32> to vector<4x8x8xf32>
    %396 = arith.addf %393, %395 : vector<4x8x8xf32>
    %cst_196 = arith.constant dense<0xFF800000> : vector<4x8xf32>
    %397 = vector.multi_reduction <maximumf>, %396, %cst_196 [2] : vector<4x8x8xf32> to vector<4x8xf32>
    %398 = vector.shape_cast %397 : vector<4x8xf32> to vector<4x8x1xf32>
    %399 = vector.broadcast %398 : vector<4x8x1xf32> to vector<4x8x8xf32>
    %400 = arith.subf %396, %399 : vector<4x8x8xf32>
    %401 = math.exp %400 : vector<4x8x8xf32>
    %cst_197 = arith.constant dense<0.000000e+00> : vector<4x8xf32>
    %402 = vector.multi_reduction <add>, %401, %cst_197 [2] : vector<4x8x8xf32> to vector<4x8xf32>
    %403 = vector.shape_cast %402 : vector<4x8xf32> to vector<4x8x1xf32>
    %404 = tpu.reciprocal %403 {approx = true} : vector<4x8x1xf32> -> vector<4x8x1xf32>
    %405 = vector.broadcast %404 : vector<4x8x1xf32> to vector<4x8x8xf32>
    %406 = arith.mulf %401, %405 : vector<4x8x8xf32>
    %407 = arith.truncf %406 : vector<4x8x8xf32> to vector<4x8x8xbf16>
    %408 = arith.truncf %390 : vector<4x8x8xf32> to vector<4x8x8xbf16>
    %cst_198 = arith.constant dense<0.000000e+00> : vector<4x8x8xf32>
    %409 = tpu.matmul %407, %408, %cst_198 {dimension_numbers = #tpu.dot_dimension_numbers<[2], [1], [1], [2], [0, 0, 0, 1, 1, 2], [0], [0]>} : vector<4x8x8xbf16>, vector<4x8x8xbf16>, vector<4x8x8xf32> -> vector<4x8x8xf32>
    %410 = arith.truncf %409 : vector<4x8x8xf32> to vector<4x8x8xbf16>
    %411 = arith.truncf %368 : vector<4x8x32xf32> to vector<4x8x32xbf16>
    %cst_199 = arith.constant dense<0.000000e+00> : vector<4x8x32xf32>
    %412 = tpu.matmul %410, %411, %cst_199 {dimension_numbers = #tpu.dot_dimension_numbers<[2], [1], [1], [2], [0, 0, 0, 1, 1, 2], [0], [0]>} : vector<4x8x8xbf16>, vector<4x8x32xbf16>, vector<4x8x32xf32> -> vector<4x8x32xf32>
    %cst_200 = arith.constant dense<0.000000e+00> : vector<8x32xf32>
    %413 = vector.multi_reduction <add>, %412, %cst_200 [0] : vector<4x8x32xf32> to vector<8x32xf32>
    %414 = arith.addf %360, %413 : vector<8x32xf32>
    %c1_201 = arith.constant 1 : index
    %c0_202 = arith.constant 0 : index
    %c0_203 = arith.constant 0 : index
    %415 = vector.load %arg21[%c1_201, %c0_202, %c0_203] : memref<2x1x32xf32, #tpu.memory_space<vmem>>, vector<1x1x32xf32>
    %416 = vector.shape_cast %415 : vector<1x1x32xf32> to vector<1x32xf32>
    %c1_204 = arith.constant 1 : index
    %c0_205 = arith.constant 0 : index
    %c0_206 = arith.constant 0 : index
    %417 = vector.load %arg22[%c1_204, %c0_205, %c0_206] : memref<2x32x64xf32, #tpu.memory_space<vmem>>, vector<1x32x64xf32>
    %418 = vector.shape_cast %417 : vector<1x32x64xf32> to vector<32x64xf32>
    %c1_207 = arith.constant 1 : index
    %c0_208 = arith.constant 0 : index
    %c0_209 = arith.constant 0 : index
    %419 = vector.load %arg23[%c1_207, %c0_208, %c0_209] : memref<2x64x32xf32, #tpu.memory_space<vmem>>, vector<1x64x32xf32>
    %420 = vector.shape_cast %419 : vector<1x64x32xf32> to vector<64x32xf32>
    %421 = arith.mulf %414, %414 : vector<8x32xf32>
    %cst_210 = arith.constant dense<0.000000e+00> : vector<8xf32>
    %422 = vector.multi_reduction <add>, %421, %cst_210 [1] : vector<8x32xf32> to vector<8xf32>
    %423 = vector.shape_cast %422 : vector<8xf32> to vector<8x1xf32>
    %cst_211 = arith.constant 3.200000e+01 : f32
    %424 = vector.broadcast %cst_211 : f32 to vector<8x1xf32>
    %425 = arith.divf %423, %424 : vector<8x1xf32>
    %cst_212 = arith.constant 9.99999997E-7 : f32
    %426 = vector.broadcast %cst_212 : f32 to vector<8x1xf32>
    %427 = arith.addf %425, %426 : vector<8x1xf32>
    %428 = math.rsqrt %427 : vector<8x1xf32>
    %429 = vector.broadcast %428 : vector<8x1xf32> to vector<8x32xf32>
    %430 = arith.mulf %414, %429 : vector<8x32xf32>
    %431 = vector.broadcast %416 : vector<1x32xf32> to vector<8x32xf32>
    %432 = arith.mulf %430, %431 : vector<8x32xf32>
    %433 = arith.truncf %432 : vector<8x32xf32> to vector<8x32xbf16>
    %434 = arith.truncf %418 : vector<32x64xf32> to vector<32x64xbf16>
    %cst_213 = arith.constant dense<0.000000e+00> : vector<8x64xf32>
    %435 = tpu.matmul %433, %434, %cst_213 {dimension_numbers = #tpu.dot_dimension_numbers<[1], [0], [0], [1], [0, 0, 1, 1], [], []>} : vector<8x32xbf16>, vector<32x64xbf16>, vector<8x64xf32> -> vector<8x64xf32>
    %cst_214 = arith.constant 0.000000e+00 : f32
    %436 = vector.broadcast %cst_214 : f32 to vector<8x64xf32>
    %437 = arith.maximumf %435, %436 : vector<8x64xf32>
    %438 = arith.truncf %437 : vector<8x64xf32> to vector<8x64xbf16>
    %439 = arith.truncf %420 : vector<64x32xf32> to vector<64x32xbf16>
    %cst_215 = arith.constant dense<0.000000e+00> : vector<8x32xf32>
    %440 = tpu.matmul %438, %439, %cst_215 {dimension_numbers = #tpu.dot_dimension_numbers<[1], [0], [0], [1], [0, 0, 1, 1], [], []>} : vector<8x64xbf16>, vector<64x32xbf16>, vector<8x32xf32> -> vector<8x32xf32>
    %441 = arith.addf %414, %440 : vector<8x32xf32>
    %442 = arith.mulf %441, %441 : vector<8x32xf32>
    %cst_216 = arith.constant dense<0.000000e+00> : vector<8xf32>
    %443 = vector.multi_reduction <add>, %442, %cst_216 [1] : vector<8x32xf32> to vector<8xf32>
    %444 = vector.shape_cast %443 : vector<8xf32> to vector<8x1xf32>
    %cst_217 = arith.constant 3.200000e+01 : f32
    %445 = vector.broadcast %cst_217 : f32 to vector<8x1xf32>
    %446 = arith.divf %444, %445 : vector<8x1xf32>
    %cst_218 = arith.constant 9.99999997E-7 : f32
    %447 = vector.broadcast %cst_218 : f32 to vector<8x1xf32>
    %448 = arith.addf %446, %447 : vector<8x1xf32>
    %449 = math.rsqrt %448 : vector<8x1xf32>
    %450 = vector.broadcast %449 : vector<8x1xf32> to vector<8x32xf32>
    %451 = arith.mulf %441, %450 : vector<8x32xf32>
    %c0_219 = arith.constant 0 : index
    %c0_220 = arith.constant 0 : index
    %452 = vector.load %arg24[%c0_219, %c0_220] : memref<1x32xf32, #tpu.memory_space<vmem>>, vector<1x32xf32>
    %453 = vector.broadcast %452 : vector<1x32xf32> to vector<8x32xf32>
    %454 = arith.mulf %451, %453 : vector<8x32xf32>
    %c0_221 = arith.constant 0 : index
    %c0_222 = arith.constant 0 : index
    %455 = vector.load %arg25[%c0_221, %c0_222] : memref<128x32xf32, #tpu.memory_space<vmem>>, vector<128x32xf32>
    %456 = arith.truncf %454 : vector<8x32xf32> to vector<8x32xbf16>
    %457 = arith.truncf %455 : vector<128x32xf32> to vector<128x32xbf16>
    %cst_223 = arith.constant dense<0.000000e+00> : vector<8x128xf32>
    %458 = tpu.matmul %456, %457, %cst_223 {dimension_numbers = #tpu.dot_dimension_numbers<[1], [1], [0], [0], [0, 0, 1, 0], [], []>} : vector<8x32xbf16>, vector<128x32xbf16>, vector<8x128xf32> -> vector<8x128xf32>
    %cst_224 = arith.constant dense<0xFF800000> : vector<8xf32>
    %459 = vector.multi_reduction <maximumf>, %458, %cst_224 [1] : vector<8x128xf32> to vector<8xf32>
    %460 = vector.shape_cast %459 : vector<8xf32> to vector<8x1xf32>
    %461 = vector.broadcast %460 : vector<8x1xf32> to vector<8x128xf32>
    %462 = arith.subf %458, %461 : vector<8x128xf32>
    %463 = math.exp %462 : vector<8x128xf32>
    %cst_225 = arith.constant dense<0.000000e+00> : vector<8xf32>
    %464 = vector.multi_reduction <add>, %463, %cst_225 [1] : vector<8x128xf32> to vector<8xf32>
    %465 = vector.shape_cast %464 : vector<8xf32> to vector<8x1xf32>
    %466 = math.log %465 : vector<8x1xf32>
    %467 = arith.addf %466, %460 : vector<8x1xf32>
    %c0_226 = arith.constant 0 : index
    %c0_227 = arith.constant 0 : index
    %c0_228 = arith.constant 0 : index
    %468 = vector.load %arg4[%c0_226, %c0_227, %c0_228] : memref<1x8x1xi32, #tpu.memory_space<vmem>>, vector<1x8x1xi32>
    %469 = vector.shape_cast %468 : vector<1x8x1xi32> to vector<8x1xi32>
    %470 = tpu.iota {dimensions = array<i32: 1>} : vector<8x128xi32>
    %471 = vector.broadcast %469 : vector<8x1xi32> to vector<8x128xi32>
    %472 = arith.cmpi eq, %470, %471 : vector<8x128xi32>
    %cst_229 = arith.constant 0.000000e+00 : f32
    %473 = vector.broadcast %cst_229 : f32 to vector<8x128xf32>
    %474 = arith.select %472, %458, %473 : vector<8x128xi1>, vector<8x128xf32>
    %cst_230 = arith.constant dense<0.000000e+00> : vector<8xf32>
    %475 = vector.multi_reduction <add>, %474, %cst_230 [1] : vector<8x128xf32> to vector<8xf32>
    %476 = vector.shape_cast %475 : vector<8xf32> to vector<8x1xf32>
    %c-100_i32 = arith.constant -100 : i32
    %477 = vector.broadcast %c-100_i32 : i32 to vector<8x1xi32>
    %478 = arith.cmpi ne, %469, %477 : vector<8x1xi32>
    %479 = arith.extui %478 : vector<8x1xi1> to vector<8x1xi32>
    %480 = arith.sitofp %479 : vector<8x1xi32> to vector<8x1xf32>
    %481 = arith.subf %467, %476 : vector<8x1xf32>
    %482 = arith.mulf %481, %480 : vector<8x1xf32>
    %cst_231 = arith.constant dense<0.000000e+00> : vector<1xf32>
    %483 = vector.multi_reduction <add>, %482, %cst_231 [0] : vector<8x1xf32> to vector<1xf32>
    %484 = vector.shape_cast %483 : vector<1xf32> to vector<1x1xf32>
    %cst_232 = arith.constant dense<0.000000e+00> : vector<1xf32>
    %485 = vector.multi_reduction <add>, %480, %cst_232 [0] : vector<8x1xf32> to vector<1xf32>
    %486 = vector.shape_cast %485 : vector<1xf32> to vector<1x1xf32>
    %c0_233 = arith.constant 0 : index
    %c0_234 = arith.constant 0 : index
    %c0_235 = arith.constant 0 : index
    %487 = vector.load %arg26[%c0_233, %c0_234, %c0_235] : memref<1x8x128xf32, #tpu.memory_space<vmem>>, vector<1x8x128xf32>
    %488 = vector.shape_cast %487 : vector<1x8x128xf32> to vector<8x128xf32>
    %489 = vector.shape_cast %458 : vector<8x128xf32> to vector<1x8x128xf32>
    tpu.vector_store %arg26[%c0_233, %c0_234, %c0_235], %489 {strides = array<i32>} : memref<1x8x128xf32, #tpu.memory_space<vmem>>, vector<1x8x128xf32>,
    %490 = tpu.iota {dimensions = array<i32: 1>} : vector<1x128xi32>
    %c0_i32 = arith.constant 0 : i32
    %491 = vector.broadcast %c0_i32 : i32 to vector<1x128xi32>
    %492 = arith.cmpi eq, %490, %491 : vector<1x128xi32>
    %c1_i32 = arith.constant 1 : i32
    %493 = vector.broadcast %c1_i32 : i32 to vector<1x128xi32>
    %494 = arith.cmpi eq, %490, %493 : vector<1x128xi32>
    %cst_236 = arith.constant 0.000000e+00 : f32
    %495 = vector.shape_cast %486 : vector<1x1xf32> to vector<1x1xf32>
    %496 = vector.broadcast %495 : vector<1x1xf32> to vector<1x128xf32>
    %497 = vector.broadcast %cst_236 : f32 to vector<1x128xf32>
    %498 = arith.select %494, %496, %497 : vector<1x128xi1>, vector<1x128xf32>
    %499 = vector.shape_cast %484 : vector<1x1xf32> to vector<1x1xf32>
    %500 = vector.broadcast %499 : vector<1x1xf32> to vector<1x128xf32>
    %501 = arith.select %492, %500, %498 : vector<1x128xi1>, vector<1x128xf32>
    %c0_237 = arith.constant 0 : index
    %c0_238 = arith.constant 0 : index
    %c0_239 = arith.constant 0 : index
    %502 = vector.load %arg27[%c0_237, %c0_238, %c0_239] : memref<1x1x128xf32, #tpu.memory_space<vmem>>, vector<1x1x128xf32>
    %503 = vector.shape_cast %502 : vector<1x1x128xf32> to vector<1x128xf32>
    %504 = vector.shape_cast %501 : vector<1x128xf32> to vector<1x1x128xf32>
    tpu.vector_store %arg27[%c0_237, %c0_238, %c0_239], %504 {strides = array<i32>} : memref<1x1x128xf32, #tpu.memory_space<vmem>>, vector<1x1x128xf32>,
    return
  }
  func.func @transform_0(%arg0: i32) -> (i32, i32, i32) {
    %c0_i32 = arith.constant 0 : i32
    %c0_i32_0 = arith.constant 0 : i32
    %c0_i32_1 = arith.constant 0 : i32
    return %arg0, %c0_i32, %c0_i32_0 : i32, i32, i32
  }
  func.func @transform_1(%arg0: i32) -> (i32, i32, i32) {
    %c0_i32 = arith.constant 0 : i32
    %c0_i32_0 = arith.constant 0 : i32
    %c0_i32_1 = arith.constant 0 : i32
    return %arg0, %c0_i32, %c0_i32_0 : i32, i32, i32
  }
  func.func @transform_2(%arg0: i32) -> (i32, i32, i32) {
    %c0_i32 = arith.constant 0 : i32
    %c0_i32_0 = arith.constant 0 : i32
    %c0_i32_1 = arith.constant 0 : i32
    return %arg0, %c0_i32, %c0_i32_0 : i32, i32, i32
  }
  func.func @transform_3(%arg0: i32) -> (i32, i32, i32) {
    %c0_i32 = arith.constant 0 : i32
    %c0_i32_0 = arith.constant 0 : i32
    %c0_i32_1 = arith.constant 0 : i32
    return %arg0, %c0_i32, %c0_i32_0 : i32, i32, i32
  }
  func.func @transform_4(%arg0: i32) -> (i32, i32, i32) {
    %c0_i32 = arith.constant 0 : i32
    %c0_i32_0 = arith.constant 0 : i32
    %c0_i32_1 = arith.constant 0 : i32
    %c0_i32_2 = arith.constant 0 : i32
    return %c0_i32, %c0_i32_0, %c0_i32_1 : i32, i32, i32
  }
  func.func @transform_5(%arg0: i32) -> (i32, i32, i32) {
    %c0_i32 = arith.constant 0 : i32
    %c0_i32_0 = arith.constant 0 : i32
    %c0_i32_1 = arith.constant 0 : i32
    %c0_i32_2 = arith.constant 0 : i32
    return %c0_i32, %c0_i32_0, %c0_i32_1 : i32, i32, i32
  }
  func.func @transform_6(%arg0: i32) -> (i32, i32, i32) {
    %c0_i32 = arith.constant 0 : i32
    %c0_i32_0 = arith.constant 0 : i32
    %c0_i32_1 = arith.constant 0 : i32
    %c0_i32_2 = arith.constant 0 : i32
    return %c0_i32, %c0_i32_0, %c0_i32_1 : i32, i32, i32
  }
  func.func @transform_7(%arg0: i32) -> (i32, i32, i32, i32) {
    %c0_i32 = arith.constant 0 : i32
    %c0_i32_0 = arith.constant 0 : i32
    %c0_i32_1 = arith.constant 0 : i32
    %c0_i32_2 = arith.constant 0 : i32
    %c0_i32_3 = arith.constant 0 : i32
    return %c0_i32, %c0_i32_0, %c0_i32_1, %c0_i32_2 : i32, i32, i32, i32
  }
  func.func @transform_8(%arg0: i32) -> (i32, i32, i32, i32) {
    %c0_i32 = arith.constant 0 : i32
    %c0_i32_0 = arith.constant 0 : i32
    %c0_i32_1 = arith.constant 0 : i32
    %c0_i32_2 = arith.constant 0 : i32
    %c0_i32_3 = arith.constant 0 : i32
    return %c0_i32, %c0_i32_0, %c0_i32_1, %c0_i32_2 : i32, i32, i32, i32
  }
  func.func @transform_9(%arg0: i32) -> (i32, i32, i32) {
    %c0_i32 = arith.constant 0 : i32
    %c0_i32_0 = arith.constant 0 : i32
    %c0_i32_1 = arith.constant 0 : i32
    %c0_i32_2 = arith.constant 0 : i32
    return %c0_i32, %c0_i32_0, %c0_i32_1 : i32, i32, i32
  }
  func.func @transform_10(%arg0: i32) -> (i32, i32, i32) {
    %c0_i32 = arith.constant 0 : i32
    %c0_i32_0 = arith.constant 0 : i32
    %c0_i32_1 = arith.constant 0 : i32
    %c0_i32_2 = arith.constant 0 : i32
    return %c0_i32, %c0_i32_0, %c0_i32_1 : i32, i32, i32
  }
  func.func @transform_11(%arg0: i32) -> (i32, i32, i32) {
    %c0_i32 = arith.constant 0 : i32
    %c0_i32_0 = arith.constant 0 : i32
    %c0_i32_1 = arith.constant 0 : i32
    %c0_i32_2 = arith.constant 0 : i32
    return %c0_i32, %c0_i32_0, %c0_i32_1 : i32, i32, i32
  }
  func.func @transform_12(%arg0: i32) -> (i32, i32) {
    %c0_i32 = arith.constant 0 : i32
    %c0_i32_0 = arith.constant 0 : i32
    %c0_i32_1 = arith.constant 0 : i32
    return %c0_i32, %c0_i32_0 : i32, i32
  }
  func.func @transform_13(%arg0: i32) -> (i32, i32, i32) {
    %c0_i32 = arith.constant 0 : i32
    %c0_i32_0 = arith.constant 0 : i32
    %c0_i32_1 = arith.constant 0 : i32
    %c0_i32_2 = arith.constant 0 : i32
    return %c0_i32, %c0_i32_0, %c0_i32_1 : i32, i32, i32
  }
  func.func @transform_14(%arg0: i32) -> (i32, i32, i32, i32) {
    %c0_i32 = arith.constant 0 : i32
    %c0_i32_0 = arith.constant 0 : i32
    %c0_i32_1 = arith.constant 0 : i32
    %c0_i32_2 = arith.constant 0 : i32
    %c0_i32_3 = arith.constant 0 : i32
    return %c0_i32, %c0_i32_0, %c0_i32_1, %c0_i32_2 : i32, i32, i32, i32
  }
  func.func @transform_15(%arg0: i32) -> (i32, i32, i32, i32) {
    %c0_i32 = arith.constant 0 : i32
    %c0_i32_0 = arith.constant 0 : i32
    %c0_i32_1 = arith.constant 0 : i32
    %c0_i32_2 = arith.constant 0 : i32
    %c0_i32_3 = arith.constant 0 : i32
    return %c0_i32, %c0_i32_0, %c0_i32_1, %c0_i32_2 : i32, i32, i32, i32
  }
  func.func @transform_16(%arg0: i32) -> (i32, i32, i32) {
    %c0_i32 = arith.constant 0 : i32
    %c0_i32_0 = arith.constant 0 : i32
    %c0_i32_1 = arith.constant 0 : i32
    %c0_i32_2 = arith.constant 0 : i32
    return %c0_i32, %c0_i32_0, %c0_i32_1 : i32, i32, i32
  }
  func.func @transform_17(%arg0: i32) -> (i32, i32, i32, i32) {
    %c0_i32 = arith.constant 0 : i32
    %c0_i32_0 = arith.constant 0 : i32
    %c0_i32_1 = arith.constant 0 : i32
    %c0_i32_2 = arith.constant 0 : i32
    %c0_i32_3 = arith.constant 0 : i32
    return %c0_i32, %c0_i32_0, %c0_i32_1, %c0_i32_2 : i32, i32, i32, i32
  }
  func.func @transform_18(%arg0: i32) -> (i32, i32, i32, i32) {
    %c0_i32 = arith.constant 0 : i32
    %c0_i32_0 = arith.constant 0 : i32
    %c0_i32_1 = arith.constant 0 : i32
    %c0_i32_2 = arith.constant 0 : i32
    %c0_i32_3 = arith.constant 0 : i32
    return %c0_i32, %c0_i32_0, %c0_i32_1, %c0_i32_2 : i32, i32, i32, i32
  }
  func.func @transform_19(%arg0: i32) -> (i32, i32, i32, i32) {
    %c0_i32 = arith.constant 0 : i32
    %c0_i32_0 = arith.constant 0 : i32
    %c0_i32_1 = arith.constant 0 : i32
    %c0_i32_2 = arith.constant 0 : i32
    %c0_i32_3 = arith.constant 0 : i32
    return %c0_i32, %c0_i32_0, %c0_i32_1, %c0_i32_2 : i32, i32, i32, i32
  }
  func.func @transform_20(%arg0: i32) -> (i32, i32, i32) {
    %c0_i32 = arith.constant 0 : i32
    %c0_i32_0 = arith.constant 0 : i32
    %c0_i32_1 = arith.constant 0 : i32
    %c0_i32_2 = arith.constant 0 : i32
    return %c0_i32, %c0_i32_0, %c0_i32_1 : i32, i32, i32
  }
  func.func @transform_21(%arg0: i32) -> (i32, i32, i32) {
    %c0_i32 = arith.constant 0 : i32
    %c0_i32_0 = arith.constant 0 : i32
    %c0_i32_1 = arith.constant 0 : i32
    %c0_i32_2 = arith.constant 0 : i32
    return %c0_i32, %c0_i32_0, %c0_i32_1 : i32, i32, i32
  }
  func.func @transform_22(%arg0: i32) -> (i32, i32, i32) {
    %c0_i32 = arith.constant 0 : i32
    %c0_i32_0 = arith.constant 0 : i32
    %c0_i32_1 = arith.constant 0 : i32
    %c0_i32_2 = arith.constant 0 : i32
    return %c0_i32, %c0_i32_0, %c0_i32_1 : i32, i32, i32
  }
  func.func @transform_23(%arg0: i32) -> (i32, i32) {
    %c0_i32 = arith.constant 0 : i32
    %c0_i32_0 = arith.constant 0 : i32
    %c0_i32_1 = arith.constant 0 : i32
    return %c0_i32, %c0_i32_0 : i32, i32
  }
  func.func @transform_24(%arg0: i32) -> (i32, i32) {
    %c0_i32 = arith.constant 0 : i32
    %c0_i32_0 = arith.constant 0 : i32
    %c0_i32_1 = arith.constant 0 : i32
    return %c0_i32, %c0_i32_0 : i32, i32
  }
  func.func @transform_25(%arg0: i32) -> (i32, i32, i32) {
    %c0_i32 = arith.constant 0 : i32
    %c0_i32_0 = arith.constant 0 : i32
    %c0_i32_1 = arith.constant 0 : i32
    return %arg0, %c0_i32, %c0_i32_0 : i32, i32, i32
  }
  func.func @transform_26(%arg0: i32) -> (i32, i32, i32) {
    %c0_i32 = arith.constant 0 : i32
    %c0_i32_0 = arith.constant 0 : i32
    %c0_i32_1 = arith.constant 0 : i32
    return %arg0, %c0_i32, %c0_i32_0 : i32, i32, i32
  }
}

</mosaic_0001>

<bundles_post_ra>
// kernel: t5_forward.1
= control target key start
LH: loop header
LB: loop body
LE: loop exit
PB: predicated region body
PF: predicated region fallthrough
CT: control target
= control target key end

     0   :  { %s8461_s0 = inlined_call_operand.vmem [shape: f32[2,8,32], index: 0, kind: input, shape index: {}]   ;;  %s8462_s1 = inlined_call_operand.vmem [shape: f32[2,8,32], index: 1, kind: input, shape index: {}]   ;;  %s8463_s2 = inlined_call_operand.vmem [shape: f32[2,1,8], index: 2, kind: input, shape index: {}]   ;;  %s8464_s3 = inlined_call_operand.vmem [shape: s32[2,8,1], index: 3, kind: input, shape index: {}]   ;;  %s8465_s4 = inlined_call_operand.vmem [shape: f32[4,8,8], index: 4, kind: input, shape index: {}]   ;;  %s8466_s5 = inlined_call_operand.vmem [shape: f32[4,8,8], index: 5, kind: input, shape index: {}]   ;;  %s8467_s6 = inlined_call_operand.vmem [shape: f32[2,1,32], index: 6, kind: input, shape index: {}]   ;;  %s8468_s7 = inlined_call_operand.vmem [shape: f32[2,12,32,8], index: 7, kind: input, shape index: {}]   ;;  %s8469_s8 = inlined_call_operand.vmem [shape: f32[2,4,8,32], index: 8, kind: input, shape index: {}]   ;;  %s8470_s9 = inlined_call_operand.vmem [shape: f32[2,1,32], index: 9, kind: input, shape index: {}]   ;;  %s8471_s10 = inlined_call_operand.vmem [shape: f32[2,32,64], index: 10, kind: input, shape index: {}]   ;;  %s8472_s11 = inlined_call_operand.vmem [shape: f32[2,64,32], index: 11, kind: input, shape index: {}]   ;;  %s8473_s12 = inlined_call_operand.vmem [shape: f32[1,32], index: 12, kind: input, shape index: {}]   ;;  %s8474_s13 = inlined_call_operand.vmem [shape: f32[2,1,32], index: 13, kind: input, shape index: {}]   ;;  %s8475_s14 = inlined_call_operand.vmem [shape: f32[2,12,32,8], index: 14, kind: input, shape index: {}]   ;;  %s8476_s15 = inlined_call_operand.vmem [shape: f32[2,4,8,32], index: 15, kind: input, shape index: {}]   ;;  %s8477_s16 = inlined_call_operand.vmem [shape: f32[2,1,32], index: 16, kind: input, shape index: {}]   ;;  %s8478_s17 = inlined_call_operand.vmem [shape: f32[2,4,32,8], index: 17, kind: input, shape index: {}]   ;;  %s8479_s18 = inlined_call_operand.vmem [shape: f32[2,8,32,8], index: 18, kind: input, shape index: {}]   ;;  %s8480_s19 = inlined_call_operand.vmem [shape: f32[2,4,8,32], index: 19, kind: input, shape index: {}]   ;;  %s8481_s20 = inlined_call_operand.vmem [shape: f32[2,1,32], index: 20, kind: input, shape index: {}]   ;;  %s8482_s21 = inlined_call_operand.vmem [shape: f32[2,32,64], index: 21, kind: input, shape index: {}]   ;;  %s8483_s22 = inlined_call_operand.vmem [shape: f32[2,64,32], index: 22, kind: input, shape index: {}]   ;;  %s8484_s23 = inlined_call_operand.vmem [shape: f32[1,32], index: 23, kind: input, shape index: {}]   ;;  %s8485_s24 = inlined_call_operand.vmem [shape: f32[128,32], index: 24, kind: input, shape index: {}]   ;;  %s8486_s25 = inlined_call_operand.hbm [shape: f32[2,8,128], index: 25, kind: output, shape index: {0}]   ;;  %s8487_s26 = inlined_call_operand.vmem [shape: f32[2,1,128], index: 26, kind: output, shape index: {1}]  }
   0x1   :  { %8514 = sst [smem:[#allocation15_spill]] %s8461_s0 }
   0x2   :  { %8515 = sst [smem:[#allocation16_spill]] %s8462_s1 }
   0x3   :  { %8516 = sst [smem:[#allocation17_spill]] %s8463_s2 }
   0x4   :  { %8517 = sst [smem:[#allocation18_spill]] %s8464_s3 }
   0x5   :  { %8518 = sst [smem:[#allocation19_spill]] %s8465_s4 }
   0x6   :  { %8519 = sst [smem:[#allocation20_spill]] %s8466_s5 }
   0x7   :  { %8520 = sst [smem:[#allocation21_spill]] %s8467_s6 }
   0x8   :  { %8521 = sst [smem:[#allocation22_spill]] %s8468_s7 }
   0x9   :  { %8522 = sst [smem:[#allocation23_spill]] %s8469_s8 }
   0xa   :  { %8523 = sst [smem:[#allocation24_spill]] %s8470_s9 }
   0xb   :  { %8524 = sst [smem:[#allocation25_spill]] %s8471_s10 }
   0xc   :  { %8525 = sst [smem:[#allocation26_spill]] %s8484_s23 }
   0xd   :  { %8526 = sst [smem:[#allocation27_spill]] %s8485_s24 }
   0xe   :  { %8527 = sst [smem:[#allocation28_spill]] %s8486_s25 }
   0xf   :  { %8528 = sst [smem:[#allocation29_spill]] %s8487_s26 }
  0x10   :  { %32 = vsyncpa [#allocation3], 0 }
  0x11   :  { %34 = vsyncpa [#allocation3 + $0x1], 0  ;;  %s6619_s27 = smov 0   ;;  %s6621_s3 = smov 0  }
  0x12   :  { %s6623_s7 = smov 0   ;;  %s6625_s28 = smov 0  }
  0x13 LB: > { %8529 = sst [smem:[#allocation5_spill]] %s6467_s27  ;;  %s6640_s8 = sadd.s32 4294967295, %s6479_s28   ;;  %s6479_s28 = sphi %s6625_s28, %s8573_s28   ;;  %s6475_s7 = sphi %s6623_s7, %s8576_s7   ;;  %s6471_s3 = sphi %s6621_s3, %s8575_s3   ;;  %s6467_s27 = sphi %s6619_s27, %s8574_s27  }
  0x14   : > { %8530 = sst [smem:[#allocation6_spill]] %s6471_s3  ;;  %s5876_s4 = sadd.s32 4294967294, %s6479_s28  }
  0x15   : > { %8531 = sst [smem:[#allocation7_spill]] %s6475_s7  ;;  %s6644_s29 = sadd.s32 1, %s6479_s28  }
  0x16   : > { %8532 = sst [smem:[#allocation8_spill]] %s6479_s28  ;;  %s592_s0 = sadd.s32 1, %s6475_s7 }
  0x17   : > { %8533 = sst [smem:[#allocation9_spill]] %s6640_s8  ;;  %s589_s9 = ssub.s32 %s6479_s28, %s6644_s29 }
  0x18   : > { %8534 = sst [smem:[#allocation10_spill]] %s6644_s29  ;;  %p602_p0 = scmp.ne.s32.totalorder %s6475_s7, %s6471_s3 }
  0x19   : > { %p590_p1 = scmp.eq.s32.totalorder %s589_s9, 0  ;;  %p603_p2 = scmp.eq.s32.totalorder %s6640_s8, 1 }
  0x1a   : > { %p608_p3 = scmp.ne.s32.totalorder %s6471_s3, %s6467_s27  ;;  %p609_p4 = scmp.eq.s32.totalorder %s5876_s4, 1 }
  0x1b   : > { %s6655_s30 = scalar_select %p590_p1, %s6475_s7, %s592_s0  }
  0x1c   : > { %p6657_p5 = por %p603_p2, %p602_p0  ;;  %p6661_p6 = por %p609_p4, %p608_p3 }
  0x1d   : > { %8535 = sst [smem:[#allocation11_spill]] %s6655_s30  ;;  %p5879_p7 = scmp.ge.s32.totalorder %s6479_s28, 1 }
  0x1e   : > { %s8536_s2 = scalar_select %p6657_p5, 1, 0 }
  0x1f   : > { %s8538_s5 = scalar_select %p6661_p6, 1, 0 }
  0x20   : > { %8537 = sst [smem:[#allocation12_spill]] %s8536_s2  ;;  %p743_p8 = scmp.lt.s32.totalorder %s6479_s28, 3 }
  0x21   : > { %8539 = sst [smem:[#allocation13_spill]] %s8538_s5 }
  0x22   : > { %p744_p9 = pnand %p5879_p7, %p743_p8 }
  0x24   : > { %747 = sbr.rel (%p744_p9) target bundleno = 7922 (0x1ef2), region = 120 }
  0x29   : > { %p826_p10 = scmp.lt.s32.totalorder %s6640_s8, 1  ;;  %s8541_s0 = sld [smem:[#allocation17_spill]]  ;;  %vm912_vm0 = vcmask 261120   ;;  %v6481_v3 = vmov 32.0   ;;  %vm1300_vm5 = vcmask 64512   ;;  %vm1432_vm6 = vcmask 1043456  }
  0x2a   : > { %s8542_s29 = sld [smem:[#allocation15_spill]]  ;;  %6285 = vrcp.f32 %v6481_v3  ;;  %vm1657_vm10 = vcmask 523264  }
  0x2b   : > { %s6669_s10 = scalar_select %p826_p10, %s6640_s8, 1 }
  0x2c   : > { %s8544_s1 = sld [smem:[#allocation21_spill]] }
  0x2d   : > { %8540 = sst [smem:[#allocation14_spill]] %s6669_s10  ;;  %s6672_s6 = sshll.u32 %s6669_s10, 3 }
  0x2e   : > { %s8545_s28 = sld [smem:[#allocation19_spill]] }
  0x2f   : > { %s6678_s9 = scalar_lea.vmem %s8541_s0, %s6669_s10  ;;  %s8543_s0 = sld [smem:[#allocation22_spill]] }
  0x30   : > { %s829_s5 = scalar_lea.vmem %s8542_s29, %s6672_s6  ;;  %v6286_v4 = vpop.eup %6285  ;;  %s8547_s2 = sld [smem:[#allocation23_spill]] }
  0x31   : > { %v6684_v0 = vld [vmem:[%s829_s5] sm:$0xff]  ;;  %v917_v5 = vmul.f32 32.0, %v6286_v4  ;;  %vm921_vm1 = vweird.f32 %v6286_v4  ;;  %s8548_s25 = sld [smem:[#allocation25_spill]] }
  0x32   : > { %v911_v1 = vmul.f32 %v6684_v0, %v6684_v0  ;;  %s8553_s30 = sld [smem:[#allocation16_spill]] }
  0x33   : > { %v918_v6 = vsub.f32 1.0, %v917_v5  ;;  %s8554_s24 = sld [smem:[#allocation20_spill]] }
  0x34   : > { %v913_v2 = vsel %vm912_vm0, %v911_v1, 0.0  ;;  %s8546_s26 = smov %s8545_s28  ;;  %s8562_s3 = sld [smem:[#allocation18_spill]] }
  0x35   : > { %914 = vadd.xlane.f32.xlu0 %v913_v2  ;;  %v861_v7 = vld [vmem:[%s8543_s0 + $0x10] sm:$0xff]  ;;  %v862_v8 = vld [vmem:[%s8543_s0 + $0x18] sm:$0xff]  ;;  %v919_v22 = vmul.f32 %v6286_v4, %v918_v6  ;;  %v859_v26 = vld [vmem:[%s8543_s0] sm:$0xff]  ;;  %s8564_s4 = sld [smem:[#allocation26_spill]] }
  0x36   : > { %v869_v9 = vld [vmem:[%s8543_s0 + $0x50] sm:$0xff]  ;;  %v943_v10 = vpack.c.bf16 %v861_v7, %v861_v7  ;;  %v944_v11 = vpack.c.bf16 %v862_v8, %v862_v8  ;;  %v870_v12 = vld [vmem:[%s8543_s0 + $0x58] sm:$0xff]  ;;  %v860_v27 = vld [vmem:[%s8543_s0 + $0x8] sm:$0xff]  ;;  %v941_v30 = vpack.c.bf16 %v859_v26, %v859_v26 }
  0x37   : > { %v951_v13 = vpack.c.bf16 %v869_v9, %v869_v9  ;;  %v873_v14 = vld [vmem:[%s8543_s0 + $0x70] sm:$0xff]  ;;  %v874_v15 = vld [vmem:[%s8543_s0 + $0x78] sm:$0xff]  ;;  %v952_v16 = vpack.c.bf16 %v870_v12, %v870_v12  ;;  %v867_v28 = vld [vmem:[%s8543_s0 + $0x40] sm:$0xff]  ;;  %v942_v31 = vpack.c.bf16 %v860_v27, %v860_v27  ;;  %v920_v49 = vadd.f32 %v6286_v4, %v919_v22 }
  0x38   : > { %v955_v17 = vpack.c.bf16 %v873_v14, %v873_v14  ;;  %v956_v18 = vpack.c.bf16 %v874_v15, %v874_v15  ;;  %v995_v19 = vunpack.c.l.b16 %v943_v10  ;;  %v996_v20 = vunpack.c.l.b16 %v944_v11  ;;  %v868_v32 = vld [vmem:[%s8543_s0 + $0x48] sm:$0xff]  ;;  %v871_v34 = vld [vmem:[%s8543_s0 + $0x60] sm:$0xff]  ;;  %v865_v52 = vld [vmem:[%s8543_s0 + $0x30] sm:$0xff]  ;;  %s833_s5 = scalar_lea.vmem %s8553_s30, %s6672_s6 }
  0x39   : > { %v1048_v21 = vunpack.c.l.b16 %v951_v13  ;;  %v1049_v23 = vunpack.c.l.b16 %v952_v16  ;;  %v949_v33 = vpack.c.bf16 %v867_v28, %v867_v28  ;;  %v872_v35 = vld [vmem:[%s8543_s0 + $0x68] sm:$0xff]  ;;  %v950_v38 = vpack.c.bf16 %v868_v32, %v868_v32  ;;  %v866_v53 = vld [vmem:[%s8543_s0 + $0x38] sm:$0xff]  ;;  %v877_v54 = vld [vmem:[%s8543_s0 + $0x90] sm:$0xff] }
  0x3a   : > { %v1073_v24 = vunpack.c.l.b16 %v955_v17  ;;  %v1074_v25 = vunpack.c.l.b16 %v956_v18  ;;  %v998_v29 = vpack.c.b16 %v996_v20, %v995_v19  ;;  %v953_v39 = vpack.c.bf16 %v871_v34, %v871_v34  ;;  %v878_v57 = vld [vmem:[%s8543_s0 + $0x98] sm:$0xff]  ;;  %v889_v59 = vld [vmem:[%s8543_s0 + $0xf0] sm:$0xff]  ;;  %v863_v2 = vld [vmem:[%s8543_s0 + $0x20] sm:$0xff]  ;;  %s840_s8 = scalar_lea.vmem %s8562_s3, %s6672_s6 }
  0x3b   : > { %v1051_v36 = vpack.c.b16 %v1049_v23, %v1048_v21  ;;  %v993_v40 = vunpack.c.l.b16 %v941_v30  ;;  %v994_v41 = vunpack.c.l.b16 %v942_v31  ;;  %v1046_v42 = vunpack.c.l.b16 %v949_v33  ;;  %v890_v60 = vld [vmem:[%s8543_s0 + $0xf8] sm:$0xff]  ;;  %v864_v3 = vld [vmem:[%s8543_s0 + $0x28] sm:$0xff]  ;;  %v887_v18 = vld [vmem:[%s8543_s0 + $0xe0] sm:$0xff] }
  0x3c   : > { %v1076_v37 = vpack.c.b16 %v1074_v25, %v1073_v24  ;;  %1010 = vmatpush.bf16.msra.mxu1 %v998_v29  ;;  %v954_v43 = vpack.c.bf16 %v872_v35, %v872_v35  ;;  %v1047_v44 = vunpack.c.l.b16 %v950_v38  ;;  %v1071_v45 = vunpack.c.l.b16 %v953_v39  ;;  %v876_v9 = vld [vmem:[%s8543_s0 + $0x88] sm:$0xff]  ;;  %v882_v38 = vld [vmem:[%s8543_s0 + $0xb8] sm:$0xff]  ;;  %v885_v39 = vld [vmem:[%s8543_s0 + $0xd0] sm:$0xff] }
  0x3d   : > { %1060 = vmatpush.bf16.msra.mxu2 %v1051_v36  ;;  %v997_v46 = vpack.c.b16 %v994_v41, %v993_v40  ;;  %v6725_v51 = vsel %vm921_vm1, %v6286_v4, %v920_v49  ;;  %v947_v55 = vpack.c.bf16 %v865_v52, %v865_v52  ;;  %v948_v56 = vpack.c.bf16 %v866_v53, %v866_v53  ;;  %v875_v4 = vld [vmem:[%s8543_s0 + $0x80] sm:$0xff]  ;;  %v888_v19 = vld [vmem:[%s8543_s0 + $0xe8] sm:$0xff]  ;;  %v886_v40 = vld [vmem:[%s8543_s0 + $0xd8] sm:$0xff] }
  0x3e   : > { %1085 = vmatpush.bf16.msra.mxu3 %v1076_v37  ;;  %v1072_v47 = vunpack.c.l.b16 %v954_v43  ;;  %v1050_v48 = vpack.c.b16 %v1047_v44, %v1046_v42  ;;  %v959_v58 = vpack.c.bf16 %v877_v54, %v877_v54  ;;  %v960_v62 = vpack.c.bf16 %v878_v57, %v878_v57  ;;  %v881_v37 = vld [vmem:[%s8543_s0 + $0xb0] sm:$0xff]  ;;  %v894_v42 = vld [vmem:[%s8543_s0 + $0x118] sm:$0xff]  ;;  %v879_v52 = vld [vmem:[%s8543_s0 + $0xa0] sm:$0xff] }
  0x3f   : > { %v971_v63 = vpack.c.bf16 %v889_v59, %v889_v59  ;;  %v972_v1 = vpack.c.bf16 %v890_v60, %v890_v60  ;;  %v1023_v6 = vunpack.c.l.b16 %v947_v55  ;;  %v1024_v7 = vunpack.c.l.b16 %v948_v56  ;;  %v893_v41 = vld [vmem:[%s8543_s0 + $0x110] sm:$0xff]  ;;  %v880_v53 = vld [vmem:[%s8543_s0 + $0xa8] sm:$0xff]  ;;  %v883_v54 = vld [vmem:[%s8543_s0 + $0xc0] sm:$0xff] }
  0x40   : > { %1011 = vmatpush.bf16.msra.mxu1 %v997_v46  ;;  %v1075_v50 = vpack.c.b16 %v1072_v47, %v1071_v45  ;;  %v1098_v8 = vunpack.c.l.b16 %v959_v58  ;;  %v1099_v10 = vunpack.c.l.b16 %v960_v62  ;;  %v945_v13 = vpack.c.bf16 %v863_v2, %v863_v2  ;;  %v884_v58 = vld [vmem:[%s8543_s0 + $0xc8] sm:$0xff]  ;;  %v891_v59 = vld [vmem:[%s8543_s0 + $0x100] sm:$0xff] }
  0x41   : > { %1061 = vmatpush.bf16.msra.mxu2 %v1050_v48  ;;  %v1173_v11 = vunpack.c.l.b16 %v971_v63  ;;  %v1174_v12 = vunpack.c.l.b16 %v972_v1  ;;  %v1026_v15 = vpack.c.b16 %v1024_v7, %v1023_v6  ;;  %v946_v16 = vpack.c.bf16 %v864_v3, %v864_v3  ;;  %v892_v60 = vld [vmem:[%s8543_s0 + $0x108] sm:$0xff] }
  0x42   : > { %1086 = vmatpush.bf16.msra.mxu3 %v1075_v50  ;;  %v957_v17 = vpack.c.bf16 %v875_v4, %v875_v4  ;;  %v1101_v20 = vpack.c.b16 %v1099_v10, %v1098_v8  ;;  %v1021_v22 = vunpack.c.l.b16 %v945_v13  ;;  %v958_v23 = vpack.c.bf16 %v876_v9, %v876_v9 }
  0x43   : > { %v1176_v21 = vpack.c.b16 %v1174_v12, %v1173_v11  ;;  %v1022_v24 = vunpack.c.l.b16 %v946_v16  ;;  %v969_v27 = vpack.c.bf16 %v887_v18, %v887_v18  ;;  %v970_v28 = vpack.c.bf16 %v888_v19, %v888_v19 }
  0x44   : > { %1035 = vmatpush.bf16.msrb.mxu1 %v1026_v15  ;;  %v1096_v25 = vunpack.c.l.b16 %v957_v17  ;;  %v1097_v26 = vunpack.c.l.b16 %v958_v23  ;;  %v963_v44 = vpack.c.bf16 %v881_v37, %v881_v37  ;;  %v964_v45 = vpack.c.bf16 %v882_v38, %v882_v38  ;;  %v897_v23 = vld [vmem:[%s8543_s0 + $0x130] sm:$0xff]  ;;  %v895_v37 = vld [vmem:[%s8543_s0 + $0x120] sm:$0xff]  ;;  %v896_v38 = vld [vmem:[%s8543_s0 + $0x128] sm:$0xff] }
  0x45   : > { %1110 = vmatpush.bf16.msrb.mxu2 %v1101_v20  ;;  %v1025_v29 = vpack.c.b16 %v1022_v24, %v1021_v22  ;;  %v1171_v31 = vunpack.c.l.b16 %v969_v27  ;;  %v1172_v32 = vunpack.c.l.b16 %v970_v28  ;;  %v967_v46 = vpack.c.bf16 %v885_v39, %v885_v39  ;;  %v898_v24 = vld [vmem:[%s8543_s0 + $0x138] sm:$0xff]  ;;  %v899_v39 = vld [vmem:[%s8543_s0 + $0x140] sm:$0xff] }
  0x46   : > { %1185 = vmatpush.bf16.msrb.mxu3 %v1176_v21  ;;  %v1100_v30 = vpack.c.b16 %v1097_v26, %v1096_v25  ;;  %v968_v47 = vpack.c.bf16 %v886_v40, %v886_v40  ;;  %v975_v48 = vpack.c.bf16 %v893_v41, %v893_v41  ;;  %v976_v50 = vpack.c.bf16 %v894_v42, %v894_v42  ;;  %v901_v25 = vld [vmem:[%s8543_s0 + $0x150] sm:$0xff]  ;;  %v902_v28 = vld [vmem:[%s8543_s0 + $0x158] sm:$0xff]  ;;  %v900_v40 = vld [vmem:[%s8543_s0 + $0x148] sm:$0xff] }
  0x47   : > { %v1175_v33 = vpack.c.b16 %v1172_v32, %v1171_v31  ;;  %v1123_v56 = vunpack.c.l.b16 %v963_v44  ;;  %v1124_v57 = vunpack.c.l.b16 %v964_v45  ;;  %v1148_v62 = vunpack.c.l.b16 %v967_v46  ;;  %v903_v41 = vld [vmem:[%s8543_s0 + $0x160] sm:$0xff]  ;;  %v904_v42 = vld [vmem:[%s8543_s0 + $0x168] sm:$0xff] }
  0x48   : > { %1036 = vmatpush.bf16.msrb.mxu1 %v1025_v29  ;;  %v1149_v63 = vunpack.c.l.b16 %v968_v47  ;;  %v1198_v1 = vunpack.c.l.b16 %v975_v48  ;;  %v961_v2 = vpack.c.bf16 %v879_v52, %v879_v52  ;;  %v1199_v4 = vunpack.c.l.b16 %v976_v50  ;;  %v905_v29 = vld [vmem:[%s8543_s0 + $0x170] sm:$0xff] }
  0x49   : > { %1111 = vmatpush.bf16.msrb.mxu2 %v1100_v30  ;;  %v965_v6 = vpack.c.bf16 %v883_v54, %v883_v54  ;;  %v966_v8 = vpack.c.bf16 %v884_v58, %v884_v58  ;;  %v973_v9 = vpack.c.bf16 %v891_v59, %v891_v59  ;;  %v974_v10 = vpack.c.bf16 %v892_v60, %v892_v60  ;;  %v906_v30 = vld [vmem:[%s8543_s0 + $0x178] sm:$0xff] }
  0x4a   : > { %1186 = vmatpush.bf16.msrb.mxu3 %v1175_v33  ;;  %v1126_v12 = vpack.c.b16 %v1124_v57, %v1123_v56  ;;  %v1121_v13 = vunpack.c.l.b16 %v961_v2  ;;  %v1201_v15 = vpack.c.b16 %v1199_v4, %v1198_v1  ;;  %v979_v31 = vpack.c.bf16 %v897_v23, %v897_v23 }
  0x4b   : > { %v1146_v17 = vunpack.c.l.b16 %v965_v6  ;;  %v1147_v19 = vunpack.c.l.b16 %v966_v8  ;;  %v1196_v20 = vunpack.c.l.b16 %v973_v9  ;;  %v1197_v21 = vunpack.c.l.b16 %v974_v10 }
  0x4c   : > { %v980_v32 = vpack.c.bf16 %v898_v24, %v898_v24  ;;  %v983_v33 = vpack.c.bf16 %v901_v25, %v901_v25  ;;  %v977_v46 = vpack.c.bf16 %v895_v37, %v895_v37  ;;  %v978_v50 = vpack.c.bf16 %v896_v38, %v896_v38 }
  0x4d   : > { %v1150_v26 = vpack.c.b16 %v1147_v19, %v1146_v17  ;;  %v1200_v27 = vpack.c.b16 %v1197_v21, %v1196_v20  ;;  %v981_v52 = vpack.c.bf16 %v899_v39, %v899_v39  ;;  %v985_v54 = vpack.c.bf16 %v903_v41, %v903_v41 }
  0x4e   : > { %v1224_v44 = vunpack.c.l.b16 %v980_v32  ;;  %v1248_v45 = vunpack.c.l.b16 %v983_v33  ;;  %v1221_v59 = vunpack.c.l.b16 %v977_v46  ;;  %v1222_v60 = vunpack.c.l.b16 %v978_v50  ;;  %v849_v50 = vld [vmem:[%s8545_s28 + $0x18] sm:$0xff]  ;;  %s8549_s28 = sld [smem:[#allocation24_spill]] }
  0x50   : > { %v1225_v2 = vpack.c.b16 %v1222_v60, %v1221_v59 }
  0x54   : > { %s8550_s10 = smov %s8549_s28 }
  0xa8   : > { %v915_v61 = vpop.xlane.xlu0 %914 }
  0xa9   : > { %v923_v5 = vmul.f32 %v6725_v51, %v915_v61  ;;  %v6273_v61 = vld [vmem:[%s8544_s1] ss:$0 sm:$0xff] }
  0xab   : > { %v924_v14 = vadd.f32 1e-06, %v923_v5  ;;  %v962_v5 = vpack.c.bf16 %v880_v53, %v880_v53  ;;  %v982_v53 = vpack.c.bf16 %v900_v40, %v900_v40 }
  0xad   : > { %6287 = vrsqrt.f32 %v924_v14  ;;  %vm931_vm3 = vweird.f32 %v924_v14  ;;  %v1122_v16 = vunpack.c.l.b16 %v962_v5 }
  0xaf   : > { %v1125_v22 = vpack.c.b16 %v1122_v16, %v1121_v13 }
  0xb3   : > { %v6288_v34 = vpop.eup %6287 }
  0xb4   : > { %v926_v35 = vmul.f32 %v6288_v34, %v924_v14  ;;  %vm932_vm2 = vweird.f32 %v6288_v34  ;;  %v1151_v14 = vpack.c.b16 %v1149_v63, %v1148_v62  ;;  %v1247_v62 = vunpack.c.l.b16 %v982_v53 }
  0xb5   : > { %vm933_vm4 = vmor %vm931_vm3, %vm932_vm2  ;;  %v1271_v63 = vunpack.c.l.b16 %v985_v54  ;;  %v847_v54 = vld [vmem:[%s8546_s26 + $0x8] sm:$0xff] }
  0xb6   : > { %v927_v36 = vmul.f32 %v6288_v34, %v926_v35  ;;  %v987_v35 = vpack.c.bf16 %v905_v29, %v905_v29 }
  0xb8   : > { %v928_v43 = vmul.f32 0.5, %v927_v36  ;;  %v988_v36 = vpack.c.bf16 %v906_v30, %v906_v30  ;;  %v1273_v48 = vunpack.c.l.b16 %v987_v35 }
  0xba   : > { %v929_v49 = vsub.f32 1.5, %v928_v43  ;;  %v1223_v43 = vunpack.c.l.b16 %v979_v31 }
  0xbc   : > { %v930_v55 = vmul.f32 %v6288_v34, %v929_v49  ;;  %v1274_v49 = vunpack.c.l.b16 %v988_v36  ;;  %v1226_v56 = vpack.c.b16 %v1224_v44, %v1223_v43 }
  0xbe   : > { %v934_v3 = vsel %vm933_vm4, %v6288_v34, %v930_v55  ;;  %v984_v34 = vpack.c.bf16 %v902_v28, %v902_v28  ;;  %v986_v55 = vpack.c.bf16 %v904_v42, %v904_v42  ;;  %v1276_v58 = vpack.c.b16 %v1274_v49, %v1273_v48 }
  0xbf   : > { %v935_v7 = vmul.f32 %v934_v3, %v6684_v0 }
  0xc0   : > { %v1249_v47 = vunpack.c.l.b16 %v984_v34  ;;  %v1272_v1 = vunpack.c.l.b16 %v986_v55  ;;  %v846_v55 = vld [vmem:[%s8546_s26] sm:$0xff] }
  0xc1   : > { %v939_v11 = vmul.f32 %v6273_v61, %v935_v7  ;;  %v1246_v61 = vunpack.c.l.b16 %v981_v52  ;;  %v6272_v52 = vld [vmem:[%s6678_s9] ss:$0 sm:$0xff] }
  0xc2   : > { %v1251_v57 = vpack.c.b16 %v1249_v47, %v1248_v45  ;;  %v1275_v4 = vpack.c.b16 %v1272_v1, %v1271_v63  ;;  %v6882_v53 = vadd.f32 %v6272_v52, %v849_v50  ;;  %v6893_v60 = vadd.f32 %v6272_v52, %v846_v55  ;;  %v907_v50 = vld [vmem:[%s8547_s2] sm:$0xff] }
  0xc3   : > { %v6804_v18 = vpack.c.bf16 %v939_v11, %v939_v11  ;;  %v1250_v3 = vpack.c.b16 %v1247_v62, %v1246_v61 }
  0xc5   : > { %5884 = vmatmul.msk.bf16.vlgmr.msra.gmra.mxu1 %vm912_vm0, %v6804_v18  ;;  %5886 = vmatmul.msk.bf16.vlgmr.msra.gmra.mxu2 %vm912_vm0, %v6804_v18 }
  0xc6   : > { %5887 = vmatmul.msk.bf16.vlgmr.msra.gmra.mxu3 %vm912_vm0, %v6804_v18  ;;  %1135 = vmatpush.bf16.msra.mxu1 %v1126_v12 }
  0xc7   : > { %1160 = vmatpush.bf16.msra.mxu2 %v1151_v14  ;;  %1210 = vmatpush.bf16.msra.mxu3 %v1201_v15 }
  0xca   : > { %1136 = vmatpush.bf16.msra.mxu1 %v1125_v22 }
  0xcb   : > { %1161 = vmatpush.bf16.msra.mxu2 %v1150_v26  ;;  %1211 = vmatpush.bf16.msra.mxu3 %v1200_v27 }
  0xd5   : > { %5885 = vmatmul.msk.bf16.vlgmr.msrb.gmra.mxu1 %vm912_vm0, %v6804_v18  ;;  %5888 = vmatmul.msk.bf16.vlgmr.msrb.gmra.mxu2 %vm912_vm0, %v6804_v18 }
  0xd6   : > { %5891 = vmatmul.msk.bf16.vlgmr.msrb.gmra.mxu3 %vm912_vm0, %v6804_v18  ;;  %1235 = vmatpush.bf16.msrb.mxu1 %v1226_v56 }
  0xd7   : > { %1260 = vmatpush.bf16.msrb.mxu2 %v1251_v57  ;;  %1285 = vmatpush.bf16.msrb.mxu3 %v1276_v58  ;;  %v6890_v57 = vadd.f32 %v6272_v52, %v847_v54  ;;  %v1510_v54 = vpack.c.bf16 %v907_v50, %v907_v50 }
  0xd9   : > { %v1518_v55 = vsel %vm1432_vm6, %v1510_v54, 0 }
  0xda   : > { %1236 = vmatpush.bf16.msrb.mxu1 %v1225_v2 }
  0xdb   : > { %1261 = vmatpush.bf16.msrb.mxu2 %v1250_v3  ;;  %1286 = vmatpush.bf16.msrb.mxu3 %v1275_v4  ;;  %v848_v4 = vld [vmem:[%s8546_s26 + $0x10] sm:$0xff]  ;;  %s8563_s26 = sld [smem:[#allocation6_spill]] }
  0xe1   : > { %s818_s27 = sand.u32 1, %s8563_s26  }
  0xe5   : > { %5889 = vmatmul.msk.bf16.vlgmr.msra.gmra.mxu1 %vm912_vm0, %v6804_v18  ;;  %5890 = vmatmul.msk.bf16.vlgmr.msra.gmra.mxu2 %vm912_vm0, %v6804_v18 }
  0xe6   : > { %5892 = vmatmul.msk.bf16.vlgmr.msra.gmra.mxu3 %vm912_vm0, %v6804_v18 }
  0xf5   : > { %5893 = vmatmul.msk.bf16.vlgmr.msrb.gmra.mxu1 %vm912_vm0, %v6804_v18  ;;  %5894 = vmatmul.msk.bf16.vlgmr.msrb.gmra.mxu2 %vm912_vm0, %v6804_v18 }
  0xf6   : > { %5895 = vmatmul.msk.bf16.vlgmr.msrb.gmra.mxu3 %vm912_vm0, %v6804_v18 }
 0x142   : > { %v1013_v5 = vpop.f32.mrf.mxu1 }
 0x143   : > { %v1292_v20 = vpack.c.bf16 %v1013_v5, %v1013_v5 }
 0x148   : > { %v1063_v6 = vpop.f32.mrf.mxu2 }
 0x149   : > { %v1088_v7 = vpop.f32.mrf.mxu3  ;;  %v1294_v35 = vpack.c.bf16 %v1063_v6, %v1063_v6 }
 0x14a   : > { %v1015_v8 = vpop.f32.mrf.mxu1  ;;  %v1295_v22 = vpack.c.bf16 %v1088_v7, %v1088_v7  ;;  %v6903_v7 = vadd.f32 %v6272_v52, %v848_v4 }
 0x150   : > { %v1065_v9 = vpop.f32.mrf.mxu2 }
 0x151   : > { %v1090_v10 = vpop.f32.mrf.mxu3 }
 0x152   : > { %v1038_v11 = vpop.f32.mrf.mxu1 }
 0x153   : > { %v1293_v31 = vpack.c.bf16 %v1038_v11, %v1038_v11 }
 0x158   : > { %v1113_v12 = vpop.f32.mrf.mxu2 }
 0x159   : > { %v1296_v13 = vpack.c.bf16 %v1113_v12, %v1113_v12  ;;  %v1188_v14 = vpop.f32.mrf.mxu3 }
 0x15a   : > { %v1299_v15 = vpack.c.bf16 %v1188_v14, %v1188_v14  ;;  %v1040_v16 = vpop.f32.mrf.mxu1 }
 0x15b   : > { %v1305_v17 = vsel %vm1300_vm5, %v1296_v13, 0 }
 0x15c   : > { %v1362_v19 = vsel %vm1300_vm5, %v1299_v15, 0  ;;  %1314 = vmatpush.bf16.xpose.msra.mxu0 %v1305_v17 }
 0x15d   : > { %1371 = vmatpush.bf16.xpose.msra.mxu3 %v1362_v19 }
 0x160   : > { %v1115_v18 = vpop.f32.mrf.mxu2 }
 0x161   : > { %v1190_v21 = vpop.f32.mrf.mxu3 }
 0x162   : > { %v1138_v23 = vpop.f32.mrf.mxu1 }
 0x163   : > { %v1297_v24 = vpack.c.bf16 %v1138_v23, %v1138_v23  ;;  %5896 = vmatmul.msk.bf16.vlgmr.msra.gmra.mxu0 %vm1300_vm5, %v1292_v20 }
 0x164   : > { %5899 = vmatmul.msk.bf16.vlgmr.msra.gmra.mxu3 %vm1300_vm5, %v1295_v22 }
 0x165   : > { %v1324_v25 = vsel %vm1300_vm5, %v1297_v24, 0 }
 0x166   : > { %1333 = vmatpush.bf16.xpose.msra.mxu1 %v1324_v25 }
 0x168   : > { %v1163_v26 = vpop.f32.mrf.mxu2 }
 0x169   : > { %v1298_v27 = vpack.c.bf16 %v1163_v26, %v1163_v26  ;;  %v1213_v28 = vpop.f32.mrf.mxu3 }
 0x16a   : > { %v1425_v29 = vpack.c.bf16 %v1213_v28, %v1213_v28  ;;  %v1140_v30 = vpop.f32.mrf.mxu1 }
 0x16b   : > { %v1343_v32 = vsel %vm1300_vm5, %v1298_v27, 0 }
 0x16c   : > { %1352 = vmatpush.bf16.xpose.msra.mxu2 %v1343_v32  ;;  %v1434_v33 = vsel %vm1432_vm6, %v1425_v29, 0 }
 0x16d   : > { %1443 = vmatpush.bf16.msrb.mxu0 %v1434_v33  ;;  %5897 = vmatmul.msk.bf16.vlgmr.msra.gmra.mxu1 %vm1300_vm5, %v1293_v31 }
 0x170   : > { %v1165_v34 = vpop.f32.mrf.mxu2 }
 0x171   : > { %v1215_v36 = vpop.f32.mrf.mxu3  ;;  %1527 = vmatpush.bf16.msra.mxu0 %v1518_v55 }
 0x172   : > { %v1238_v37 = vpop.f32.mrf.mxu1 }
 0x173   : > { %v1426_v38 = vpack.c.bf16 %v1238_v37, %v1238_v37  ;;  %5898 = vmatmul.msk.bf16.vlgmr.msra.gmra.mxu2 %vm1300_vm5, %v1294_v35 }
 0x175   : > { %v1453_v39 = vsel %vm1432_vm6, %v1426_v38, 0 }
 0x176   : > { %1462 = vmatpush.bf16.msrb.mxu1 %v1453_v39 }
 0x178   : > { %v1263_v40 = vpop.f32.mrf.mxu2 }
 0x179   : > { %v1427_v41 = vpack.c.bf16 %v1263_v40, %v1263_v40  ;;  %v1288_v42 = vpop.f32.mrf.mxu3 }
 0x17a   : > { %v1428_v43 = vpack.c.bf16 %v1288_v42, %v1288_v42  ;;  %v1240_v44 = vpop.f32.mrf.mxu1 }
 0x17b   : > { %v1472_v45 = vsel %vm1432_vm6, %v1427_v41, 0 }
 0x17c   : > { %v1491_v46 = vsel %vm1432_vm6, %v1428_v43, 0  ;;  %1481 = vmatpush.bf16.msrb.mxu2 %v1472_v45 }
 0x17d   : > { %1500 = vmatpush.bf16.msrb.mxu3 %v1491_v46 }
 0x180   : > { %v1265_v47 = vpop.f32.mrf.mxu2 }
 0x181   : > { %v1290_v48 = vpop.f32.mrf.mxu3 }
 0x182   : > { %v910_v48 = vld [vmem:[%s8547_s2 + $0x18] sm:$0xff] }
 0x1e0   : > { %v1316_v49 = vpop.f32.mrf.mxu0 }
 0x1e1   : > { %v1317_v2 = vadd.f32 %v1316_v49, %v6893_v60  ;;  %v1513_v49 = vpack.c.bf16 %v910_v48, %v910_v48 }
 0x1e3   : > { %v1377_v5 = vsel %vm1300_vm5, %v1317_v2, -inf  ;;  %v1575_v52 = vsel %vm1432_vm6, %v1513_v49, 0 }
 0x1e4   : > { %1584 = vmatpush.bf16.msra.mxu3 %v1575_v52 }
 0x1e7   : > { %v1373_v56 = vpop.f32.mrf.mxu3 }
 0x1e8   : > { %v1374_v58 = vadd.f32 %v1373_v56, %v6882_v53  ;;  %v1318_v59 = vpop.f32.mrf.mxu0  ;;  %v909_v56 = vld [vmem:[%s8547_s2 + $0x10] sm:$0xff] }
 0x1ea   : > { %v1386_v61 = vsel %vm1300_vm5, %v1374_v58, -inf  ;;  %v1335_v62 = vpop.f32.mrf.mxu1 }
 0x1eb   : > { %1387 = vmax.xlane.f32.xlu1 %v1386_v61  ;;  %v1336_v63 = vadd.f32 %v1335_v62, %v6890_v57  ;;  %v908_v61 = vld [vmem:[%s8547_s2 + $0x8] sm:$0xff] }
 0x1ec   : > { %v1511_v62 = vpack.c.bf16 %v908_v61, %v908_v61 }
 0x1ed   : > { %v1380_v1 = vsel %vm1300_vm5, %v1336_v63, -inf }
 0x1ee   : > { %1381 = vmax.xlane.f32.xlu2 %v1380_v1 }
 0x1ef   : > { %v1375_v3 = vpop.f32.mrf.mxu3 }
 0x1f2   : > { %v1337_v6 = vpop.f32.mrf.mxu1 }
 0x1f3   : > { %1378 = vmax.xlane.f32.xlu1 %v1377_v5 }
 0x1f6   : > { %v1354_v8 = vpop.f32.mrf.mxu2 }
 0x1f7   : > { %v1355_v9 = vadd.f32 %v1354_v8, %v6903_v7 }
 0x1f9   : > { %v1383_v10 = vsel %vm1300_vm5, %v1355_v9, -inf }
 0x1fa   : > { %1384 = vmax.xlane.f32.xlu0 %v1383_v10 }
 0x1fe   : > { %v1356_v11 = vpop.f32.mrf.mxu2 }
 0x25e   : > { %v1388_v12 = vpop.xlane.xlu1 %1387 }
 0x25f   : > { %v1392_v13 = vsub.f32 %v1374_v58, %v1388_v12  ;;  %v1512_v58 = vpack.c.bf16 %v909_v56, %v909_v56 }
 0x261   : > { %v1399_v14 = vmul.f32 1.442695, %v1392_v13  ;;  %v1382_v20 = vpop.xlane.xlu2 %1381  ;;  %v1556_v59 = vsel %vm1432_vm6, %v1512_v58, 0  ;;  %v6274_v58 = vld [vmem:[%s8549_s28] ss:$0 sm:$0xff]  ;;  %s8565_s28 = sld [smem:[#allocation9_spill]] }
 0x262   : > { %v1390_v23 = vsub.f32 %v1336_v63, %v1382_v20  ;;  %1565 = vmatpush.bf16.msra.mxu2 %v1556_v59  ;;  %v1537_v63 = vsel %vm1432_vm6, %v1511_v62, 0 }
 0x263   : > { %6289 = vpow2.f32 %v1399_v14  ;;  %1546 = vmatpush.bf16.msra.mxu1 %v1537_v63 }
 0x264   : > { %v1395_v27 = vmul.f32 1.442695, %v1390_v23 }
 0x266   : > { %v1379_v15 = vpop.xlane.xlu1 %1378 }
 0x267   : > { %v1389_v16 = vsub.f32 %v1317_v2, %v1379_v15  ;;  %s6224_s23 = sshll.u32 %s8565_s28, 3 }
 0x269   : > { %v6290_v17 = vpop.eup %6289  ;;  %v1393_v19 = vmul.f32 1.442695, %v1389_v16 }
 0x26a   : > { %v1410_v18 = vsel %vm1300_vm5, %v6290_v17, 0.0 }
 0x26b   : > { %6291 = vpow2.f32 %v1393_v19  ;;  %1411 = vadd.xlane.f32.xlu0 %v1410_v18 }
 0x26d   : > { %v1385_v21 = vpop.xlane.xlu0 %1384 }
 0x26e   : > { %v1391_v22 = vsub.f32 %v1355_v9, %v1385_v21 }
 0x270   : > { %v1397_v24 = vmul.f32 1.442695, %v1391_v22 }
 0x271   : > { %v6292_v25 = vpop.eup %6291 }
 0x272   : > { %6293 = vpow2.f32 %v1397_v24  ;;  %v1401_v26 = vsel %vm1300_vm5, %v6292_v25, 0.0 }
 0x273   : > { %1402 = vadd.xlane.f32.xlu1 %v1401_v26  ;;  %6295 = vpow2.f32 %v1395_v27 }
 0x278   : > { %v6294_v28 = vpop.eup %6293 }
 0x279   : > { %v1407_v29 = vsel %vm1300_vm5, %v6294_v28, 0.0  ;;  %v6296_v30 = vpop.eup %6295 }
 0x27a   : > { %1408 = vadd.xlane.f32.xlu2 %v1407_v29  ;;  %v1404_v31 = vsel %vm1300_vm5, %v6296_v30, 0.0 }
 0x282   : > { %1405 = vadd.xlane.f32.xlu2 %v1404_v31 }
 0x2de   : > { %v1412_v32 = vpop.xlane.xlu0 %1411 }
 0x2df   : > { %6297 = vrcp.f32 %v1412_v32  ;;  %v1601_v32 = vld [vmem:[%s8548_s25 + $0x10] sm:$0xff] }
 0x2e5   : > { %v6298_v33 = vpop.eup %6297 }
 0x2e6   : > { %v1420_v34 = vmul.f32 %v6298_v33, %v6290_v17  ;;  %v1403_v35 = vpop.xlane.xlu1 %1402  ;;  %v1602_v33 = vld [vmem:[%s8548_s25 + $0x18] sm:$0xff] }
 0x2e7   : > { %6299 = vrcp.f32 %v1403_v35  ;;  %v1599_v35 = vld [vmem:[%s8548_s25] sm:$0xff] }
 0x2e8   : > { %v1424_v36 = vpack.c.bf16 %v1420_v34, %v1420_v34  ;;  %v1634_v34 = vpack.c.bf16 %v1602_v33, %v1601_v32 }
 0x2ea   : > { %5903 = vmatmul.msk.bf16.vlgmr.msrb.gmra.mxu3 %vm1300_vm5, %v1424_v36 }
 0x2ed   : > { %v6300_v37 = vpop.eup %6299  ;;  %v1409_v38 = vpop.xlane.xlu2 %1408 }
 0x2ee   : > { %v1417_v39 = vmul.f32 %v6300_v37, %v6292_v25  ;;  %6301 = vrcp.f32 %v1409_v38  ;;  %v1609_v37 = vld [vmem:[%s8472_s11 + $0x30] sm:$0xff]  ;;  %v1610_v38 = vld [vmem:[%s8472_s11 + $0x38] sm:$0xff] }
 0x2f0   : > { %v1421_v40 = vpack.c.bf16 %v1417_v39, %v1417_v39  ;;  %v1607_v39 = vld [vmem:[%s8472_s11 + $0x20] sm:$0xff] }
 0x2f2   : > { %5900 = vmatmul.msk.bf16.vlgmr.msrb.gmra.mxu0 %vm1300_vm5, %v1421_v40  ;;  %v1656_v40 = vpack.c.bf16 %v1610_v38, %v1609_v37  ;;  %v5915_v37 = vld [vmem:[%s8543_s0 + $0x1a0] sm:$0xff] }
 0x2f3   : > { %1644 = vmatpush.bf16.msrb.mxu0 %v1634_v34 }
 0x2f4   : > { %v6302_v41 = vpop.eup %6301 }
 0x2f5   : > { %v1419_v42 = vmul.f32 %v6302_v41, %v6294_v28  ;;  %v1406_v43 = vpop.xlane.xlu2 %1405  ;;  %v1608_v41 = vld [vmem:[%s8472_s11 + $0x28] sm:$0xff] }
 0x2f6   : > { %6303 = vrcp.f32 %v1406_v43  ;;  %v1655_v43 = vpack.c.bf16 %v1608_v41, %v1607_v39 }
 0x2f7   : > { %v1423_v44 = vpack.c.bf16 %v1419_v42, %v1419_v42 }
 0x2f9   : > { %5902 = vmatmul.msk.bf16.vlgmr.msrb.gmra.mxu2 %vm1300_vm5, %v1423_v44 }
 0x2fc   : > { %v6304_v45 = vpop.eup %6303 }
 0x2fd   : > { %v1418_v46 = vmul.f32 %v6304_v45, %v6296_v30  ;;  %v1605_v45 = vld [vmem:[%s8472_s11 + $0x10] sm:$0xff] }
 0x2ff   : > { %v1422_v47 = vpack.c.bf16 %v1418_v46, %v1418_v46  ;;  %v1606_v46 = vld [vmem:[%s8472_s11 + $0x18] sm:$0xff] }
 0x300   : > { %v1654_v48 = vpack.c.bf16 %v1606_v46, %v1605_v45 }
 0x301   : > { %5901 = vmatmul.msk.bf16.vlgmr.msrb.gmra.mxu1 %vm1300_vm5, %v1422_v47 }
 0x302   : > { %1665 = vmatpush.bf16.msrb.mxu1 %v1656_v40 }
 0x306   : > { %1666 = vmatpush.bf16.msrb.mxu1 %v1655_v43  ;;  %v5919_v43 = vld [vmem:[%s8543_s0 + $0x1c0] sm:$0xff] }
 0x30a   : > { %1667 = vmatpush.bf16.msrb.mxu1 %v1654_v48  ;;  %v1757_v48 = vpack.c.bf16 %v5915_v37, %v5915_v37 }
 0x36d   : > { %v1502_v1 = vpop.f32.mrf.mxu3 }
 0x36e   : > { %v1509_v2 = vpack.c.bf16 %v1502_v1, %v1502_v1  ;;  %v1603_v1 = vld [vmem:[%s8472_s11] sm:$0xff] }
 0x36f   : > { %v1445_v3 = vpop.f32.mrf.mxu0 }
 0x370   : > { %v1506_v4 = vpack.c.bf16 %v1445_v3, %v1445_v3  ;;  %5907 = vmatmul.msk.bf16.vlgmr.msra.gmra.mxu3 %vm1300_vm5, %v1509_v2  ;;  %v1604_v2 = vld [vmem:[%s8472_s11 + $0x8] sm:$0xff] }
 0x371   : > { %v1653_v3 = vpack.c.bf16 %v1604_v2, %v1603_v1 }
 0x372   : > { %5904 = vmatmul.msk.bf16.vlgmr.msra.gmra.mxu0 %vm1300_vm5, %v1506_v4 }
 0x373   : > { %1668 = vmatpush.bf16.msrb.mxu1 %v1653_v3 }
 0x375   : > { %v1504_v5 = vpop.f32.mrf.mxu3 }
 0x377   : > { %v1447_v6 = vpop.f32.mrf.mxu0 }
 0x37c   : > { %v1483_v8 = vpop.f32.mrf.mxu2 }
 0x37d   : > { %v1508_v9 = vpack.c.bf16 %v1483_v8, %v1483_v8 }
 0x37e   : > { %v1464_v10 = vpop.f32.mrf.mxu1 }
 0x37f   : > { %v1507_v11 = vpack.c.bf16 %v1464_v10, %v1464_v10  ;;  %5906 = vmatmul.msk.bf16.vlgmr.msra.gmra.mxu2 %vm1300_vm5, %v1508_v9 }
 0x381   : > { %5905 = vmatmul.msk.bf16.vlgmr.msra.gmra.mxu1 %vm1300_vm5, %v1507_v11 }
 0x384   : > { %v1485_v12 = vpop.f32.mrf.mxu2 }
 0x386   : > { %v1466_v13 = vpop.f32.mrf.mxu1 }
 0x3ef   : > { %v1529_v14 = vpop.f32.mrf.mxu0 }
 0x3f0   : > { %v1590_v20 = vsel %vm912_vm0, %v1529_v14, 0.0  ;;  %v5913_v14 = vld [vmem:[%s8543_s0 + $0x190] sm:$0xff] }
 0x3f3   : > { %v1586_v15 = vpop.f32.mrf.mxu3 }
 0x3f4   : > { %v1595_v25 = vsel %vm912_vm0, %v1586_v15, 0.0  ;;  %v5914_v15 = vld [vmem:[%s8543_s0 + $0x198] sm:$0xff] }
 0x3f7   : > { %v1531_v16 = vpop.f32.mrf.mxu0 }
 0x3f8   : > { %v5917_v16 = vld [vmem:[%s8543_s0 + $0x1b0] sm:$0xff] }
 0x3fb   : > { %v1588_v17 = vpop.f32.mrf.mxu3 }
 0x3fc   : > { %v1755_v17 = vpack.c.bf16 %v5913_v14, %v5913_v14  ;;  %v5933_v14 = vld [vmem:[%s8543_s0 + $0x230] sm:$0xff] }
 0x3fe   : > { %v1548_v19 = vpop.f32.mrf.mxu1 }
 0x3ff   : > { %v1591_v18 = vsel %vm912_vm0, %v1548_v19, 0.0  ;;  %v1756_v19 = vpack.c.bf16 %v5914_v15, %v5914_v15 }
 0x400   : > { %v1592_v21 = vadd.f32 %v1591_v18, %v1590_v20  ;;  %v5918_v18 = vld [vmem:[%s8543_s0 + $0x1b8] sm:$0xff]  ;;  %v1759_v20 = vpack.c.bf16 %v5917_v16, %v5917_v16 }
 0x402   : > { %v1567_v22 = vpop.f32.mrf.mxu2 }
 0x403   : > { %v1593_v23 = vsel %vm912_vm0, %v1567_v22, 0.0  ;;  %v5922_v22 = vld [vmem:[%s8543_s0 + $0x1d8] sm:$0xff] }
 0x404   : > { %v1594_v24 = vadd.f32 %v1593_v23, %v1592_v21  ;;  %v5921_v21 = vld [vmem:[%s8543_s0 + $0x1d0] sm:$0xff]  ;;  %v1760_v23 = vpack.c.bf16 %v5918_v18, %v5918_v18 }
 0x405   : > { %v5937_v18 = vld [vmem:[%s8543_s0 + $0x250] sm:$0xff] }
 0x406   : > { %v1596_v26 = vadd.f32 %v1595_v25, %v1594_v24  ;;  %v1550_v27 = vpop.f32.mrf.mxu1  ;;  %v1763_v24 = vpack.c.bf16 %v5921_v21, %v5921_v21  ;;  %v1764_v25 = vpack.c.bf16 %v5922_v22, %v5922_v22  ;;  %v1836_v32 = vunpack.c.l.b16 %v1760_v23 }
 0x407   : > { %v5926_v27 = vld [vmem:[%s8543_s0 + $0x1f8] sm:$0xff]  ;;  %v1779_v23 = vpack.c.bf16 %v5937_v18, %v5937_v18 }
 0x408   : > { %v1597_v28 = vadd.f32 %v1596_v26, %v6684_v0  ;;  %v1600_v0 = vld [vmem:[%s8548_s25 + $0x8] sm:$0xff]  ;;  %v5925_v26 = vld [vmem:[%s8543_s0 + $0x1f0] sm:$0xff]  ;;  %v1860_v33 = vunpack.c.l.b16 %v1763_v24  ;;  %v1861_v34 = vunpack.c.l.b16 %v1764_v25  ;;  %v5950_v18 = vld [vmem:[%s8543_s0 + $0x2b8] sm:$0xff] }
 0x409   : > { %v1633_v36 = vpack.c.bf16 %v1600_v0, %v1599_v35  ;;  %v1768_v35 = vpack.c.bf16 %v5926_v27, %v5926_v27  ;;  %v5911_v0 = vld [vmem:[%s8543_s0 + $0x180] sm:$0xff]  ;;  %v5941_v25 = vld [vmem:[%s8543_s0 + $0x270] sm:$0xff] }
 0x40a   : > { %v1569_v29 = vpop.f32.mrf.mxu2  ;;  %v1611_v30 = vmul.f32 %v1597_v28, %v1597_v28  ;;  %v1753_v40 = vpack.c.bf16 %v5911_v0, %v5911_v0  ;;  %v1863_v46 = vpack.c.b16 %v1861_v34, %v1860_v33  ;;  %v5927_v27 = vld [vmem:[%s8543_s0 + $0x200] sm:$0xff]  ;;  %v1960_v34 = vunpack.c.l.b16 %v1779_v23 }
 0x40b   : > { %1645 = vmatpush.bf16.msrb.mxu0 %v1633_v36  ;;  %v1808_v29 = vunpack.c.l.b16 %v1756_v19  ;;  %v5912_v36 = vld [vmem:[%s8543_s0 + $0x188] sm:$0xff]  ;;  %v1775_v19 = vpack.c.bf16 %v5933_v14, %v5933_v14  ;;  %v1783_v0 = vpack.c.bf16 %v5941_v25, %v5941_v25  ;;  %v5957_v25 = vld [vmem:[%s8543_s0 + $0x2f0] sm:$0xff] }
 0x40c   : > { %v1612_v31 = vsel %vm912_vm0, %v1611_v30, 0.0  ;;  %v1835_v30 = vunpack.c.l.b16 %v1759_v20  ;;  %v1754_v41 = vpack.c.bf16 %v5912_v36, %v5912_v36  ;;  %v5938_v20 = vld [vmem:[%s8543_s0 + $0x258] sm:$0xff] }
 0x40d   : > { %1613 = vadd.xlane.f32.xlu0 %v1612_v31  ;;  %v1767_v31 = vpack.c.bf16 %v5925_v26, %v5925_v26  ;;  %v1780_v24 = vpack.c.bf16 %v5938_v20, %v5938_v20  ;;  %v5942_v26 = vld [vmem:[%s8543_s0 + $0x278] sm:$0xff]  ;;  %v5953_v20 = vld [vmem:[%s8543_s0 + $0x2d0] sm:$0xff] }
 0x40e   : > { %v1838_v45 = vpack.c.b16 %v1836_v32, %v1835_v30  ;;  %v5928_v32 = vld [vmem:[%s8543_s0 + $0x208] sm:$0xff] }
 0x40f   : > { %v1885_v39 = vunpack.c.l.b16 %v1767_v31  ;;  %1872 = vmatpush.bf16.msra.mxu0 %v1863_v46  ;;  %v1935_v31 = vunpack.c.l.b16 %v1775_v19  ;;  %v1770_v46 = vpack.c.bf16 %v5928_v32, %v5928_v32  ;;  %v5949_v19 = vld [vmem:[%s8543_s0 + $0x2b0] sm:$0xff]  ;;  %v1799_v32 = vpack.c.bf16 %v5957_v25, %v5957_v25 }
 0x410   : > { %1847 = vmatpush.bf16.msrb.mxu3 %v1838_v45  ;;  %v1985_v45 = vunpack.c.l.b16 %v1783_v0  ;;  %v5944_v0 = vld [vmem:[%s8543_s0 + $0x288] sm:$0xff] }
 0x480   : > { %v1614_v42 = vpop.xlane.xlu0 %1613 }
 0x481   : > { %v1615_v44 = vmul.f32 %v1614_v42, %v6725_v51  ;;  %v5916_v42 = vld [vmem:[%s8543_s0 + $0x1a8] sm:$0xff] }
 0x483   : > { %v1616_v47 = vadd.f32 1e-06, %v1615_v44  ;;  %v5920_v44 = vld [vmem:[%s8543_s0 + $0x1c8] sm:$0xff] }
 0x485   : > { %6305 = vrsqrt.f32 %v1616_v47  ;;  %vm1623_vm8 = vweird.f32 %v1616_v47 }
 0x48b   : > { %v6306_v49 = vpop.eup %6305 }
 0x48c   : > { %v1618_v50 = vmul.f32 %v6306_v49, %v1616_v47  ;;  %vm1624_vm7 = vweird.f32 %v6306_v49  ;;  %v1886_v47 = vunpack.c.l.b16 %v1768_v35  ;;  %v1961_v35 = vunpack.c.l.b16 %v1780_v24 }
 0x48d   : > { %vm1625_vm9 = vmor %vm1623_vm8, %vm1624_vm7 }
 0x48e   : > { %v1619_v52 = vmul.f32 %v6306_v49, %v1618_v50  ;;  %v5924_v50 = vld [vmem:[%s8543_s0 + $0x1e8] sm:$0xff] }
 0x48f   : > { %v1766_v3 = vpack.c.bf16 %v5924_v50, %v5924_v50 }
 0x490   : > { %v1620_v54 = vmul.f32 0.5, %v1619_v52  ;;  %v1805_v52 = vunpack.c.l.b16 %v1753_v40  ;;  %v5931_v40 = vld [vmem:[%s8543_s0 + $0x220] sm:$0xff] }
 0x492   : > { %v1621_v55 = vsub.f32 1.5, %v1620_v54  ;;  %v1806_v54 = vunpack.c.l.b16 %v1754_v41  ;;  %v5932_v41 = vld [vmem:[%s8543_s0 + $0x228] sm:$0xff] }
 0x494   : > { %v1622_v56 = vmul.f32 %v6306_v49, %v1621_v55  ;;  %v1758_v55 = vpack.c.bf16 %v5916_v42, %v5916_v42  ;;  %v5935_v42 = vld [vmem:[%s8543_s0 + $0x240] sm:$0xff] }
 0x496   : > { %v1626_v59 = vsel %vm1625_vm9, %v6306_v49, %v1622_v56  ;;  %v5923_v49 = vld [vmem:[%s8543_s0 + $0x1e0] sm:$0xff]  ;;  %v1761_v56 = vpack.c.bf16 %v5919_v43, %v5919_v43  ;;  %v1834_v1 = vunpack.c.l.b16 %v1758_v55  ;;  %v1773_v55 = vpack.c.bf16 %v5931_v40, %v5931_v40 }
 0x497   : > { %v1627_v61 = vmul.f32 %v1626_v59, %v1597_v28  ;;  %v1833_v59 = vunpack.c.l.b16 %v1757_v48  ;;  %v5939_v48 = vld [vmem:[%s8543_s0 + $0x260] sm:$0xff] }
 0x498   : > { %v1858_v2 = vunpack.c.l.b16 %v1761_v56  ;;  %v1774_v56 = vpack.c.bf16 %v5932_v41, %v5932_v41  ;;  %v5948_v41 = vld [vmem:[%s8543_s0 + $0x2a8] sm:$0xff] }
 0x499   : > { %v1631_v62 = vmul.f32 %v6274_v58, %v1627_v61  ;;  %v1888_v58 = vpack.c.b16 %v1886_v47, %v1885_v39  ;;  %v1762_v61 = vpack.c.bf16 %v5920_v44, %v5920_v44  ;;  %v1769_v39 = vpack.c.bf16 %v5927_v27, %v5927_v27  ;;  %v5936_v47 = vld [vmem:[%s8543_s0 + $0x248] sm:$0xff] }
 0x49a   : > { %v1963_v44 = vpack.c.b16 %v1961_v35, %v1960_v34  ;;  %v1791_v27 = vpack.c.bf16 %v5949_v19, %v5949_v19  ;;  %v5943_v35 = vld [vmem:[%s8543_s0 + $0x280] sm:$0xff] }
 0x49b   : > { %v1632_v63 = vpack.c.bf16 %v1631_v62, %v1631_v62  ;;  %v1765_v62 = vpack.c.bf16 %v5923_v49, %v5923_v49  ;;  %1897 = vmatpush.bf16.msra.mxu1 %v1888_v58  ;;  %v5940_v49 = vld [vmem:[%s8543_s0 + $0x268] sm:$0xff]  ;;  %v1777_v58 = vpack.c.bf16 %v5935_v42, %v5935_v42 }
 0x49c   : > { %v2035_v42 = vunpack.c.l.b16 %v1791_v27 }
 0x49d   : > { %5908 = vmatmul.msk.bf16.vlgmr.msrb.gmra.mxu0 %vm912_vm0, %v1632_v63  ;;  %v1809_v63 = vpack.c.b16 %v1806_v54, %v1805_v52  ;;  %v1908_v52 = vunpack.c.l.b16 %v1769_v39  ;;  %v1909_v54 = vunpack.c.l.b16 %v1770_v46  ;;  %v5951_v46 = vld [vmem:[%s8543_s0 + $0x2c0] sm:$0xff] }
 0x51a   : > { %v1647_v4 = vpop.f32.mrf.mxu0 }
 0x51b   : > { %v1651_v5 = vmax.f32 %v1647_v4, 0.0  ;;  %v1859_v4 = vunpack.c.l.b16 %v1762_v61  ;;  %v1778_v61 = vpack.c.bf16 %v5936_v47, %v5936_v47  ;;  %v5952_v47 = vld [vmem:[%s8543_s0 + $0x2c8] sm:$0xff] }
 0x51d   : > { %v1652_v6 = vpack.c.bf16 %v1651_v5, %v1651_v5  ;;  %v1883_v5 = vunpack.c.l.b16 %v1765_v62  ;;  %v1781_v62 = vpack.c.bf16 %v5939_v48, %v5939_v48  ;;  %v5955_v48 = vld [vmem:[%s8543_s0 + $0x2e0] sm:$0xff] }
 0x51f   : > { %5909 = vmatmul.msk.bf16.vlgmr.msrb.gmra.mxu1 %vm1657_vm10, %v1652_v6  ;;  %v1837_v6 = vpack.c.b16 %v1834_v1, %v1833_v59  ;;  %v1912_v1 = vpack.c.b16 %v1909_v54, %v1908_v52  ;;  %v1785_v52 = vpack.c.bf16 %v5943_v35, %v5943_v35  ;;  %v1786_v54 = vpack.c.bf16 %v5944_v0, %v5944_v0 }
 0x521   : > { %1848 = vmatpush.bf16.msrb.mxu3 %v1837_v6  ;;  %v1983_v6 = vunpack.c.l.b16 %v1781_v62  ;;  %v1793_v62 = vpack.c.bf16 %v5951_v46, %v5951_v46 }
 0x522   : > { %v1649_v8 = vpop.f32.mrf.mxu0 }
 0x523   : > { %v1884_v8 = vunpack.c.l.b16 %v1766_v3  ;;  %v1934_v3 = vunpack.c.l.b16 %v1774_v56 }
 0x59c   : > { %v1670_v9 = vpop.f32.mrf.mxu1 }
 0x59d   : > { %v6983_v10 = vadd.f32 %v1670_v9, %v1597_v28  ;;  %v1807_v28 = vunpack.c.l.b16 %v1755_v17  ;;  %v1862_v9 = vpack.c.b16 %v1859_v4, %v1858_v2  ;;  %v5934_v17 = vld [vmem:[%s8543_s0 + $0x238] sm:$0xff]  ;;  %v1933_v2 = vunpack.c.l.b16 %v1773_v55  ;;  %v5956_v55 = vld [vmem:[%s8543_s0 + $0x2e8] sm:$0xff] }
 0x59e   : > { %v1776_v22 = vpack.c.bf16 %v5934_v17, %v5934_v17  ;;  %v1958_v4 = vunpack.c.l.b16 %v1777_v58  ;;  %v5946_v17 = vld [vmem:[%s8543_s0 + $0x298] sm:$0xff] }
 0x59f   : > { %v1731_v11 = vmul.f32 %v6983_v10, %v6983_v10  ;;  %v1810_v38 = vpack.c.b16 %v1808_v29, %v1807_v28  ;;  %1873 = vmatpush.bf16.msra.mxu0 %v1862_v9  ;;  %v1937_v9 = vpack.c.b16 %v1934_v3, %v1933_v2  ;;  %v1788_v24 = vpack.c.bf16 %v5946_v17, %v5946_v17 }
 0x5a0   : > { %v1936_v33 = vunpack.c.l.b16 %v1776_v22 }
 0x5a1   : > { %v1732_v12 = vsel %vm912_vm0, %v1731_v11, 0.0  ;;  %1822 = vmatpush.bf16.msrb.mxu2 %v1810_v38  ;;  %v1887_v11 = vpack.c.b16 %v1884_v8, %v1883_v5  ;;  %v1784_v38 = vpack.c.bf16 %v5942_v26, %v5942_v26  ;;  %v1959_v5 = vunpack.c.l.b16 %v1778_v61  ;;  %v5958_v26 = vld [vmem:[%s8543_s0 + $0x2f8] sm:$0xff] }
 0x5a2   : > { %1733 = vadd.xlane.f32.xlu1 %v1732_v12  ;;  %v5929_v12 = vld [vmem:[%s8543_s0 + $0x210] sm:$0xff]  ;;  %v1938_v43 = vpack.c.b16 %v1936_v33, %v1935_v31  ;;  %v6275_v33 = vld [vmem:[%s8544_s1 + $0x1] ss:$0 sm:$0xff]  ;;  %v1800_v34 = vpack.c.bf16 %v5958_v26, %v5958_v26  ;;  %v2011_v40 = vunpack.c.l.b16 %v1788_v24  ;;  %v1790_v61 = vpack.c.bf16 %v5948_v41, %v5948_v41  ;;  %s5744_s1 = scalar_lea.sflag [#allocation3], %s818_s27 }
 0x5a3   : > { %1898 = vmatpush.bf16.msra.mxu1 %v1887_v11  ;;  %v1771_v15 = vpack.c.bf16 %v5929_v12, %v5929_v12  ;;  %v1986_v50 = vunpack.c.l.b16 %v1784_v38  ;;  %1972 = vmatpush.bf16.msrb.mxu0 %v1963_v44  ;;  %v1962_v12 = vpack.c.b16 %v1959_v5, %v1958_v4  ;;  %v1798_v4 = vpack.c.bf16 %v5956_v55, %v5956_v55 }
 0x5a4   : > { %v1672_v13 = vpop.f32.mrf.mxu1  ;;  %1947 = vmatpush.bf16.msra.mxu3 %v1938_v43  ;;  %v2086_v58 = vunpack.c.l.b16 %v1800_v34 }
 0x5a5   : > { %1823 = vmatpush.bf16.msrb.mxu2 %v1809_v63  ;;  %v5930_v13 = vld [vmem:[%s8543_s0 + $0x218] sm:$0xff]  ;;  %v1910_v29 = vunpack.c.l.b16 %v1771_v15  ;;  %v1988_v59 = vpack.c.b16 %v1986_v50, %v1985_v45  ;;  %v1782_v63 = vpack.c.bf16 %v5940_v49, %v5940_v49  ;;  %v2085_v50 = vunpack.c.l.b16 %v1799_v32 }
 0x5a6   : > { %v1772_v16 = vpack.c.bf16 %v5930_v13, %v5930_v13  ;;  %v2084_v19 = vunpack.c.l.b16 %v1798_v4 }
 0x5a7   : > { %1997 = vmatpush.bf16.msrb.mxu1 %v1988_v59  ;;  %v1984_v8 = vunpack.c.l.b16 %v1782_v63  ;;  %1973 = vmatpush.bf16.msrb.mxu0 %v1962_v12  ;;  %v1794_v63 = vpack.c.bf16 %v5952_v47, %v5952_v47  ;;  %v2088_v12 = vpack.c.b16 %v2086_v58, %v2085_v50 }
 0x5a8   : > { %v1911_v30 = vunpack.c.l.b16 %v1772_v16  ;;  %1948 = vmatpush.bf16.msra.mxu3 %v1937_v9  ;;  %v5945_v16 = vld [vmem:[%s8543_s0 + $0x290] sm:$0xff]  ;;  %v2009_v9 = vunpack.c.l.b16 %v1786_v54 }
 0x5a9   : > { %v1987_v13 = vpack.c.b16 %v1984_v8, %v1983_v6  ;;  %v1787_v23 = vpack.c.bf16 %v5945_v16, %v5945_v16  ;;  %v2008_v8 = vunpack.c.l.b16 %v1785_v52  ;;  %v2059_v16 = vunpack.c.l.b16 %v1794_v63 }
 0x5aa   : > { %v1913_v37 = vpack.c.b16 %v1911_v30, %v1910_v29  ;;  %v1795_v29 = vpack.c.bf16 %v5953_v20, %v5953_v20 }
 0x5ab   : > { %1998 = vmatpush.bf16.msrb.mxu1 %v1987_v13  ;;  %v2010_v39 = vunpack.c.l.b16 %v1787_v23 }
 0x5ac   : > { %1922 = vmatpush.bf16.msra.mxu2 %v1913_v37  ;;  %v2060_v44 = vunpack.c.l.b16 %v1795_v29 }
 0x5ad   : > { %v2013_v3 = vpack.c.b16 %v2011_v40, %v2010_v39 }
 0x5b0   : > { %1923 = vmatpush.bf16.msra.mxu2 %v1912_v1  ;;  %v1797_v1 = vpack.c.bf16 %v5955_v48, %v5955_v48 }
 0x5b2   : > { %v2083_v17 = vunpack.c.l.b16 %v1797_v1 }
 0x615   : > { %v1734_v21 = vpop.xlane.xlu1 %1733 }
 0x616   : > { %v1735_v28 = vmul.f32 %v1734_v21, %v6725_v51  ;;  %v5954_v21 = vld [vmem:[%s8543_s0 + $0x2d8] sm:$0xff] }
 0x617   : > { %v1796_v30 = vpack.c.bf16 %v5954_v21, %v5954_v21 }
 0x618   : > { %v7067_v36 = vadd.f32 1e-06, %v1735_v28  ;;  %v1792_v28 = vpack.c.bf16 %v5950_v18, %v5950_v18  ;;  %v2012_v18 = vpack.c.b16 %v2009_v9, %v2008_v8 }
 0x619   : > { %v2061_v45 = vunpack.c.l.b16 %v1796_v30 }
 0x61a   : > { %6307 = vrsqrt.f32 %v7067_v36  ;;  %vm1743_vm12 = vweird.f32 %v7067_v36  ;;  %v2036_v43 = vunpack.c.l.b16 %v1792_v28 }
 0x61b   : > { %v2063_v6 = vpack.c.b16 %v2061_v45, %v2060_v44 }
 0x61c   : > { %v2038_v5 = vpack.c.b16 %v2036_v43, %v2035_v42 }
 0x620   : > { %v6308_v11 = vpop.eup %6307 }
 0x621   : > { %v1738_v14 = vmul.f32 %v6308_v11, %v7067_v36  ;;  %vm1744_vm11 = vweird.f32 %v6308_v11  ;;  %v5947_v36 = vld [vmem:[%s8543_s0 + $0x2a0] sm:$0xff] }
 0x622   : > { %vm7124_vm13 = vmor %vm1743_vm12, %vm1744_vm11  ;;  %v1789_v59 = vpack.c.bf16 %v5947_v36, %v5947_v36 }
 0x623   : > { %v1739_v15 = vmul.f32 %v6308_v11, %v1738_v14  ;;  %v2034_v14 = vunpack.c.l.b16 %v1790_v61 }
 0x624   : > { %v2033_v13 = vunpack.c.l.b16 %v1789_v59 }
 0x625   : > { %v1740_v22 = vmul.f32 0.5, %v1739_v15  ;;  %v2058_v15 = vunpack.c.l.b16 %v1793_v62 }
 0x626   : > { %v2037_v20 = vpack.c.b16 %v2034_v14, %v2033_v13 }
 0x627   : > { %v1741_v31 = vsub.f32 1.5, %v1740_v22  ;;  %v2062_v21 = vpack.c.b16 %v2059_v16, %v2058_v15  ;;  %v2087_v22 = vpack.c.b16 %v2084_v19, %v2083_v17 }
 0x629   : > { %v1742_v37 = vmul.f32 %v6308_v11, %v1741_v31 }
 0x62b   : > { %v1746_v49 = vsel %vm7124_vm13, %v6308_v11, %v1742_v37 }
 0x62c   : > { %v1747_v56 = vmul.f32 %v1746_v49, %v6983_v10 }
 0x62e   : > { %v1751_v2 = vmul.f32 %v6275_v33, %v1747_v56 }
 0x630   : > { %v1752_v11 = vpack.c.bf16 %v1751_v2, %v1751_v2 }
 0x632   : > { %5963 = vmatmul.msk.bf16.vlgmr.msrb.gmra.mxu2 %vm912_vm0, %v1752_v11  ;;  %5964 = vmatmul.msk.bf16.vlgmr.msrb.gmra.mxu3 %vm912_vm0, %v1752_v11 }
 0x633   : > { %5965 = vmatmul.msk.bf16.vlgmr.msra.gmra.mxu0 %vm912_vm0, %v1752_v11  ;;  %5966 = vmatmul.msk.bf16.vlgmr.msra.gmra.mxu1 %vm912_vm0, %v1752_v11 }
 0x634   : > { %2022 = vmatpush.bf16.msrb.mxu2 %v2013_v3  ;;  %2047 = vmatpush.bf16.msrb.mxu3 %v2038_v5 }
 0x635   : > { %2072 = vmatpush.bf16.msra.mxu0 %v2063_v6  ;;  %2097 = vmatpush.bf16.msra.mxu1 %v2088_v12 }
 0x638   : > { %2023 = vmatpush.bf16.msrb.mxu2 %v2012_v18  ;;  %2048 = vmatpush.bf16.msrb.mxu3 %v2037_v20 }
 0x639   : > { %2073 = vmatpush.bf16.msra.mxu0 %v2062_v21  ;;  %2098 = vmatpush.bf16.msra.mxu1 %v2087_v22 }
 0x642   : > { %5967 = vmatmul.msk.bf16.vlgmr.msra.gmra.mxu2 %vm912_vm0, %v1752_v11  ;;  %5968 = vmatmul.msk.bf16.vlgmr.msra.gmra.mxu3 %vm912_vm0, %v1752_v11 }
 0x643   : > { %5969 = vmatmul.msk.bf16.vlgmr.msrb.gmra.mxu0 %vm912_vm0, %v1752_v11  ;;  %5970 = vmatmul.msk.bf16.vlgmr.msrb.gmra.mxu1 %vm912_vm0, %v1752_v11 }
 0x652   : > { %5971 = vmatmul.msk.bf16.vlgmr.msrb.gmra.mxu2 %vm912_vm0, %v1752_v11  ;;  %5972 = vmatmul.msk.bf16.vlgmr.msrb.gmra.mxu3 %vm912_vm0, %v1752_v11 }
 0x653   : > { %5973 = vmatmul.msk.bf16.vlgmr.msra.gmra.mxu0 %vm912_vm0, %v1752_v11  ;;  %5974 = vmatmul.msk.bf16.vlgmr.msra.gmra.mxu1 %vm912_vm0, %v1752_v11 }
 0x6b0   : > { %v1875_v23 = vpop.f32.mrf.mxu0  ;;  %v1900_v24 = vpop.f32.mrf.mxu1 }
 0x6b1   : > { %v2106_v44 = vpack.c.bf16 %v1875_v23, %v1875_v23  ;;  %v2107_v45 = vpack.c.bf16 %v1900_v24, %v1900_v24 }
 0x6b5   : > { %v1825_v25 = vpop.f32.mrf.mxu2  ;;  %v1850_v26 = vpop.f32.mrf.mxu3 }
 0x6b6   : > { %v2104_v48 = vpack.c.bf16 %v1825_v25, %v1825_v25  ;;  %v2105_v49 = vpack.c.bf16 %v1850_v26, %v1850_v26 }
 0x6b8   : > { %v1877_v27 = vpop.f32.mrf.mxu0  ;;  %v1902_v28 = vpop.f32.mrf.mxu1 }
 0x6bd   : > { %v1827_v29 = vpop.f32.mrf.mxu2  ;;  %v1852_v30 = vpop.f32.mrf.mxu3 }
 0x6c0   : > { %v1975_v31 = vpop.f32.mrf.mxu0  ;;  %v2000_v32 = vpop.f32.mrf.mxu1 }
 0x6c1   : > { %v2110_v33 = vpack.c.bf16 %v1975_v31, %v1975_v31  ;;  %v2111_v34 = vpack.c.bf16 %v2000_v32, %v2000_v32 }
 0x6c3   : > { %v2154_v35 = vsel %vm1300_vm5, %v2110_v33, 0  ;;  %v2173_v0 = vsel %vm1300_vm5, %v2111_v34, 0 }
 0x6c4   : > { %2163 = vmatpush.bf16.xpose.msrb.mxu0 %v2154_v35  ;;  %2182 = vmatpush.bf16.xpose.msrb.mxu1 %v2173_v0 }
 0x6c5   : > { %v1925_v37 = vpop.f32.mrf.mxu2  ;;  %v1950_v38 = vpop.f32.mrf.mxu3 }
 0x6c6   : > { %v2108_v39 = vpack.c.bf16 %v1925_v37, %v1925_v37  ;;  %v2109_v40 = vpack.c.bf16 %v1950_v38, %v1950_v38 }
 0x6c8   : > { %v2116_v36 = vsel %vm1300_vm5, %v2108_v39, 0  ;;  %v2135_v41 = vsel %vm1300_vm5, %v2109_v40, 0  ;;  %v1977_v42 = vpop.f32.mrf.mxu0  ;;  %v2002_v43 = vpop.f32.mrf.mxu1 }
 0x6c9   : > { %2125 = vmatpush.bf16.xpose.msra.mxu2 %v2116_v36  ;;  %2144 = vmatpush.bf16.xpose.msra.mxu3 %v2135_v41 }
 0x6cb   : > { %5977 = vmatmul.msk.bf16.vlgmr.msrb.gmra.mxu0 %vm1300_vm5, %v2106_v44  ;;  %5978 = vmatmul.msk.bf16.vlgmr.msrb.gmra.mxu1 %vm1300_vm5, %v2107_v45 }
 0x6cd   : > { %v1927_v46 = vpop.f32.mrf.mxu2  ;;  %v1952_v47 = vpop.f32.mrf.mxu3 }
 0x6d0   : > { %v2075_v50 = vpop.f32.mrf.mxu0  ;;  %v2100_v52 = vpop.f32.mrf.mxu1  ;;  %5975 = vmatmul.msk.bf16.vlgmr.msra.gmra.mxu2 %vm1300_vm5, %v2104_v48  ;;  %5976 = vmatmul.msk.bf16.vlgmr.msra.gmra.mxu3 %vm1300_vm5, %v2105_v49 }
 0x6d1   : > { %v2238_v54 = vpack.c.bf16 %v2075_v50, %v2075_v50  ;;  %v2239_v55 = vpack.c.bf16 %v2100_v52, %v2100_v52 }
 0x6d3   : > { %v2282_v56 = vsel %vm1432_vm6, %v2238_v54, 0  ;;  %v2301_v58 = vsel %vm1432_vm6, %v2239_v55, 0 }
 0x6d4   : > { %2291 = vmatpush.bf16.msra.mxu0 %v2282_v56  ;;  %2310 = vmatpush.bf16.msra.mxu1 %v2301_v58 }
 0x6d5   : > { %v2025_v59 = vpop.f32.mrf.mxu2  ;;  %v2050_v61 = vpop.f32.mrf.mxu3 }
 0x6d6   : > { %v2236_v62 = vpack.c.bf16 %v2025_v59, %v2025_v59  ;;  %v2237_v63 = vpack.c.bf16 %v2050_v61, %v2050_v61  ;;  %v5961_v59 = vld [vmem:[%s8547_s2 + $0x30] sm:$0xff] }
 0x6d7   : > { %v2322_v61 = vpack.c.bf16 %v5961_v59, %v5961_v59 }
 0x6d8   : > { %v2244_v1 = vsel %vm1432_vm6, %v2236_v62, 0  ;;  %v2263_v2 = vsel %vm1432_vm6, %v2237_v63, 0  ;;  %v2077_v3 = vpop.f32.mrf.mxu0  ;;  %v2102_v4 = vpop.f32.mrf.mxu1  ;;  %v5959_v63 = vld [vmem:[%s8547_s2 + $0x20] sm:$0xff] }
 0x6d9   : > { %2253 = vmatpush.bf16.msrb.mxu2 %v2244_v1  ;;  %2272 = vmatpush.bf16.msrb.mxu3 %v2263_v2  ;;  %v2366_v62 = vsel %vm1432_vm6, %v2322_v61, 0  ;;  %v5960_v1 = vld [vmem:[%s8547_s2 + $0x28] sm:$0xff]  ;;  %v2320_v2 = vpack.c.bf16 %v5959_v63, %v5959_v63 }
 0x6da   : > { %2375 = vmatpush.bf16.msrb.mxu0 %v2366_v62  ;;  %v2321_v3 = vpack.c.bf16 %v5960_v1, %v5960_v1 }
 0x6db   : > { %v2328_v4 = vsel %vm1432_vm6, %v2320_v2, 0 }
 0x6dd   : > { %v2027_v5 = vpop.f32.mrf.mxu2  ;;  %v2052_v6 = vpop.f32.mrf.mxu3  ;;  %2337 = vmatpush.bf16.msra.mxu2 %v2328_v4 }
 0x6de   : > { %v2347_v5 = vsel %vm1432_vm6, %v2321_v3, 0  ;;  %v5962_v6 = vld [vmem:[%s8547_s2 + $0x38] sm:$0xff] }
 0x6df   : > { %2356 = vmatpush.bf16.msra.mxu3 %v2347_v5 }
 0x748   : > { %v2165_v8 = vpop.f32.mrf.mxu0  ;;  %v2184_v9 = vpop.f32.mrf.mxu1 }
 0x749   : > { %v2166_v11 = vadd.f32 %v2165_v8, %v6903_v7  ;;  %v2185_v21 = vadd.f32 %v2184_v9, %v6882_v53  ;;  %v2323_v8 = vpack.c.bf16 %v5962_v6, %v5962_v6 }
 0x74b   : > { %v2194_v12 = vsel %vm1300_vm5, %v2166_v11, -inf  ;;  %v2197_v23 = vsel %vm1300_vm5, %v2185_v21, -inf  ;;  %v2385_v9 = vsel %vm1432_vm6, %v2323_v8, 0  ;;  %v6276_v8 = vld [vmem:[%s8474_s13] ss:$0 sm:$0xff] }
 0x74c   : > { %2195 = vmax.xlane.f32.xlu1 %v2194_v12  ;;  %2394 = vmatpush.bf16.msrb.mxu1 %v2385_v9 }
 0x750   : > { %v2167_v13 = vpop.f32.mrf.mxu0  ;;  %v2186_v14 = vpop.f32.mrf.mxu1 }
 0x753   : > { %v2127_v15 = vpop.f32.mrf.mxu2  ;;  %v2146_v16 = vpop.f32.mrf.mxu3 }
 0x754   : > { %v2128_v17 = vadd.f32 %v2127_v15, %v6893_v60  ;;  %v2147_v19 = vadd.f32 %v2146_v16, %v6890_v57 }
 0x756   : > { %v2191_v18 = vsel %vm1300_vm5, %v2147_v19, -inf  ;;  %v2188_v20 = vsel %vm1300_vm5, %v2128_v17, -inf }
 0x757   : > { %2192 = vmax.xlane.f32.xlu0 %v2191_v18  ;;  %2189 = vmax.xlane.f32.xlu2 %v2188_v20 }
 0x75b   : > { %v2129_v7 = vpop.f32.mrf.mxu2  ;;  %v2148_v22 = vpop.f32.mrf.mxu3 }
 0x75f   : > { %2198 = vmax.xlane.f32.xlu2 %v2197_v23 }
 0x7bf   : > { %v2196_v24 = vpop.xlane.xlu1 %2195 }
 0x7c0   : > { %v2202_v25 = vsub.f32 %v2166_v11, %v2196_v24  ;;  %v7209_v11 = vld [vmem:[%s833_s5] sm:$0xff]  ;;  %s8561_s5 = sld [smem:[#allocation27_spill]] }
 0x7c1   : > { %v2568_v12 = vmul.f32 %v7209_v11, %v7209_v11 }
 0x7c2   : > { %v2208_v26 = vmul.f32 1.442695, %v2202_v25 }
 0x7c3   : > { %v2569_v13 = vsel %vm912_vm0, %v2568_v12, 0.0 }
 0x7c4   : > { %6309 = vpow2.f32 %v2208_v26 }
 0x7ca   : > { %v6310_v60 = vpop.eup %6309  ;;  %v2193_v27 = vpop.xlane.xlu0 %2192 }
 0x7cb   : > { %v2190_v57 = vpop.xlane.xlu2 %2189  ;;  %v2201_v28 = vsub.f32 %v2147_v19, %v2193_v27  ;;  %v2218_v30 = vsel %vm1300_vm5, %v6310_v60, 0.0  ;;  %v2519_v27 = vld [vmem:[%s8475_s14 + $0x18] sm:$0xff] }
 0x7cc   : > { %v2200_v29 = vsub.f32 %v2128_v17, %v2190_v57  ;;  %2219 = vadd.xlane.f32.xlu2 %v2218_v30  ;;  %v2516_v30 = vld [vmem:[%s8475_s14] sm:$0xff] }
 0x7cd   : > { %v2206_v31 = vmul.f32 1.442695, %v2201_v28 }
 0x7ce   : > { %v2204_v32 = vmul.f32 1.442695, %v2200_v29  ;;  %v2593_v29 = vpack.c.bf16 %v2519_v27, %v2519_v27 }
 0x7cf   : > { %6311 = vpow2.f32 %v2206_v31  ;;  %v2517_v31 = vld [vmem:[%s8475_s14 + $0x8] sm:$0xff] }
 0x7d0   : > { %6313 = vpow2.f32 %v2204_v32  ;;  %v2534_v32 = vld [vmem:[%s8475_s14 + $0x90] sm:$0xff] }
 0x7d3   : > { %v2199_v53 = vpop.xlane.xlu2 %2198 }
 0x7d4   : > { %v2203_v33 = vsub.f32 %v2185_v21, %v2199_v53  ;;  %2570 = vadd.xlane.f32.xlu2 %v2569_v13  ;;  %v2590_v53 = vpack.c.bf16 %v2516_v30, %v2516_v30 }
 0x7d5   : > { %v6312_v34 = vpop.eup %6311 }
 0x7d6   : > { %v2210_v35 = vmul.f32 1.442695, %v2203_v33  ;;  %v6314_v0 = vpop.eup %6313  ;;  %v2215_v37 = vsel %vm1300_vm5, %v6312_v34, 0.0  ;;  %v2591_v33 = vpack.c.bf16 %v2517_v31, %v2517_v31 }
 0x7d7   : > { %2216 = vadd.xlane.f32.xlu1 %v2215_v37  ;;  %v2212_v38 = vsel %vm1300_vm5, %v6314_v0, 0.0 }
 0x7d8   : > { %6315 = vpow2.f32 %v2210_v35  ;;  %2213 = vadd.xlane.f32.xlu0 %v2212_v38  ;;  %v2608_v35 = vpack.c.bf16 %v2534_v32, %v2534_v32  ;;  %v2525_v32 = vld [vmem:[%s8475_s14 + $0x48] sm:$0xff] }
 0x7de   : > { %v6316_v39 = vpop.eup %6315 }
 0x7df   : > { %v2221_v40 = vsel %vm1300_vm5, %v6316_v39, 0.0 }
 0x7e0   : > { %2222 = vadd.xlane.f32.xlu0 %v2221_v40  ;;  %v2645_v40 = vunpack.c.l.b16 %v2593_v29  ;;  %v2524_v29 = vld [vmem:[%s8475_s14 + $0x40] sm:$0xff] }
 0x83f   : > { %v2220_v36 = vpop.xlane.xlu2 %2219 }
 0x840   : > { %6317 = vrcp.f32 %v2220_v36 }
 0x846   : > { %v6318_v41 = vpop.eup %6317 }
 0x847   : > { %v2230_v42 = vmul.f32 %v6318_v41, %v6310_v60  ;;  %v2571_v26 = vpop.xlane.xlu2 %2570  ;;  %v2518_v60 = vld [vmem:[%s8475_s14 + $0x10] sm:$0xff]  ;;  %v2533_v41 = vld [vmem:[%s8475_s14 + $0x88] sm:$0xff] }
 0x848   : > { %v2572_v57 = vmul.f32 %v2571_v26, %v6725_v51  ;;  %v2592_v28 = vpack.c.bf16 %v2518_v60, %v2518_v60  ;;  %v5988_v26 = vld [vmem:[%s8548_s25 + $0x20] sm:$0xff]  ;;  %v5989_v60 = vld [vmem:[%s8548_s25 + $0x28] sm:$0xff] }
 0x849   : > { %v2234_v43 = vpack.c.bf16 %v2230_v42, %v2230_v42  ;;  %v2642_v42 = vunpack.c.l.b16 %v2590_v53  ;;  %v2446_v27 = vpack.c.bf16 %v5989_v60, %v5988_v26  ;;  %v2598_v53 = vpack.c.bf16 %v2524_v29, %v2524_v29  ;;  %v2539_v26 = vld [vmem:[%s8475_s14 + $0xb8] sm:$0xff]  ;;  %v2550_v60 = vld [vmem:[%s8475_s14 + $0x110] sm:$0xff] }
 0x84a   : > { %v2217_v44 = vpop.xlane.xlu1 %2216  ;;  %v2573_v38 = vadd.f32 1e-06, %v2572_v57  ;;  %v2526_v57 = vld [vmem:[%s8475_s14 + $0x50] sm:$0xff]  ;;  %v2551_v29 = vld [vmem:[%s8475_s14 + $0x118] sm:$0xff] }
 0x84b   : > { %6319 = vrcp.f32 %v2217_v44  ;;  %v2214_v45 = vpop.xlane.xlu0 %2213  ;;  %5981 = vmatmul.msk.bf16.vlgmr.msra.gmra.mxu0 %vm1300_vm5, %v2234_v43  ;;  %v2643_v43 = vunpack.c.l.b16 %v2591_v33  ;;  %v2747_v44 = vunpack.c.l.b16 %v2608_v35  ;;  %v2600_v30 = vpack.c.bf16 %v2526_v57, %v2526_v57 }
 0x84c   : > { %6321 = vrcp.f32 %v2214_v45  ;;  %vm2580_vm14 = vweird.f32 %v2573_v38  ;;  %v2599_v33 = vpack.c.bf16 %v2525_v32, %v2525_v32  ;;  %v2624_v32 = vpack.c.bf16 %v2550_v60, %v2550_v60 }
 0x84d   : > { %v2697_v35 = vunpack.c.l.b16 %v2600_v30  ;;  %v2536_v30 = vld [vmem:[%s8475_s14 + $0xa0] sm:$0xff] }
 0x851   : > { %v6320_v46 = vpop.eup %6319 }
 0x852   : > { %v6322_v47 = vpop.eup %6321  ;;  %v2229_v48 = vmul.f32 %v6320_v46, %v6312_v34  ;;  %v2535_v34 = vld [vmem:[%s8475_s14 + $0x98] sm:$0xff] }
 0x853   : > { %v2228_v49 = vmul.f32 %v6322_v47, %v6314_v0  ;;  %v2223_v50 = vpop.xlane.xlu0 %2222  ;;  %v2532_v0 = vld [vmem:[%s8475_s14 + $0x80] sm:$0xff]  ;;  %v2609_v36 = vpack.c.bf16 %v2535_v34, %v2535_v34 }
 0x854   : > { %v2233_v52 = vpack.c.bf16 %v2229_v48, %v2229_v48  ;;  %6323 = vrcp.f32 %v2223_v50  ;;  %v2606_v45 = vpack.c.bf16 %v2532_v0, %v2532_v0  ;;  %v2607_v48 = vpack.c.bf16 %v2533_v41, %v2533_v41 }
 0x855   : > { %v2232_v54 = vpack.c.bf16 %v2228_v49, %v2228_v49  ;;  %6325 = vrsqrt.f32 %v2573_v38  ;;  %v2748_v47 = vunpack.c.l.b16 %v2609_v36  ;;  %v2646_v49 = vpack.c.b16 %v2643_v43, %v2642_v42 }
 0x856   : > { %5980 = vmatmul.msk.bf16.vlgmr.msrb.gmra.mxu3 %vm1300_vm5, %v2233_v52  ;;  %v2745_v52 = vunpack.c.l.b16 %v2606_v45  ;;  %v2522_v45 = vld [vmem:[%s8475_s14 + $0x30] sm:$0xff] }
 0x857   : > { %5979 = vmatmul.msk.bf16.vlgmr.msrb.gmra.mxu2 %vm1300_vm5, %v2232_v54  ;;  %v2750_v50 = vpack.c.b16 %v2748_v47, %v2747_v44  ;;  %v2746_v54 = vunpack.c.l.b16 %v2607_v48  ;;  %v2542_v47 = vld [vmem:[%s8475_s14 + $0xd0] sm:$0xff]  ;;  %v2543_v48 = vld [vmem:[%s8475_s14 + $0xd8] sm:$0xff] }
 0x85a   : > { %v6324_v55 = vpop.eup %6323 }
 0x85b   : > { %v2231_v56 = vmul.f32 %v6324_v55, %v6316_v39  ;;  %v2644_v39 = vunpack.c.l.b16 %v2592_v28  ;;  %v6326_v55 = vpop.eup %6325  ;;  %v2527_v28 = vld [vmem:[%s8475_s14 + $0x58] sm:$0xff] }
 0x85c   : > { %vm2581_vm15 = vweird.f32 %v6326_v55  ;;  %v2601_v31 = vpack.c.bf16 %v2527_v28, %v2527_v28  ;;  %v2613_v28 = vpack.c.bf16 %v2539_v26, %v2539_v26 }
 0x85d   : > { %v2235_v58 = vpack.c.bf16 %v2231_v56, %v2231_v56  ;;  %v2647_v46 = vpack.c.b16 %v2645_v40, %v2644_v39  ;;  %v2575_v56 = vmul.f32 %v6326_v55, %v2573_v38  ;;  %vm2582_vm1 = vmor %vm2580_vm14, %vm2581_vm15  ;;  %v2696_v39 = vunpack.c.l.b16 %v2599_v33 }
 0x85e   : > { %v2698_v0 = vunpack.c.l.b16 %v2601_v31  ;;  %v2537_v31 = vld [vmem:[%s8475_s14 + $0xa8] sm:$0xff]  ;;  %v2610_v33 = vpack.c.bf16 %v2536_v30, %v2536_v30 }
 0x85f   : > { %5982 = vmatmul.msk.bf16.vlgmr.msra.gmra.mxu1 %vm1300_vm5, %v2235_v58  ;;  %2659 = vmatpush.bf16.msra.mxu0 %v2647_v46  ;;  %v2749_v58 = vpack.c.b16 %v2746_v54, %v2745_v52  ;;  %v2576_v59 = vmul.f32 %v6326_v55, %v2575_v56  ;;  %v2523_v46 = vld [vmem:[%s8475_s14 + $0x38] sm:$0xff] }
 0x860   : > { %v2700_v40 = vpack.c.b16 %v2698_v0, %v2697_v35  ;;  %v2548_v35 = vld [vmem:[%s8475_s14 + $0x100] sm:$0xff]  ;;  %v2549_v0 = vld [vmem:[%s8475_s14 + $0x108] sm:$0xff] }
 0x861   : > { %v2577_v62 = vmul.f32 0.5, %v2576_v59  ;;  %v2617_v59 = vpack.c.bf16 %v2543_v48, %v2543_v48  ;;  %v5998_v48 = vld [vmem:[%s8472_s11 + $0x70] sm:$0xff] }
 0x863   : > { %2660 = vmatpush.bf16.msra.mxu0 %v2646_v49  ;;  %v2578_v1 = vsub.f32 1.5, %v2577_v62  ;;  %v2596_v49 = vpack.c.bf16 %v2522_v45, %v2522_v45  ;;  %v2770_v45 = vunpack.c.l.b16 %v2610_v33 }
 0x865   : > { %v2579_v5 = vmul.f32 %v6326_v55, %v2578_v1  ;;  %v2672_v54 = vunpack.c.l.b16 %v2596_v49  ;;  %v5999_v49 = vld [vmem:[%s8472_s11 + $0x78] sm:$0xff] }
 0x867   : > { %v2583_v12 = vsel %vm2582_vm1, %v6326_v55, %v2579_v5 }
 0x8c8   : > { %v2293_v14 = vpop.f32.mrf.mxu0 }
 0x8c9   : > { %v2318_v15 = vpack.c.bf16 %v2293_v14, %v2293_v14 }
 0x8cb   : > { %5985 = vmatmul.msk.bf16.vlgmr.msrb.gmra.mxu0 %vm1300_vm5, %v2318_v15  ;;  %v2584_v15 = vmul.f32 %v2583_v12, %v7209_v11  ;;  %v2520_v12 = vld [vmem:[%s8475_s14 + $0x20] sm:$0xff] }
 0x8cc   : > { %2759 = vmatpush.bf16.msrb.mxu0 %v2750_v50  ;;  %v2597_v50 = vpack.c.bf16 %v2523_v46, %v2523_v46 }
 0x8ce   : > { %v2673_v55 = vunpack.c.l.b16 %v2597_v50 }
 0x8d0   : > { %v2295_v16 = vpop.f32.mrf.mxu0  ;;  %2760 = vmatpush.bf16.msrb.mxu0 %v2749_v58  ;;  %v2616_v58 = vpack.c.bf16 %v2542_v47, %v2542_v47  ;;  %v2675_v62 = vpack.c.b16 %v2673_v55, %v2672_v54  ;;  %v2559_v47 = vld [vmem:[%s8475_s14 + $0x158] sm:$0xff] }
 0x8d2   : > { %2684 = vmatpush.bf16.msra.mxu1 %v2675_v62  ;;  %v2797_v5 = vunpack.c.l.b16 %v2616_v58  ;;  %v2553_v58 = vld [vmem:[%s8475_s14 + $0x128] sm:$0xff] }
 0x8d9   : > { %v2274_v17 = vpop.f32.mrf.mxu3 }
 0x8da   : > { %v2255_v19 = vpop.f32.mrf.mxu2  ;;  %v2317_v18 = vpack.c.bf16 %v2274_v17, %v2274_v17 }
 0x8db   : > { %v2316_v20 = vpack.c.bf16 %v2255_v19, %v2255_v19  ;;  %v2588_v19 = vmul.f32 %v6276_v8, %v2584_v15 }
 0x8dc   : > { %v2312_v21 = vpop.f32.mrf.mxu1  ;;  %5984 = vmatmul.msk.bf16.vlgmr.msra.gmra.mxu3 %vm1300_vm5, %v2317_v18 }
 0x8dd   : > { %v2319_v7 = vpack.c.bf16 %v2312_v21, %v2312_v21  ;;  %5983 = vmatmul.msk.bf16.vlgmr.msra.gmra.mxu2 %vm1300_vm5, %v2316_v20 }
 0x8df   : > { %5986 = vmatmul.msk.bf16.vlgmr.msrb.gmra.mxu1 %vm1300_vm5, %v2319_v7  ;;  %v7254_v7 = vpack.c.bf16 %v2588_v19, %v2588_v19 }
 0x8e1   : > { %v2276_v22 = vpop.f32.mrf.mxu3  ;;  %6002 = vmatmul.msk.bf16.vlgmr.msra.gmra.mxu0 %vm912_vm0, %v7254_v7 }
 0x8e2   : > { %v2257_v23 = vpop.f32.mrf.mxu2 }
 0x8e4   : > { %v2314_v24 = vpop.f32.mrf.mxu1 }
 0x8e5   : > { %v5990_v24 = vld [vmem:[%s8548_s25 + $0x30] sm:$0xff] }
 0x8f1   : > { %6006 = vmatmul.msk.bf16.vlgmr.msrb.gmra.mxu0 %vm912_vm0, %v7254_v7 }
 0x948   : > { %v2377_v25 = vpop.f32.mrf.mxu0 }
 0x949   : > { %v2403_v9 = vsel %vm912_vm0, %v2377_v25, 0.0 }
 0x950   : > { %v2379_v37 = vpop.f32.mrf.mxu0 }
 0x951   : > { %v2695_v37 = vunpack.c.l.b16 %v2598_v53  ;;  %v2625_v53 = vpack.c.bf16 %v2551_v29, %v2551_v29  ;;  %v5995_v29 = vld [vmem:[%s8472_s11 + $0x58] sm:$0xff] }
 0x953   : > { %v2699_v41 = vpack.c.b16 %v2696_v39, %v2695_v37  ;;  %v2554_v37 = vld [vmem:[%s8475_s14 + $0x130] sm:$0xff]  ;;  %v2773_v39 = vunpack.c.l.b16 %v2613_v28 }
 0x954   : > { %v2628_v55 = vpack.c.bf16 %v2554_v37, %v2554_v37  ;;  %v5994_v28 = vld [vmem:[%s8472_s11 + $0x50] sm:$0xff] }
 0x955   : > { %v2530_v37 = vld [vmem:[%s8475_s14 + $0x70] sm:$0xff] }
 0x95c   : > { %v2396_v61 = vpop.f32.mrf.mxu1 }
 0x95d   : > { %v2405_v16 = vsel %vm912_vm0, %v2396_v61, 0.0  ;;  %v2540_v61 = vld [vmem:[%s8475_s14 + $0xc0] sm:$0xff] }
 0x95f   : > { %v2358_v63 = vpop.f32.mrf.mxu3 }
 0x960   : > { %v2339_v2 = vpop.f32.mrf.mxu2  ;;  %v2401_v3 = vsel %vm912_vm0, %v2358_v63, 0.0  ;;  %v2541_v63 = vld [vmem:[%s8475_s14 + $0xc8] sm:$0xff] }
 0x961   : > { %v2400_v4 = vsel %vm912_vm0, %v2339_v2, 0.0  ;;  %v6277_v2 = vld [vmem:[%s8550_s10 + $0x1] ss:$0 sm:$0xff]  ;;  %v2615_v8 = vpack.c.bf16 %v2541_v63, %v2541_v63 }
 0x962   : > { %v2402_v6 = vadd.f32 %v2401_v3, %v2400_v4  ;;  %v2614_v3 = vpack.c.bf16 %v2540_v61, %v2540_v61 }
 0x964   : > { %v2404_v13 = vadd.f32 %v2403_v9, %v2402_v6  ;;  %v2398_v14 = vpop.f32.mrf.mxu1  ;;  %v2798_v6 = vunpack.c.l.b16 %v2617_v59  ;;  %v2556_v59 = vld [vmem:[%s8475_s14 + $0x140] sm:$0xff] }
 0x965   : > { %v2594_v14 = vpack.c.bf16 %v2520_v12, %v2520_v12 }
 0x966   : > { %v2406_v17 = vadd.f32 %v2405_v16, %v2404_v13  ;;  %v2521_v13 = vld [vmem:[%s8475_s14 + $0x28] sm:$0xff]  ;;  %v2800_v19 = vpack.c.b16 %v2798_v6, %v2797_v5  ;;  %v2872_v6 = vunpack.c.l.b16 %v2628_v55 }
 0x967   : > { %v2360_v18 = vpop.f32.mrf.mxu3  ;;  %v2595_v15 = vpack.c.bf16 %v2521_v13, %v2521_v13 }
 0x968   : > { %v2341_v20 = vpop.f32.mrf.mxu2  ;;  %v7252_v21 = vadd.f32 %v2406_v17, %v6983_v10  ;;  %v5991_v10 = vld [vmem:[%s8548_s25 + $0x38] sm:$0xff]  ;;  %v2795_v17 = vunpack.c.l.b16 %v2614_v3  ;;  %v2796_v18 = vunpack.c.l.b16 %v2615_v8  ;;  %v5996_v3 = vld [vmem:[%s8472_s11 + $0x60] sm:$0xff]  ;;  %v2633_v8 = vpack.c.bf16 %v2559_v47, %v2559_v47 }
 0x969   : > { %v2447_v25 = vpack.c.bf16 %v5991_v10, %v5990_v24  ;;  %v2670_v20 = vunpack.c.l.b16 %v2594_v14  ;;  %v7317_v10 = vpop.f32.mrf.mxu0 }
 0x96a   : > { %v2424_v22 = vmul.f32 %v7252_v21, %v7252_v21 }
 0x96b   : > { %2457 = vmatpush.bf16.msrb.mxu2 %v2447_v25  ;;  %v2538_v25 = vld [vmem:[%s8475_s14 + $0xb0] sm:$0xff] }
 0x96c   : > { %v2425_v23 = vsel %vm912_vm0, %v2424_v22, 0.0  ;;  %v2671_v22 = vunpack.c.l.b16 %v2595_v15  ;;  %v2612_v57 = vpack.c.bf16 %v2538_v25, %v2538_v25 }
 0x96d   : > { %2426 = vadd.xlane.f32.xlu1 %v2425_v23 }
 0x96e   : > { %v2674_v24 = vpack.c.b16 %v2671_v22, %v2670_v20 }
 0x96f   : > { %2458 = vmatpush.bf16.msrb.mxu2 %v2446_v27  ;;  %v2799_v27 = vpack.c.b16 %v2796_v18, %v2795_v17  ;;  %v2898_v17 = vunpack.c.l.b16 %v2633_v8 }
 0x970   : > { %2685 = vmatpush.bf16.msra.mxu1 %v2674_v24 }
 0x971   : > { %v2664_v12 = vpop.f32.mrf.mxu0 }
 0x973   : > { %2709 = vmatpush.bf16.msra.mxu2 %v2700_v40  ;;  %v2622_v40 = vpack.c.bf16 %v2548_v35, %v2548_v35  ;;  %6003 = vmatmul.msk.bf16.vlgmr.msra.gmra.mxu1 %vm912_vm0, %v7254_v7  ;;  %v5992_v35 = vld [vmem:[%s8472_s11 + $0x40] sm:$0xff] }
 0x977   : > { %2710 = vmatpush.bf16.msra.mxu2 %v2699_v41  ;;  %v2555_v41 = vld [vmem:[%s8475_s14 + $0x138] sm:$0xff] }
 0x978   : > { %v2629_v63 = vpack.c.bf16 %v2555_v41, %v2555_v41 }
 0x97a   : > { %v2873_v13 = vunpack.c.l.b16 %v2629_v63 }
 0x97c   : > { %v2875_v22 = vpack.c.b16 %v2873_v13, %v2872_v6  ;;  %v2562_v13 = vld [vmem:[%s8475_s14 + $0x170] sm:$0xff] }
 0x9e0   : > { %v2427_v34 = vpop.xlane.xlu1 %2426 }
 0x9e1   : > { %v2428_v38 = vmul.f32 %v2427_v34, %v6725_v51  ;;  %v2611_v34 = vpack.c.bf16 %v2537_v31, %v2537_v31 }
 0x9e3   : > { %v2429_v36 = vadd.f32 1e-06, %v2428_v38  ;;  %v2772_v38 = vunpack.c.l.b16 %v2612_v57  ;;  %v2771_v46 = vunpack.c.l.b16 %v2611_v34  ;;  %v2762_v57 = vpop.f32.mrf.mxu0  ;;  %v2941_v34 = vpack.c.bf16 %v7317_v10, %v7317_v10 }
 0x9e4   : > { %v2945_v30 = vpack.c.bf16 %v2762_v57, %v2762_v57 }
 0x9e5   : > { %6327 = vrsqrt.f32 %v2429_v36  ;;  %vm2436_vm3 = vweird.f32 %v2429_v36  ;;  %v2775_v50 = vpack.c.b16 %v2773_v39, %v2772_v38  ;;  %v2774_v62 = vpack.c.b16 %v2771_v46, %v2770_v45  ;;  %v2531_v38 = vld [vmem:[%s8475_s14 + $0x78] sm:$0xff] }
 0x9e6   : > { %v2604_v39 = vpack.c.bf16 %v2530_v37, %v2530_v37 }
 0x9e7   : > { %2784 = vmatpush.bf16.msrb.mxu1 %v2775_v50  ;;  %v2546_v50 = vld [vmem:[%s8475_s14 + $0xf0] sm:$0xff] }
 0x9eb   : > { %v6328_v42 = vpop.eup %6327  ;;  %2785 = vmatpush.bf16.msrb.mxu1 %v2774_v62  ;;  %v2764_v33 = vpop.f32.mrf.mxu0 }
 0x9ec   : > { %v2431_v43 = vmul.f32 %v6328_v42, %v2429_v36  ;;  %vm2437_vm2 = vweird.f32 %v6328_v42  ;;  %v2623_v36 = vpack.c.bf16 %v2549_v0, %v2549_v0  ;;  %v5993_v0 = vld [vmem:[%s8472_s11 + $0x48] sm:$0xff] }
 0x9ed   : > { %vm2438_vm4 = vmor %vm2436_vm3, %vm2437_vm2  ;;  %v2466_v10 = vpack.c.bf16 %v5993_v0, %v5992_v35 }
 0x9ee   : > { %v2432_v44 = vmul.f32 %v6328_v42, %v2431_v43  ;;  %v2847_v43 = vunpack.c.l.b16 %v2624_v32  ;;  %v2846_v54 = vunpack.c.l.b16 %v2623_v36  ;;  %v2467_v32 = vpack.c.bf16 %v5995_v29, %v5994_v28  ;;  %6007 = vmatmul.msk.bf16.vlgmr.msrb.gmra.mxu1 %vm912_vm0, %v7254_v7 }
 0x9ef   : > { %2884 = vmatpush.bf16.msra.mxu1 %v2875_v22  ;;  %v2722_v36 = vunpack.c.l.b16 %v2604_v39 }
 0x9f0   : > { %v2433_v52 = vmul.f32 0.5, %v2432_v44  ;;  %v2848_v44 = vunpack.c.l.b16 %v2625_v53  ;;  %v2953_v53 = vsel %vm1300_vm5, %v2945_v30, 0 }
 0x9f2   : > { %v2434_v56 = vsub.f32 1.5, %v2433_v52  ;;  %v2845_v52 = vunpack.c.l.b16 %v2622_v40  ;;  %v2850_v61 = vpack.c.b16 %v2848_v44, %v2847_v43  ;;  %v2605_v40 = vpack.c.bf16 %v2531_v38, %v2531_v38  ;;  %v2529_v43 = vld [vmem:[%s8475_s14 + $0x68] sm:$0xff] }
 0x9f3   : > { %v2603_v46 = vpack.c.bf16 %v2529_v43, %v2529_v43 }
 0x9f4   : > { %v2435_v1 = vmul.f32 %v6328_v42, %v2434_v56  ;;  %v2552_v56 = vld [vmem:[%s8475_s14 + $0x120] sm:$0xff]  ;;  %v2849_v5 = vpack.c.b16 %v2846_v54, %v2845_v52  ;;  %2859 = vmatpush.bf16.msra.mxu0 %v2850_v61  ;;  %v2723_v41 = vunpack.c.l.b16 %v2605_v40  ;;  %v2547_v52 = vld [vmem:[%s8475_s14 + $0xf8] sm:$0xff]  ;;  %v2620_v54 = vpack.c.bf16 %v2546_v50, %v2546_v50 }
 0x9f5   : > { %v2626_v15 = vpack.c.bf16 %v2552_v56, %v2552_v56  ;;  %v2621_v55 = vpack.c.bf16 %v2547_v52, %v2547_v52  ;;  %v2544_v56 = vld [vmem:[%s8475_s14 + $0xe0] sm:$0xff] }
 0x9f6   : > { %v2439_v4 = vsel %vm2438_vm4, %v6328_v42, %v2435_v1  ;;  %v2558_v42 = vld [vmem:[%s8475_s14 + $0x150] sm:$0xff]  ;;  %v2725_v44 = vpack.c.b16 %v2723_v41, %v2722_v36  ;;  %v2822_v61 = vunpack.c.l.b16 %v2620_v54  ;;  %v2618_v63 = vpack.c.bf16 %v2544_v56, %v2544_v56 }
 0x9f7   : > { %v2440_v9 = vmul.f32 %v2439_v4, %v7252_v21  ;;  %v2632_v1 = vpack.c.bf16 %v2558_v42, %v2558_v42  ;;  %v5997_v4 = vld [vmem:[%s8472_s11 + $0x68] sm:$0xff]  ;;  %v2528_v42 = vld [vmem:[%s8475_s14 + $0x60] sm:$0xff]  ;;  %v2823_v62 = vunpack.c.l.b16 %v2621_v55 }
 0x9f8   : > { %v2468_v20 = vpack.c.bf16 %v5997_v4, %v5996_v3  ;;  %2860 = vmatpush.bf16.msra.mxu0 %v2849_v5  ;;  %v2602_v45 = vpack.c.bf16 %v2528_v42, %v2528_v42  ;;  %v2820_v5 = vunpack.c.l.b16 %v2618_v63 }
 0x9f9   : > { %v2444_v16 = vmul.f32 %v6277_v2, %v2440_v9  ;;  %v2557_v2 = vld [vmem:[%s8475_s14 + $0x148] sm:$0xff]  ;;  %v2469_v9 = vpack.c.bf16 %v5999_v49, %v5998_v48  ;;  %v2897_v14 = vunpack.c.l.b16 %v2632_v1  ;;  %v2721_v48 = vunpack.c.l.b16 %v2603_v46 }
 0x9fa   : > { %v2631_v18 = vpack.c.bf16 %v2557_v2, %v2557_v2  ;;  %v2720_v47 = vunpack.c.l.b16 %v2602_v45  ;;  %v2825_v4 = vpack.c.b16 %v2823_v62, %v2822_v61 }
 0x9fb   : > { %v2445_v23 = vpack.c.bf16 %v2444_v16, %v2444_v16  ;;  %v2627_v16 = vpack.c.bf16 %v2553_v58, %v2553_v58  ;;  %2477 = vmatpush.bf16.msrb.mxu3 %v2469_v9  ;;  %v2900_v26 = vpack.c.b16 %v2898_v17, %v2897_v14  ;;  %6010 = vmatmul.msk.bf16.vlgmr.msra.gmra.mxu0 %vm912_vm0, %v7254_v7  ;;  %v2545_v58 = vld [vmem:[%s8475_s14 + $0xe8] sm:$0xff]  ;;  %v2563_v14 = vld [vmem:[%s8475_s14 + $0x178] sm:$0xff] }
 0x9fc   : > { %2962 = vmatpush.bf16.xpose.msrb.mxu0 %v2953_v53  ;;  %v2724_v49 = vpack.c.b16 %v2721_v48, %v2720_v47  ;;  %v2619_v1 = vpack.c.bf16 %v2545_v58, %v2545_v58  ;;  %v2637_v17 = vpack.c.bf16 %v2563_v14, %v2563_v14 }
 0x9fd   : > { %6000 = vmatmul.msk.bf16.vlgmr.msrb.gmra.mxu2 %vm912_vm0, %v2445_v23  ;;  %v2870_v23 = vunpack.c.l.b16 %v2626_v15  ;;  %v2871_v24 = vunpack.c.l.b16 %v2627_v16  ;;  %v2636_v16 = vpack.c.bf16 %v2562_v13, %v2562_v13 }
 0x9fe   : > { %2809 = vmatpush.bf16.msrb.mxu2 %v2800_v19  ;;  %v2630_v19 = vpack.c.bf16 %v2556_v59, %v2556_v59  ;;  %v2687_v59 = vpop.f32.mrf.mxu1  ;;  %v2821_v6 = vunpack.c.l.b16 %v2619_v1 }
 0x9ff   : > { %v2874_v25 = vpack.c.b16 %v2871_v24, %v2870_v23  ;;  %2478 = vmatpush.bf16.msrb.mxu3 %v2468_v20  ;;  %v2561_v20 = vld [vmem:[%s8475_s14 + $0x168] sm:$0xff]  ;;  %v2922_v23 = vunpack.c.l.b16 %v2636_v16  ;;  %v2942_v33 = vpack.c.bf16 %v2687_v59, %v2687_v59 }
 0xa00   : > { %v2895_v60 = vunpack.c.l.b16 %v2630_v19  ;;  %v2824_v9 = vpack.c.b16 %v2821_v6, %v2820_v5 }
 0xa01   : > { %2885 = vmatpush.bf16.msra.mxu1 %v2874_v25 }
 0xa02   : > { %2810 = vmatpush.bf16.msrb.mxu2 %v2799_v27  ;;  %v2896_v27 = vunpack.c.l.b16 %v2631_v18  ;;  %v2560_v18 = vld [vmem:[%s8475_s14 + $0x160] sm:$0xff] }
 0xa03   : > { %2479 = vmatpush.bf16.msrb.mxu3 %v2467_v32 }
 0xa04   : > { %v2899_v31 = vpack.c.b16 %v2896_v27, %v2895_v60  ;;  %6011 = vmatmul.msk.bf16.vlgmr.msra.gmra.mxu1 %vm912_vm0, %v7254_v7  ;;  %v2634_v60 = vpack.c.bf16 %v2560_v18, %v2560_v18  ;;  %v2635_v27 = vpack.c.bf16 %v2561_v20, %v2561_v20 }
 0xa06   : > { %v2689_v12 = vpop.f32.mrf.mxu1  ;;  %v2921_v32 = vunpack.c.l.b16 %v2635_v27 }
 0xa07   : > { %2480 = vmatpush.bf16.msrb.mxu3 %v2466_v10  ;;  %v2511_v10 = vld [vmem:[%s8554_s24] sm:$0xff] }
 0xa0b   : > { %6014 = vmatmul.msk.bf16.vlgmr.msrb.gmra.mxu0 %vm1300_vm5, %v2941_v34  ;;  %2734 = vmatpush.bf16.msra.mxu3 %v2725_v44 }
 0xa0d   : > { %6004 = vmatmul.msk.bf16.vlgmr.msra.gmra.mxu2 %vm912_vm0, %v7254_v7 }
 0xa0e   : > { %2909 = vmatpush.bf16.msra.mxu2 %v2900_v26  ;;  %v2923_v26 = vunpack.c.l.b16 %v2637_v17 }
 0xa0f   : > { %2735 = vmatpush.bf16.msra.mxu3 %v2724_v49 }
 0xa10   : > { %v2925_v30 = vpack.c.b16 %v2923_v26, %v2922_v23 }
 0xa12   : > { %2910 = vmatpush.bf16.msra.mxu2 %v2899_v31  ;;  %v2920_v31 = vunpack.c.l.b16 %v2634_v60 }
 0xa14   : > { %v2924_v34 = vpack.c.b16 %v2921_v32, %v2920_v31 }
 0xa1d   : > { %6008 = vmatmul.msk.bf16.vlgmr.msrb.gmra.mxu2 %vm912_vm0, %v7254_v7 }
 0xa2d   : > { %6012 = vmatmul.msk.bf16.vlgmr.msra.gmra.mxu2 %vm912_vm0, %v7254_v7 }
 0xa6b   : > { %v2787_v24 = vpop.f32.mrf.mxu1 }
 0xa6c   : > { %v2946_v57 = vpack.c.bf16 %v2787_v24, %v2787_v24 }
 0xa6e   : > { %v2972_v29 = vsel %vm1300_vm5, %v2946_v57, 0 }
 0xa6f   : > { %2981 = vmatpush.bf16.xpose.msrb.mxu1 %v2972_v29 }
 0xa73   : > { %v2789_v35 = vpop.f32.mrf.mxu1 }
 0xa76   : > { %6015 = vmatmul.msk.bf16.vlgmr.msrb.gmra.mxu1 %vm1300_vm5, %v2942_v33 }
 0xa78   : > { %v2862_v19 = vpop.f32.mrf.mxu0 }
 0xa79   : > { %v3073_v22 = vpack.c.bf16 %v2862_v19, %v2862_v19 }
 0xa7b   : > { %v3081_v25 = vsel %vm1432_vm6, %v3073_v22, 0 }
 0xa7c   : > { %3090 = vmatpush.bf16.msra.mxu0 %v3081_v25 }
 0xa80   : > { %v2460_v2 = vpop.f32.mrf.mxu2  ;;  %v2864_v53 = vpop.f32.mrf.mxu0 }
 0xa81   : > { %v2464_v3 = vmax.f32 %v2460_v2, 0.0  ;;  %v2887_v40 = vpop.f32.mrf.mxu1 }
 0xa82   : > { %v3074_v36 = vpack.c.bf16 %v2887_v40, %v2887_v40 }
 0xa83   : > { %v2465_v8 = vpack.c.bf16 %v2464_v3, %v2464_v3 }
 0xa84   : > { %v3100_v43 = vsel %vm1432_vm6, %v3074_v36, 0 }
 0xa85   : > { %6001 = vmatmul.msk.bf16.vlgmr.msrb.gmra.mxu3 %vm1657_vm10, %v2465_v8  ;;  %3109 = vmatpush.bf16.msra.mxu1 %v3100_v43 }
 0xa86   : > { %2834 = vmatpush.bf16.msrb.mxu3 %v2825_v4  ;;  %v2513_v4 = vld [vmem:[%s8554_s24 + $0x10] sm:$0xff] }
 0xa88   : > { %v2462_v15 = vpop.f32.mrf.mxu2  ;;  %v2964_v37 = vpop.f32.mrf.mxu0 }
 0xa89   : > { %v2965_v38 = vadd.f32 %v2964_v37, %v2511_v10  ;;  %v2889_v46 = vpop.f32.mrf.mxu1 }
 0xa8a   : > { %2835 = vmatpush.bf16.msrb.mxu3 %v2824_v9  ;;  %v2512_v9 = vld [vmem:[%s8554_s24 + $0x8] sm:$0xff] }
 0xa8b   : > { %v3025_v39 = vsel %vm1300_vm5, %v2965_v38, -inf }
 0xa8c   : > { %3026 = vmax.xlane.f32.xlu2 %v3025_v39 }
 0xa90   : > { %v2712_v28 = vpop.f32.mrf.mxu2  ;;  %v2966_v45 = vpop.f32.mrf.mxu0 }
 0xa91   : > { %v2943_v47 = vpack.c.bf16 %v2712_v28, %v2712_v28 }
 0xa95   : > { %6005 = vmatmul.msk.bf16.vlgmr.msra.gmra.mxu3 %vm912_vm0, %v7254_v7 }
 0xa96   : > { %2934 = vmatpush.bf16.msra.mxu3 %v2925_v30  ;;  %v2514_v30 = vld [vmem:[%s8554_s24 + $0x18] sm:$0xff] }
 0xa98   : > { %v2714_v0 = vpop.f32.mrf.mxu2 }
 0xa9a   : > { %2935 = vmatpush.bf16.msra.mxu3 %v2924_v34 }
 0xaa0   : > { %v2812_v41 = vpop.f32.mrf.mxu2 }
 0xaa1   : > { %v2947_v42 = vpack.c.bf16 %v2812_v41, %v2812_v41  ;;  %v2564_v41 = vld [vmem:[%s8476_s15] sm:$0xff] }
 0xaa3   : > { %v2991_v44 = vsel %vm1300_vm5, %v2947_v42, 0  ;;  %v3157_v42 = vpack.c.bf16 %v2564_v41, %v2564_v41  ;;  %v3248_v41 = vld [vmem:[%s8478_s17 + $0x10] sm:$0xff] }
 0xaa4   : > { %3000 = vmatpush.bf16.xpose.msrb.mxu2 %v2991_v44 }
 0xaa5   : > { %6009 = vmatmul.msk.bf16.vlgmr.msrb.gmra.mxu3 %vm912_vm0, %v7254_v7  ;;  %v3165_v43 = vsel %vm1432_vm6, %v3157_v42, 0  ;;  %v3249_v42 = vld [vmem:[%s8478_s17 + $0x18] sm:$0xff] }
 0xaa6   : > { %3174 = vmatpush.bf16.msrb.mxu0 %v3165_v43  ;;  %v3322_v43 = vpack.c.bf16 %v3248_v41, %v3248_v41 }
 0xaa8   : > { %v2814_v48 = vpop.f32.mrf.mxu2 }
 0xaab   : > { %6016 = vmatmul.msk.bf16.vlgmr.msrb.gmra.mxu2 %vm1300_vm5, %v2943_v47 }
 0xab0   : > { %v2912_v49 = vpop.f32.mrf.mxu2 }
 0xab1   : > { %v3075_v50 = vpack.c.bf16 %v2912_v49, %v2912_v49 }
 0xab3   : > { %v3119_v52 = vsel %vm1432_vm6, %v3075_v50, 0 }
 0xab4   : > { %3128 = vmatpush.bf16.msra.mxu2 %v3119_v52 }
 0xab5   : > { %6013 = vmatmul.msk.bf16.vlgmr.msra.gmra.mxu3 %vm912_vm0, %v7254_v7 }
 0xab8   : > { %v2914_v54 = vpop.f32.mrf.mxu2 }
 0xaf3   : > { %v2983_v58 = vpop.f32.mrf.mxu1 }
 0xaf4   : > { %v2984_v15 = vadd.f32 %v2983_v58, %v2512_v9 }
 0xaf6   : > { %v3028_v17 = vsel %vm1300_vm5, %v2984_v15, -inf }
 0xafb   : > { %v2985_v61 = vpop.f32.mrf.mxu1 }
 0xaff   : > { %v3027_v3 = vpop.xlane.xlu2 %3026 }
 0xb00   : > { %v3037_v6 = vsub.f32 %v2965_v38, %v3027_v3  ;;  %v2565_v3 = vld [vmem:[%s8476_s15 + $0x8] sm:$0xff] }
 0xb02   : > { %v3041_v14 = vmul.f32 1.442695, %v3037_v6 }
 0xb04   : > { %6329 = vpow2.f32 %v3041_v14 }
 0xb08   : > { %v2482_v55 = vpop.f32.mrf.mxu3 }
 0xb09   : > { %v7476_v25 = vadd.f32 %v2482_v55, %v7252_v21 }
 0xb0a   : > { %v6330_v22 = vpop.eup %6329 }
 0xb0b   : > { %v3049_v23 = vsel %vm1300_vm5, %v6330_v22, 0.0  ;;  %v2487_v26 = vmul.f32 %v7476_v25, %v7476_v25 }
 0xb0d   : > { %v2488_v60 = vsel %vm912_vm0, %v2487_v26, 0.0 }
 0xb10   : > { %v2484_v56 = vpop.f32.mrf.mxu3 }
 0xb18   : > { %v2737_v59 = vpop.f32.mrf.mxu3 }
 0xb19   : > { %v2944_v12 = vpack.c.bf16 %v2737_v59, %v2737_v59 }
 0xb20   : > { %v2739_v62 = vpop.f32.mrf.mxu3 }
 0xb28   : > { %v2837_v63 = vpop.f32.mrf.mxu3 }
 0xb29   : > { %v2948_v1 = vpack.c.bf16 %v2837_v63, %v2837_v63 }
 0xb2b   : > { %v3010_v2 = vsel %vm1300_vm5, %v2948_v1, 0  ;;  %v2566_v1 = vld [vmem:[%s8476_s15 + $0x10] sm:$0xff] }
 0xb2c   : > { %3019 = vmatpush.bf16.xpose.msrb.mxu3 %v3010_v2  ;;  %v3159_v2 = vpack.c.bf16 %v2566_v1, %v2566_v1 }
 0xb2e   : > { %v3002_v5 = vpop.f32.mrf.mxu2 }
 0xb2f   : > { %v3003_v7 = vadd.f32 %v3002_v5, %v2513_v4  ;;  %v3203_v4 = vsel %vm1432_vm6, %v3159_v2, 0  ;;  %v3158_v5 = vpack.c.bf16 %v2565_v3, %v2565_v3 }
 0xb30   : > { %v2839_v8 = vpop.f32.mrf.mxu3  ;;  %3212 = vmatpush.bf16.msrb.mxu2 %v3203_v4  ;;  %v3246_v4 = vld [vmem:[%s8478_s17] sm:$0xff] }
 0xb31   : > { %v3031_v13 = vsel %vm1300_vm5, %v3003_v7, -inf  ;;  %v3184_v6 = vsel %vm1432_vm6, %v3158_v5, 0  ;;  %v2567_v8 = vld [vmem:[%s8476_s15 + $0x18] sm:$0xff]  ;;  %v3247_v5 = vld [vmem:[%s8478_s17 + $0x8] sm:$0xff] }
 0xb32   : > { %3032 = vmax.xlane.f32.xlu0 %v3031_v13  ;;  %3193 = vmatpush.bf16.msrb.mxu1 %v3184_v6  ;;  %v3160_v9 = vpack.c.bf16 %v2567_v8, %v2567_v8  ;;  %v3250_v6 = vld [vmem:[%s8478_s17 + $0x20] sm:$0xff] }
 0xb33   : > { %6017 = vmatmul.msk.bf16.vlgmr.msrb.gmra.mxu3 %vm1300_vm5, %v2944_v12 }
 0xb34   : > { %v3222_v12 = vsel %vm1432_vm6, %v3160_v9, 0  ;;  %v3320_v9 = vpack.c.bf16 %v3246_v4, %v3246_v4 }
 0xb36   : > { %v3004_v16 = vpop.f32.mrf.mxu2 }
 0xb38   : > { %v2937_v19 = vpop.f32.mrf.mxu3 }
 0xb39   : > { %v3076_v18 = vpack.c.bf16 %v2937_v19, %v2937_v19 }
 0xb3a   : > { %3029 = vmax.xlane.f32.xlu0 %v3028_v17 }
 0xb3b   : > { %v3138_v20 = vsel %vm1432_vm6, %v3076_v18, 0 }
 0xb3c   : > { %3147 = vmatpush.bf16.msra.mxu3 %v3138_v20 }
 0xb40   : > { %v2939_v24 = vpop.f32.mrf.mxu3  ;;  %3231 = vmatpush.bf16.msrb.mxu3 %v3222_v12  ;;  %v3321_v12 = vpack.c.bf16 %v3247_v5, %v3247_v5 }
 0xb42   : > { %3050 = vadd.xlane.f32.xlu0 %v3049_v23 }
 0xb4a   : > { %2489 = vadd.xlane.f32.xlu0 %v2488_v60 }
 0xba5   : > { %v3033_v27 = vpop.xlane.xlu0 %3032 }
 0xba6   : > { %v3039_v28 = vsub.f32 %v3003_v7, %v3033_v27 }
 0xba8   : > { %v3045_v29 = vmul.f32 1.442695, %v3039_v28 }
 0xbad   : > { %v3030_v57 = vpop.xlane.xlu0 %3029 }
 0xbae   : > { %v3038_v53 = vsub.f32 %v2984_v15, %v3030_v57 }
 0xbb0   : > { %v3043_v35 = vmul.f32 1.442695, %v3038_v53 }
 0xbb5   : > { %v3051_v31 = vpop.xlane.xlu0 %3050 }
 0xbb6   : > { %6331 = vrcp.f32 %v3051_v31  ;;  %v3021_v32 = vpop.f32.mrf.mxu3 }
 0xbb7   : > { %v3022_v21 = vadd.f32 %v3021_v32, %v2514_v30  ;;  %6333 = vpow2.f32 %v3045_v29 }
 0xbb8   : > { %6335 = vpow2.f32 %v3043_v35 }
 0xbb9   : > { %v3034_v33 = vsel %vm1300_vm5, %v3022_v21, -inf }
 0xbba   : > { %3035 = vmax.xlane.f32.xlu1 %v3034_v33 }
 0xbbc   : > { %v6332_v34 = vpop.eup %6331 }
 0xbbd   : > { %v3065_v0 = vmul.f32 %v6332_v34, %v6330_v22  ;;  %v6334_v10 = vpop.eup %6333 }
 0xbbe   : > { %v3023_v37 = vpop.f32.mrf.mxu3  ;;  %v3055_v39 = vsel %vm1300_vm5, %v6334_v10, 0.0  ;;  %v6336_v40 = vpop.eup %6335 }
 0xbbf   : > { %v3069_v38 = vpack.c.bf16 %v3065_v0, %v3065_v0  ;;  %v3052_v36 = vsel %vm1300_vm5, %v6336_v40, 0.0 }
 0xbc1   : > { %6018 = vmatmul.msk.bf16.vlgmr.msra.gmra.mxu0 %vm1300_vm5, %v3069_v38 }
 0xbc2   : > { %3056 = vadd.xlane.f32.xlu1 %v3055_v39 }
 0xbca   : > { %3053 = vadd.xlane.f32.xlu1 %v3052_v36 }
 0xc2d   : > { %v3036_v44 = vpop.xlane.xlu1 %3035 }
 0xc2e   : > { %v3040_v45 = vsub.f32 %v3022_v21, %v3036_v44  ;;  %v3323_v44 = vpack.c.bf16 %v3249_v42, %v3249_v42  ;;  %v3269_v42 = vld [vmem:[%s8479_s18 + $0x38] sm:$0xff] }
 0xc30   : > { %v3047_v46 = vmul.f32 1.442695, %v3040_v45  ;;  %v3253_v45 = vld [vmem:[%s8478_s17 + $0x38] sm:$0xff] }
 0xc32   : > { %6337 = vpow2.f32 %v3047_v46 }
 0xc35   : > { %v3057_v47 = vpop.xlane.xlu1 %3056 }
 0xc36   : > { %6339 = vrcp.f32 %v3057_v47  ;;  %v3256_v47 = vld [vmem:[%s8478_s17 + $0x50] sm:$0xff] }
 0xc38   : > { %v6338_v48 = vpop.eup %6337 }
 0xc39   : > { %v3058_v49 = vsel %vm1300_vm5, %v6338_v48, 0.0 }
 0xc3a   : > { %3059 = vadd.xlane.f32.xlu2 %v3058_v49 }
 0xc3c   : > { %v6340_v50 = vpop.eup %6339 }
 0xc3d   : > { %v3067_v52 = vmul.f32 %v6340_v50, %v6334_v10  ;;  %v3054_v54 = vpop.xlane.xlu1 %3053  ;;  %v3327_v50 = vpack.c.bf16 %v3253_v45, %v3253_v45 }
 0xc3e   : > { %6341 = vrcp.f32 %v3054_v54  ;;  %v3092_v55 = vpop.f32.mrf.mxu0 }
 0xc3f   : > { %v3071_v56 = vpack.c.bf16 %v3067_v52, %v3067_v52  ;;  %v3153_v58 = vpack.c.bf16 %v3092_v55, %v3092_v55  ;;  %v3330_v52 = vpack.c.bf16 %v3256_v47, %v3256_v47  ;;  %v3260_v55 = vld [vmem:[%s8478_s17 + $0x70] sm:$0xff] }
 0xc41   : > { %6020 = vmatmul.msk.bf16.vlgmr.msra.gmra.mxu2 %vm1300_vm5, %v3071_v56  ;;  %6022 = vmatmul.msk.bf16.vlgmr.msrb.gmra.mxu0 %vm1300_vm5, %v3153_v58  ;;  %v3261_v56 = vld [vmem:[%s8478_s17 + $0x78] sm:$0xff]  ;;  %v3342_v58 = vunpack.c.l.b16 %v3322_v43  ;;  %v3395_v1 = vunpack.c.l.b16 %v3330_v52  ;;  %v3272_v43 = vld [vmem:[%s8479_s18 + $0x50] sm:$0xff] }
 0xc42   : > { %v3335_v3 = vpack.c.bf16 %v3261_v56, %v3261_v56  ;;  %v3449_v47 = vpack.c.bf16 %v3272_v43, %v3272_v43  ;;  %v3277_v52 = vld [vmem:[%s8479_s18 + $0x78] sm:$0xff]  ;;  %v3284_v43 = vld [vmem:[%s8479_s18 + $0xb0] sm:$0xff] }
 0xc44   : > { %v6342_v59 = vpop.eup %6341 }
 0xc45   : > { %v3066_v61 = vmul.f32 %v6342_v59, %v6336_v40  ;;  %v2490_v40 = vpop.xlane.xlu0 %2489  ;;  %v3343_v59 = vunpack.c.l.b16 %v3323_v44  ;;  %v3273_v44 = vld [vmem:[%s8479_s18 + $0x58] sm:$0xff] }
 0xc46   : > { %v3094_v62 = vpop.f32.mrf.mxu0  ;;  %v2491_v36 = vmul.f32 %v2490_v40, %v6725_v51  ;;  %v3268_v40 = vld [vmem:[%s8479_s18 + $0x30] sm:$0xff] }
 0xc47   : > { %v3070_v63 = vpack.c.bf16 %v3066_v61, %v3066_v61  ;;  %v3334_v62 = vpack.c.bf16 %v3260_v55, %v3260_v55 }
 0xc48   : > { %v7541_v49 = vadd.f32 1e-06, %v2491_v36 }
 0xc49   : > { %6019 = vmatmul.msk.bf16.vlgmr.msra.gmra.mxu1 %vm1300_vm5, %v3070_v63  ;;  %v3371_v63 = vunpack.c.l.b16 %v3327_v50  ;;  %v3420_v8 = vunpack.c.l.b16 %v3334_v62  ;;  %v3276_v50 = vld [vmem:[%s8479_s18 + $0x70] sm:$0xff] }
 0xc4a   : > { %vm2499_vm12 = vweird.f32 %v7541_v49 }
 0xcad   : > { %v3060_v7 = vpop.xlane.xlu2 %3059 }
 0xcae   : > { %6343 = vrcp.f32 %v3060_v7  ;;  %v3345_v7 = vpack.c.b16 %v3343_v59, %v3342_v58 }
 0xcaf   : > { %6345 = vrsqrt.f32 %v7541_v49 }
 0xcb0   : > { %3357 = vmatpush.bf16.msra.mxu0 %v3345_v7 }
 0xcb4   : > { %v6344_v13 = vpop.eup %6343 }
 0xcb5   : > { %v3068_v14 = vmul.f32 %v6344_v13, %v6338_v48  ;;  %v3257_v48 = vld [vmem:[%s8478_s17 + $0x58] sm:$0xff]  ;;  %v3251_v13 = vld [vmem:[%s8478_s17 + $0x28] sm:$0xff]  ;;  %v7605_v62 = vpop.eup %6345 }
 0xcb6   : > { %v3331_v54 = vpack.c.bf16 %v3257_v48, %v3257_v48  ;;  %v3450_v48 = vpack.c.bf16 %v3273_v44, %v3273_v44  ;;  %vm2500_vm11 = vweird.f32 %v7605_v62 }
 0xcb7   : > { %v3072_v15 = vpack.c.bf16 %v3068_v14, %v3068_v14  ;;  %v3254_v14 = vld [vmem:[%s8478_s17 + $0x40] sm:$0xff]  ;;  %vm2501_vm13 = vmor %vm2499_vm12, %vm2500_vm11 }
 0xcb8   : > { %v3396_v2 = vunpack.c.l.b16 %v3331_v54  ;;  %v3262_v54 = vld [vmem:[%s8479_s18] sm:$0xff] }
 0xcb9   : > { %6021 = vmatmul.msk.bf16.vlgmr.msra.gmra.mxu3 %vm1300_vm5, %v3072_v15  ;;  %v3255_v15 = vld [vmem:[%s8478_s17 + $0x48] sm:$0xff]  ;;  %v3439_v7 = vpack.c.bf16 %v3262_v54, %v3262_v54  ;;  %v3292_v54 = vld [vmem:[%s8479_s18 + $0xf0] sm:$0xff] }
 0xcbe   : > { %v3176_v16 = vpop.f32.mrf.mxu0 }
 0xcbf   : > { %v3237_v28 = vsel %vm912_vm0, %v3176_v16, 0.0 }
 0xcc4   : > { %v3130_v17 = vpop.f32.mrf.mxu2 }
 0xcc5   : > { %v3155_v19 = vpack.c.bf16 %v3130_v17, %v3130_v17  ;;  %v3398_v17 = vpack.c.b16 %v3396_v2, %v3395_v1  ;;  %v3530_v1 = vunpack.c.l.b16 %v3449_v47  ;;  %v3531_v2 = vunpack.c.l.b16 %v3450_v48  ;;  %v3289_v47 = vld [vmem:[%s8479_s18 + $0xd8] sm:$0xff] }
 0xcc6   : > { %v3111_v18 = vpop.f32.mrf.mxu1  ;;  %v3178_v20 = vpop.f32.mrf.mxu0 }
 0xcc7   : > { %v3154_v22 = vpack.c.bf16 %v3111_v18, %v3111_v18  ;;  %6024 = vmatmul.msk.bf16.vlgmr.msrb.gmra.mxu2 %vm1300_vm5, %v3155_v19  ;;  %v3421_v19 = vunpack.c.l.b16 %v3335_v3  ;;  %v3324_v18 = vpack.c.bf16 %v3250_v6, %v3250_v6  ;;  %v3258_v20 = vld [vmem:[%s8478_s17 + $0x60] sm:$0xff]  ;;  %v3453_v3 = vpack.c.bf16 %v3276_v50, %v3276_v50 }
 0xcc8   : > { %3407 = vmatpush.bf16.msra.mxu2 %v3398_v17  ;;  %v3454_v6 = vpack.c.bf16 %v3277_v52, %v3277_v52  ;;  %v3271_v17 = vld [vmem:[%s8479_s18 + $0x48] sm:$0xff] }
 0xcc9   : > { %6023 = vmatmul.msk.bf16.vlgmr.msrb.gmra.mxu1 %vm1300_vm5, %v3154_v22  ;;  %v3259_v22 = vld [vmem:[%s8478_s17 + $0x68] sm:$0xff] }
 0xccc   : > { %v3132_v23 = vpop.f32.mrf.mxu2 }
 0xccd   : > { %v3340_v23 = vunpack.c.l.b16 %v3320_v9  ;;  %v3267_v9 = vld [vmem:[%s8479_s18 + $0x28] sm:$0xff] }
 0xcce   : > { %v3113_v24 = vpop.f32.mrf.mxu1 }
 0xccf   : > { %v3341_v24 = vunpack.c.l.b16 %v3321_v12  ;;  %v3270_v12 = vld [vmem:[%s8479_s18 + $0x40] sm:$0xff] }
 0xd3c   : > { %v3149_v26 = vpop.f32.mrf.mxu3 }
 0xd3d   : > { %v3156_v60 = vpack.c.bf16 %v3149_v26, %v3149_v26  ;;  %v3325_v26 = vpack.c.bf16 %v3251_v13, %v3251_v13 }
 0xd3f   : > { %6025 = vmatmul.msk.bf16.vlgmr.msrb.gmra.mxu3 %vm1300_vm5, %v3156_v60  ;;  %v3328_v60 = vpack.c.bf16 %v3254_v14, %v3254_v14  ;;  %v3533_v14 = vpack.c.b16 %v3531_v2, %v3530_v1  ;;  %v3469_v1 = vpack.c.bf16 %v3292_v54, %v3292_v54  ;;  %v6279_v2 = vld [vmem:[%s8477_s16] ss:$0 sm:$0xff] }
 0xd44   : > { %v3151_v27 = vpop.f32.mrf.mxu3 }
 0xd45   : > { %v3423_v27 = vpack.c.b16 %v3421_v19, %v3420_v8  ;;  %v3266_v8 = vld [vmem:[%s8479_s18 + $0x20] sm:$0xff] }
 0xd46   : > { %v3195_v57 = vpop.f32.mrf.mxu1  ;;  %v3274_v19 = vld [vmem:[%s8479_s18 + $0x60] sm:$0xff] }
 0xd47   : > { %v3238_v29 = vsel %vm912_vm0, %v3195_v57, 0.0  ;;  %v3368_v57 = vunpack.c.l.b16 %v3324_v18  ;;  %3432 = vmatpush.bf16.msra.mxu3 %v3423_v27  ;;  %v3275_v18 = vld [vmem:[%s8479_s18 + $0x68] sm:$0xff]  ;;  %v3447_v27 = vpack.c.bf16 %v3270_v12, %v3270_v12 }
 0xd48   : > { %v3239_v30 = vadd.f32 %v3238_v29, %v3237_v28  ;;  %v3329_v28 = vpack.c.bf16 %v3255_v15, %v3255_v15  ;;  %v3332_v29 = vpack.c.bf16 %v3258_v20, %v3258_v20  ;;  %v3555_v15 = vunpack.c.l.b16 %v3453_v3 }
 0xd49   : > { %v2494_v20 = vmul.f32 %v7605_v62, %v7541_v49  ;;  %v6278_v49 = vld [vmem:[%s8473_s12] ss:$0 sm:$0xff] }
 0xd4a   : > { %v3214_v31 = vpop.f32.mrf.mxu2 }
 0xd4b   : > { %v3240_v32 = vsel %vm912_vm0, %v3214_v31, 0.0  ;;  %v3369_v31 = vunpack.c.l.b16 %v3325_v26  ;;  %v3443_v26 = vpack.c.bf16 %v3266_v8, %v3266_v8 }
 0xd4c   : > { %v3241_v21 = vadd.f32 %v3240_v32, %v3239_v30  ;;  %v3344_v30 = vpack.c.b16 %v3341_v24, %v3340_v23  ;;  %v3393_v32 = vunpack.c.l.b16 %v3328_v60  ;;  %v3475_v23 = vunpack.c.l.b16 %v3439_v7 }
 0xd4d   : > { %v3444_v60 = vpack.c.bf16 %v3267_v9, %v3267_v9 }
 0xd4e   : > { %v3197_v53 = vpop.f32.mrf.mxu1  ;;  %3358 = vmatpush.bf16.msra.mxu0 %v3344_v30  ;;  %v3452_v30 = vpack.c.bf16 %v3275_v18, %v3275_v18  ;;  %v3286_v18 = vld [vmem:[%s8479_s18 + $0xc0] sm:$0xff] }
 0xd4f   : > { %v3394_v53 = vunpack.c.l.b16 %v3329_v28  ;;  %v3448_v28 = vpack.c.bf16 %v3271_v17, %v3271_v17 }
 0xd52   : > { %v3216_v33 = vpop.f32.mrf.mxu2 }
 0xd53   : > { %v3418_v33 = vunpack.c.l.b16 %v3332_v29  ;;  %v3451_v29 = vpack.c.bf16 %v3274_v19, %v3274_v19 }
 0xdc2   : > { %v3233_v34 = vpop.f32.mrf.mxu3 }
 0xdc3   : > { %v3242_v35 = vsel %vm912_vm0, %v3233_v34, 0.0  ;;  %v3372_v34 = vpack.c.b16 %v3369_v31, %v3368_v57 }
 0xdc4   : > { %v3243_v0 = vadd.f32 %v3242_v35, %v3241_v21  ;;  %v3333_v21 = vpack.c.bf16 %v3259_v22, %v3259_v22  ;;  %v3556_v22 = vunpack.c.l.b16 %v3454_v6  ;;  %v3279_v6 = vld [vmem:[%s8479_s18 + $0x88] sm:$0xff] }
 0xdc6   : > { %v7517_v10 = vadd.f32 %v3243_v0, %v7209_v11  ;;  %v3252_v11 = vld [vmem:[%s8478_s17 + $0x30] sm:$0xff]  ;;  %v3419_v35 = vunpack.c.l.b16 %v3333_v21  ;;  %v3397_v0 = vpack.c.b16 %v3394_v53, %v3393_v32  ;;  %v3558_v57 = vpack.c.b16 %v3556_v22, %v3555_v15  ;;  %v3290_v22 = vld [vmem:[%s8479_s18 + $0xe0] sm:$0xff] }
 0xdc7   : > { %v3326_v46 = vpack.c.bf16 %v3252_v11, %v3252_v11  ;;  %v3445_v11 = vpack.c.bf16 %v3268_v40, %v3268_v40  ;;  %v3503_v32 = vunpack.c.l.b16 %v3443_v26  ;;  %v3504_v21 = vunpack.c.l.b16 %v3444_v60 }
 0xdc8   : > { %v3298_v37 = vmul.f32 %v7517_v10, %v7517_v10  ;;  %3408 = vmatpush.bf16.msra.mxu2 %v3397_v0  ;;  %v3528_v53 = vunpack.c.l.b16 %v3447_v27  ;;  %v3456_v60 = vpack.c.bf16 %v3279_v6, %v3279_v6  ;;  %v3291_v27 = vld [vmem:[%s8479_s18 + $0xe8] sm:$0xff] }
 0xdc9   : > { %v3370_v61 = vunpack.c.l.b16 %v3326_v46  ;;  %v3446_v46 = vpack.c.bf16 %v3269_v42, %v3269_v42  ;;  %v3505_v59 = vunpack.c.l.b16 %v3445_v11  ;;  %v3507_v0 = vpack.c.b16 %v3504_v21, %v3503_v32  ;;  %v3280_v42 = vld [vmem:[%s8479_s18 + $0x90] sm:$0xff]  ;;  %v3281_v11 = vld [vmem:[%s8479_s18 + $0x98] sm:$0xff] }
 0xdca   : > { %v3235_v38 = vpop.f32.mrf.mxu3  ;;  %v3299_v39 = vsel %vm912_vm0, %v3298_v37, 0.0  ;;  %v3422_v37 = vpack.c.b16 %v3419_v35, %v3418_v33  ;;  %v3529_v33 = vunpack.c.l.b16 %v3448_v28  ;;  %v3554_v35 = vunpack.c.l.b16 %v3452_v30 }
 0xdcb   : > { %3300 = vadd.xlane.f32.xlu2 %v3299_v39  ;;  %v3373_v16 = vpack.c.b16 %v3371_v63, %v3370_v61  ;;  %v3264_v38 = vld [vmem:[%s8479_s18 + $0x10] sm:$0xff]  ;;  %v3265_v39 = vld [vmem:[%s8479_s18 + $0x18] sm:$0xff]  ;;  %v3263_v61 = vld [vmem:[%s8479_s18 + $0x8] sm:$0xff]  ;;  %v3506_v63 = vunpack.c.l.b16 %v3446_v46  ;;  %v3457_v50 = vpack.c.bf16 %v3280_v42, %v3280_v42  ;;  %v3458_v52 = vpack.c.bf16 %v3281_v11, %v3281_v11 }
 0xdcc   : > { %3433 = vmatpush.bf16.msra.mxu3 %v3422_v37  ;;  %v3441_v36 = vpack.c.bf16 %v3264_v38, %v3264_v38  ;;  %v3442_v41 = vpack.c.bf16 %v3265_v39, %v3265_v39  ;;  %3542 = vmatpush.bf16.msrb.mxu2 %v3533_v14  ;;  %v2495_v38 = vmul.f32 %v7605_v62, %v2494_v20  ;;  %v3288_v46 = vld [vmem:[%s8479_s18 + $0xd0] sm:$0xff]  ;;  %v3283_v14 = vld [vmem:[%s8479_s18 + $0xa8] sm:$0xff] }
 0xdcd   : > { %3382 = vmatpush.bf16.msra.mxu1 %v3373_v16  ;;  %v3508_v13 = vpack.c.b16 %v3506_v63, %v3505_v59  ;;  %v3440_v16 = vpack.c.bf16 %v3263_v61, %v3263_v61  ;;  %v3532_v39 = vpack.c.b16 %v3529_v33, %v3528_v53  ;;  %v3465_v59 = vpack.c.bf16 %v3288_v46, %v3288_v46  ;;  %v3287_v20 = vld [vmem:[%s8479_s18 + $0xc8] sm:$0xff] }
 0xdce   : > { %v3477_v56 = vunpack.c.l.b16 %v3441_v36  ;;  %v3478_v58 = vunpack.c.l.b16 %v3442_v41  ;;  %v2496_v44 = vmul.f32 0.5, %v2495_v38  ;;  %v3466_v61 = vpack.c.bf16 %v3289_v47, %v3289_v47 }
 0xdcf   : > { %v3476_v24 = vunpack.c.l.b16 %v3440_v16  ;;  %v3580_v12 = vunpack.c.l.b16 %v3457_v50  ;;  %v3630_v17 = vunpack.c.l.b16 %v3465_v59  ;;  %v3460_v30 = vpack.c.bf16 %v3283_v14, %v3283_v14 }
 0xdd0   : > { %v3480_v5 = vpack.c.b16 %v3478_v58, %v3477_v56  ;;  %3567 = vmatpush.bf16.msrb.mxu3 %v3558_v57  ;;  %3543 = vmatpush.bf16.msrb.mxu2 %v3532_v39  ;;  %v3461_v56 = vpack.c.bf16 %v3284_v43, %v3284_v43  ;;  %v2497_v7 = vsub.f32 1.5, %v2496_v44  ;;  %v3631_v19 = vunpack.c.l.b16 %v3466_v61 }
 0xdd1   : > { %3383 = vmatpush.bf16.msra.mxu1 %v3372_v34  ;;  %v3479_v31 = vpack.c.b16 %v3476_v24, %v3475_v23  ;;  %v3553_v34 = vunpack.c.l.b16 %v3451_v29  ;;  %v3655_v24 = vunpack.c.l.b16 %v3469_v1  ;;  %v3464_v32 = vpack.c.bf16 %v3287_v20, %v3287_v20 }
 0xdd2   : > { %3492 = vmatpush.bf16.msrb.mxu0 %v3480_v5  ;;  %v3278_v5 = vld [vmem:[%s8479_s18 + $0x80] sm:$0xff]  ;;  %v3605_v15 = vunpack.c.l.b16 %v3461_v56  ;;  %v3467_v21 = vpack.c.bf16 %v3290_v22, %v3290_v22  ;;  %v2498_v53 = vmul.f32 %v7605_v62, %v2497_v7  ;;  %v3579_v39 = vunpack.c.l.b16 %v3456_v60 }
 0xdd3   : > { %v3557_v40 = vpack.c.b16 %v3554_v35, %v3553_v34  ;;  %v3455_v26 = vpack.c.bf16 %v3278_v5, %v3278_v5  ;;  %v3468_v35 = vpack.c.bf16 %v3291_v27, %v3291_v27  ;;  %v3604_v42 = vunpack.c.l.b16 %v3460_v30 }
 0xdd4   : > { %v3629_v43 = vunpack.c.l.b16 %v3464_v32  ;;  %v3653_v44 = vunpack.c.l.b16 %v3467_v21 }
 0xdd5   : > { %3517 = vmatpush.bf16.msrb.mxu1 %v3508_v13  ;;  %3568 = vmatpush.bf16.msrb.mxu3 %v3557_v40  ;;  %v3581_v13 = vunpack.c.l.b16 %v3458_v52  ;;  %v3578_v38 = vunpack.c.l.b16 %v3455_v26 }
 0xdd6   : > { %3493 = vmatpush.bf16.msrb.mxu0 %v3479_v31  ;;  %v3463_v31 = vpack.c.bf16 %v3286_v18, %v3286_v18 }
 0xdd7   : > { %v3583_v34 = vpack.c.b16 %v3581_v13, %v3580_v12  ;;  %v3582_v46 = vpack.c.b16 %v3579_v39, %v3578_v38 }
 0xdd8   : > { %v3628_v11 = vunpack.c.l.b16 %v3463_v31 }
 0xdd9   : > { %3518 = vmatpush.bf16.msrb.mxu1 %v3507_v0 }
 0xdda   : > { %v3632_v50 = vpack.c.b16 %v3629_v43, %v3628_v11 }
 0xe3e   : > { %v3301_v45 = vpop.xlane.xlu2 %3300 }
 0xe3f   : > { %v3302_v55 = vmul.f32 %v3301_v45, %v6725_v51  ;;  %v3285_v45 = vld [vmem:[%s8479_s18 + $0xb8] sm:$0xff] }
 0xe40   : > { %v3462_v58 = vpack.c.bf16 %v3285_v45, %v3285_v45  ;;  %v3654_v45 = vunpack.c.l.b16 %v3468_v35 }
 0xe41   : > { %v7607_v4 = vadd.f32 1e-06, %v3302_v55  ;;  %v3293_v55 = vld [vmem:[%s8479_s18 + $0xf8] sm:$0xff] }
 0xe42   : > { %v3470_v3 = vpack.c.bf16 %v3293_v55, %v3293_v55  ;;  %v3606_v16 = vunpack.c.l.b16 %v3462_v58  ;;  %v3657_v52 = vpack.c.b16 %v3654_v45, %v3653_v44 }
 0xe43   : > { %6347 = vrsqrt.f32 %v7607_v4  ;;  %vm3310_vm8 = vweird.f32 %v7607_v4 }
 0xe44   : > { %v3656_v28 = vunpack.c.l.b16 %v3470_v3  ;;  %v3608_v0 = vpack.c.b16 %v3606_v16, %v3605_v15 }
 0xe49   : > { %v6348_v37 = vpop.eup %6347 }
 0xe4a   : > { %v3305_v36 = vmul.f32 %v6348_v37, %v7607_v4  ;;  %vm3311_vm7 = vweird.f32 %v6348_v37  ;;  %v3282_v4 = vld [vmem:[%s8479_s18 + $0xa0] sm:$0xff] }
 0xe4b   : > { %vm7667_vm9 = vmor %vm3310_vm8, %vm3311_vm7  ;;  %v3459_v29 = vpack.c.bf16 %v3282_v4, %v3282_v4 }
 0xe4c   : > { %v3306_v41 = vmul.f32 %v6348_v37, %v3305_v36  ;;  %v3658_v36 = vpack.c.b16 %v3656_v28, %v3655_v24 }
 0xe4e   : > { %v3307_v48 = vmul.f32 0.5, %v3306_v41  ;;  %v3603_v41 = vunpack.c.l.b16 %v3459_v29 }
 0xe50   : > { %v3308_v63 = vsub.f32 1.5, %v3307_v48  ;;  %v3607_v47 = vpack.c.b16 %v3604_v42, %v3603_v41  ;;  %v2502_v48 = vsel %vm2501_vm13, %v7605_v62, %v2498_v53 }
 0xe51   : > { %v2503_v54 = vmul.f32 %v2502_v48, %v7476_v25 }
 0xe52   : > { %v3309_v8 = vmul.f32 %v6348_v37, %v3308_v63 }
 0xe53   : > { %v2508_v55 = vmul.f32 %v6278_v49, %v2503_v54 }
 0xe54   : > { %v3313_v23 = vsel %vm7667_vm9, %v6348_v37, %v3309_v8  ;;  %v3633_v37 = vpack.c.b16 %v3631_v19, %v3630_v17 }
 0xe55   : > { %v3314_v57 = vmul.f32 %v3313_v23, %v7517_v10  ;;  %v7706_v56 = vpack.c.bf16 %v2508_v55, %v2508_v55 }
 0xe57   : > { %v3318_v33 = vmul.f32 %v6279_v2, %v3314_v57 }
 0xe59   : > { %v3319_v40 = vpack.c.bf16 %v3318_v33, %v3318_v33 }
 0xe5b   : > { %6026 = vmatmul.msk.bf16.vlgmr.msra.gmra.mxu0 %vm912_vm0, %v3319_v40  ;;  %6027 = vmatmul.msk.bf16.vlgmr.msra.gmra.mxu1 %vm912_vm0, %v3319_v40 }
 0xe5c   : > { %6028 = vmatmul.msk.bf16.vlgmr.msra.gmra.mxu2 %vm912_vm0, %v3319_v40  ;;  %6029 = vmatmul.msk.bf16.vlgmr.msra.gmra.mxu3 %vm912_vm0, %v3319_v40 }
 0xe5d   : > { %3592 = vmatpush.bf16.msra.mxu0 %v3583_v34  ;;  %3617 = vmatpush.bf16.msra.mxu1 %v3608_v0 }
 0xe5e   : > { %3642 = vmatpush.bf16.msra.mxu2 %v3633_v37  ;;  %3667 = vmatpush.bf16.msra.mxu3 %v3658_v36  ;;  %v6411_v36 = vld [vmem:[%s6678_s9] ss:$0 sm:$0xff] }
 0xe61   : > { %3593 = vmatpush.bf16.msra.mxu0 %v3582_v46  ;;  %3618 = vmatpush.bf16.msra.mxu1 %v3607_v47 }
 0xe62   : > { %3643 = vmatpush.bf16.msra.mxu2 %v3632_v50  ;;  %3668 = vmatpush.bf16.msra.mxu3 %v3657_v52 }
 0xe6b   : > { %6030 = vmatmul.msk.bf16.vlgmr.msrb.gmra.mxu0 %vm912_vm0, %v7706_v56  ;;  %6031 = vmatmul.msk.bf16.vlgmr.msrb.gmra.mxu1 %vm912_vm0, %v7706_v56 }
 0xe6c   : > { %6032 = vmatmul.msk.bf16.vlgmr.msrb.gmra.mxu2 %vm912_vm0, %v7706_v56  ;;  %6033 = vmatmul.msk.bf16.vlgmr.msrb.gmra.mxu3 %vm912_vm0, %v7706_v56 }
 0xe7b   : > { %6034 = vmatmul.msk.bf16.vlgmr.msra.gmra.mxu0 %vm912_vm0, %v7706_v56  ;;  %6035 = vmatmul.msk.bf16.vlgmr.msra.gmra.mxu1 %vm912_vm0, %v7706_v56 }
 0xe7c   : > { %6036 = vmatmul.msk.bf16.vlgmr.msra.gmra.mxu2 %vm912_vm0, %v7706_v56  ;;  %6037 = vmatmul.msk.bf16.vlgmr.msra.gmra.mxu3 %vm912_vm0, %v7706_v56 }
 0xed8   : > { %v3360_v25 = vpop.f32.mrf.mxu0  ;;  %v3385_v62 = vpop.f32.mrf.mxu1 }
 0xed9   : > { %v3674_v17 = vpack.c.bf16 %v3360_v25, %v3360_v25  ;;  %v3675_v19 = vpack.c.bf16 %v3385_v62, %v3385_v62 }
 0xedf   : > { %v3410_v58 = vpop.f32.mrf.mxu2  ;;  %v3435_v59 = vpop.f32.mrf.mxu3 }
 0xee0   : > { %v3362_v61 = vpop.f32.mrf.mxu0  ;;  %v3387_v63 = vpop.f32.mrf.mxu1  ;;  %v3676_v24 = vpack.c.bf16 %v3410_v58, %v3410_v58  ;;  %v3677_v26 = vpack.c.bf16 %v3435_v59, %v3435_v59 }
 0xee7   : > { %v3412_v1 = vpop.f32.mrf.mxu2  ;;  %v3437_v2 = vpop.f32.mrf.mxu3 }
 0xee8   : > { %v3495_v3 = vpop.f32.mrf.mxu0  ;;  %v3520_v5 = vpop.f32.mrf.mxu1 }
 0xee9   : > { %v3678_v6 = vpack.c.bf16 %v3495_v3, %v3495_v3  ;;  %v3679_v7 = vpack.c.bf16 %v3520_v5, %v3520_v5 }
 0xeeb   : > { %v3686_v8 = vsel %vm1300_vm5, %v3678_v6, 0  ;;  %v3705_v9 = vsel %vm1300_vm5, %v3679_v7, 0 }
 0xeec   : > { %3695 = vmatpush.bf16.xpose.msrb.mxu0 %v3686_v8  ;;  %3714 = vmatpush.bf16.xpose.msrb.mxu1 %v3705_v9 }
 0xeef   : > { %v3545_v12 = vpop.f32.mrf.mxu2  ;;  %v3570_v13 = vpop.f32.mrf.mxu3 }
 0xef0   : > { %v3680_v4 = vpack.c.bf16 %v3545_v12, %v3545_v12  ;;  %v3681_v14 = vpack.c.bf16 %v3570_v13, %v3570_v13  ;;  %v3497_v15 = vpop.f32.mrf.mxu0  ;;  %v3522_v16 = vpop.f32.mrf.mxu1 }
 0xef2   : > { %v3724_v18 = vsel %vm1300_vm5, %v3680_v4, 0  ;;  %v3743_v20 = vsel %vm1300_vm5, %v3681_v14, 0 }
 0xef3   : > { %3733 = vmatpush.bf16.xpose.msrb.mxu2 %v3724_v18  ;;  %3752 = vmatpush.bf16.xpose.msrb.mxu3 %v3743_v20 }
 0xef4   : > { %6038 = vmatmul.msk.bf16.vlgmr.msrb.gmra.mxu0 %vm1300_vm5, %v3674_v17  ;;  %6039 = vmatmul.msk.bf16.vlgmr.msrb.gmra.mxu1 %vm1300_vm5, %v3675_v19 }
 0xef7   : > { %v3547_v22 = vpop.f32.mrf.mxu2  ;;  %v3572_v23 = vpop.f32.mrf.mxu3 }
 0xef8   : > { %v3595_v60 = vpop.f32.mrf.mxu0  ;;  %v3620_v27 = vpop.f32.mrf.mxu1 }
 0xef9   : > { %v3806_v57 = vpack.c.bf16 %v3595_v60, %v3595_v60  ;;  %v3807_v28 = vpack.c.bf16 %v3620_v27, %v3620_v27 }
 0xefa   : > { %6040 = vmatmul.msk.bf16.vlgmr.msrb.gmra.mxu2 %vm1300_vm5, %v3676_v24  ;;  %6041 = vmatmul.msk.bf16.vlgmr.msrb.gmra.mxu3 %vm1300_vm5, %v3677_v26 }
 0xefb   : > { %v3814_v29 = vsel %vm1432_vm6, %v3806_v57, 0  ;;  %v3833_v30 = vsel %vm1432_vm6, %v3807_v28, 0 }
 0xefc   : > { %3823 = vmatpush.bf16.msra.mxu0 %v3814_v29  ;;  %3842 = vmatpush.bf16.msra.mxu1 %v3833_v30 }
 0xeff   : > { %v3645_v31 = vpop.f32.mrf.mxu2  ;;  %v3670_v32 = vpop.f32.mrf.mxu3 }
 0xf00   : > { %v3808_v21 = vpack.c.bf16 %v3645_v31, %v3645_v31  ;;  %v3809_v53 = vpack.c.bf16 %v3670_v32, %v3670_v32  ;;  %v3597_v33 = vpop.f32.mrf.mxu0  ;;  %v3622_v34 = vpop.f32.mrf.mxu1 }
 0xf01   : > { %v3296_v34 = vld [vmem:[%s8480_s19 + $0x10] sm:$0xff] }
 0xf02   : > { %v3852_v35 = vsel %vm1432_vm6, %v3808_v21, 0  ;;  %v3871_v0 = vsel %vm1432_vm6, %v3809_v53, 0  ;;  %v3294_v21 = vld [vmem:[%s8480_s19] sm:$0xff] }
 0xf03   : > { %3861 = vmatpush.bf16.msra.mxu2 %v3852_v35  ;;  %3880 = vmatpush.bf16.msra.mxu3 %v3871_v0  ;;  %v3890_v53 = vpack.c.bf16 %v3294_v21, %v3294_v21  ;;  %v3297_v35 = vld [vmem:[%s8480_s19 + $0x18] sm:$0xff]  ;;  %v3892_v0 = vpack.c.bf16 %v3296_v34, %v3296_v34 }
 0xf05   : > { %v3898_v33 = vsel %vm1432_vm6, %v3890_v53, 0 }
 0xf06   : > { %3907 = vmatpush.bf16.msrb.mxu0 %v3898_v33 }
 0xf07   : > { %v3647_v37 = vpop.f32.mrf.mxu2  ;;  %v3672_v38 = vpop.f32.mrf.mxu3 }
 0xf08   : > { %v3893_v37 = vpack.c.bf16 %v3297_v35, %v3297_v35  ;;  %v3936_v38 = vsel %vm1432_vm6, %v3892_v0, 0  ;;  %v6280_v35 = vld [vmem:[%s8481_s20] ss:$0 sm:$0xff] }
 0xf09   : > { %3945 = vmatpush.bf16.msrb.mxu2 %v3936_v38 }
 0xf71   : > { %v3697_v39 = vpop.f32.mrf.mxu0  ;;  %v3716_v40 = vpop.f32.mrf.mxu1 }
 0xf72   : > { %v3698_v41 = vadd.f32 %v6411_v36, %v3697_v39  ;;  %v3717_v52 = vadd.f32 %v6411_v36, %v3716_v40  ;;  %v3955_v39 = vsel %vm1432_vm6, %v3893_v37, 0  ;;  %v3295_v40 = vld [vmem:[%s8480_s19 + $0x8] sm:$0xff] }
 0xf73   : > { %3964 = vmatpush.bf16.msrb.mxu3 %v3955_v39 }
 0xf74   : > { %v3758_v42 = vsel %vm1300_vm5, %v3698_v41, -inf  ;;  %v3761_v55 = vsel %vm1300_vm5, %v3717_v52, -inf }
 0xf75   : > { %3759 = vmax.xlane.f32.xlu0 %v3758_v42 }
 0xf79   : > { %v3699_v11 = vpop.f32.mrf.mxu0  ;;  %v3718_v43 = vpop.f32.mrf.mxu1 }
 0xf7d   : > { %v3735_v44 = vpop.f32.mrf.mxu2  ;;  %v3754_v45 = vpop.f32.mrf.mxu3 }
 0xf7e   : > { %v3736_v46 = vadd.f32 %v6411_v36, %v3735_v44  ;;  %v3755_v47 = vadd.f32 %v6411_v36, %v3754_v45  ;;  %v3891_v36 = vpack.c.bf16 %v3295_v40, %v3295_v40  ;;  %v3983_v40 = vld [vmem:[%s8483_s22] sm:$0xff] }
 0xf80   : > { %v3764_v48 = vsel %vm1300_vm5, %v3736_v46, -inf  ;;  %v3767_v50 = vsel %vm1300_vm5, %v3755_v47, -inf }
 0xf81   : > { %3765 = vmax.xlane.f32.xlu1 %v3764_v48  ;;  %3768 = vmax.xlane.f32.xlu2 %v3767_v50 }
 0xf85   : > { %v3737_v49 = vpop.f32.mrf.mxu2  ;;  %v3756_v54 = vpop.f32.mrf.mxu3 }
 0xf89   : > { %3762 = vmax.xlane.f32.xlu1 %v3761_v55 }
 0xfe8   : > { %v3760_v25 = vpop.xlane.xlu0 %3759 }
 0xfe9   : > { %v3770_v62 = vsub.f32 %v3698_v41, %v3760_v25  ;;  %v3917_v41 = vsel %vm1432_vm6, %v3891_v36, 0  ;;  %v3984_v36 = vld [vmem:[%s8483_s22 + $0x8] sm:$0xff] }
 0xfea   : > { %3926 = vmatpush.bf16.msrb.mxu1 %v3917_v41  ;;  %v4033_v41 = vpack.c.bf16 %v3984_v36, %v3983_v40 }
 0xfeb   : > { %v3774_v58 = vmul.f32 1.442695, %v3770_v62 }
 0xfed   : > { %6349 = vpow2.f32 %v3774_v58 }
 0xff3   : > { %v6350_v59 = vpop.eup %6349 }
 0xff4   : > { %v3766_v61 = vpop.xlane.xlu1 %3765  ;;  %v3769_v63 = vpop.xlane.xlu2 %3768  ;;  %v3782_v1 = vsel %vm1300_vm5, %v6350_v59, 0.0 }
 0xff5   : > { %v3772_v2 = vsub.f32 %v3736_v46, %v3766_v61  ;;  %v3773_v3 = vsub.f32 %v3755_v47, %v3769_v63  ;;  %3783 = vadd.xlane.f32.xlu1 %v3782_v1 }
 0xff7   : > { %v3778_v5 = vmul.f32 1.442695, %v3772_v2  ;;  %v3780_v6 = vmul.f32 1.442695, %v3773_v3 }
 0xff9   : > { %6351 = vpow2.f32 %v3778_v5 }
 0xffa   : > { %6353 = vpow2.f32 %v3780_v6 }
 0xffc   : > { %v3763_v7 = vpop.xlane.xlu1 %3762 }
 0xffd   : > { %v3771_v8 = vsub.f32 %v3717_v52, %v3763_v7 }
 0xfff   : > { %v6352_v9 = vpop.eup %6351  ;;  %v3776_v12 = vmul.f32 1.442695, %v3771_v8 }
0x1000   : > { %v6354_v13 = vpop.eup %6353  ;;  %v3788_v4 = vsel %vm1300_vm5, %v6352_v9, 0.0 }
0x1001   : > { %6355 = vpow2.f32 %v3776_v12  ;;  %3789 = vadd.xlane.f32.xlu2 %v3788_v4  ;;  %v3791_v14 = vsel %vm1300_vm5, %v6354_v13, 0.0 }
0x1002   : > { %3792 = vadd.xlane.f32.xlu0 %v3791_v14  ;;  %v3981_v14 = vld [vmem:[%s8482_s21 + $0x10] sm:$0xff] }
0x1007   : > { %v6356_v15 = vpop.eup %6355 }
0x1008   : > { %v3785_v16 = vsel %vm1300_vm5, %v6356_v15, 0.0 }
0x1009   : > { %3786 = vadd.xlane.f32.xlu2 %v3785_v16 }
0x1068   : > { %v3784_v17 = vpop.xlane.xlu1 %3783 }
0x1069   : > { %6357 = vrcp.f32 %v3784_v17  ;;  %v3980_v17 = vld [vmem:[%s8482_s21 + $0x8] sm:$0xff] }
0x106f   : > { %v6358_v19 = vpop.eup %6357 }
0x1070   : > { %v3798_v18 = vmul.f32 %v6358_v19, %v6350_v59 }
0x1072   : > { %v3802_v20 = vpack.c.bf16 %v3798_v18, %v3798_v18  ;;  %v3989_v18 = vld [vmem:[%s8483_s22 + $0x30] sm:$0xff] }
0x1074   : > { %6042 = vmatmul.msk.bf16.vlgmr.msra.gmra.mxu0 %vm1300_vm5, %v3802_v20  ;;  %v3790_v22 = vpop.xlane.xlu2 %3789  ;;  %v3990_v20 = vld [vmem:[%s8483_s22 + $0x38] sm:$0xff] }
0x1075   : > { %v3793_v23 = vpop.xlane.xlu0 %3792  ;;  %6359 = vrcp.f32 %v3790_v22  ;;  %v3987_v22 = vld [vmem:[%s8483_s22 + $0x20] sm:$0xff] }
0x1076   : > { %6361 = vrcp.f32 %v3793_v23  ;;  %v4036_v23 = vpack.c.bf16 %v3990_v20, %v3989_v18 }
0x107b   : > { %v6360_v24 = vpop.eup %6359 }
0x107c   : > { %v6362_v26 = vpop.eup %6361  ;;  %v3800_v60 = vmul.f32 %v6360_v24, %v6352_v9  ;;  %v3787_v27 = vpop.xlane.xlu2 %3786  ;;  %v3988_v24 = vld [vmem:[%s8483_s22 + $0x28] sm:$0xff] }
0x107d   : > { %v3801_v57 = vmul.f32 %v6362_v26, %v6354_v13  ;;  %6363 = vrcp.f32 %v3787_v27 }
0x107e   : > { %v3804_v28 = vpack.c.bf16 %v3800_v60, %v3800_v60  ;;  %v4035_v60 = vpack.c.bf16 %v3988_v24, %v3987_v22  ;;  %v6058_v22 = vld [vmem:[%s8475_s14 + $0x1a8] sm:$0xff] }
0x107f   : > { %v3805_v29 = vpack.c.bf16 %v3801_v57, %v3801_v57  ;;  %v3985_v57 = vld [vmem:[%s8483_s22 + $0x10] sm:$0xff]  ;;  %v6062_v24 = vld [vmem:[%s8475_s14 + $0x1c8] sm:$0xff] }
0x1080   : > { %6044 = vmatmul.msk.bf16.vlgmr.msra.gmra.mxu2 %vm1300_vm5, %v3804_v28  ;;  %v3986_v28 = vld [vmem:[%s8483_s22 + $0x18] sm:$0xff] }
0x1081   : > { %6045 = vmatmul.msk.bf16.vlgmr.msra.gmra.mxu3 %vm1300_vm5, %v3805_v29 }
0x1083   : > { %v6364_v30 = vpop.eup %6363 }
0x1084   : > { %v3799_v31 = vmul.f32 %v6364_v30, %v6356_v15  ;;  %v3982_v15 = vld [vmem:[%s8482_s21 + $0x18] sm:$0xff]  ;;  %v4034_v30 = vpack.c.bf16 %v3986_v28, %v3985_v57  ;;  %v6065_v28 = vld [vmem:[%s8475_s14 + $0x1e0] sm:$0xff] }
0x1085   : > { %v4014_v16 = vpack.c.bf16 %v3982_v15, %v3981_v14  ;;  %v6053_v15 = vld [vmem:[%s8475_s14 + $0x180] sm:$0xff] }
0x1086   : > { %v3803_v32 = vpack.c.bf16 %v3799_v31, %v3799_v31  ;;  %v4132_v18 = vpack.c.bf16 %v6053_v15, %v6053_v15 }
0x1087   : > { %4024 = vmatpush.bf16.msra.mxu0 %v4014_v16  ;;  %v6054_v16 = vld [vmem:[%s8475_s14 + $0x188] sm:$0xff] }
0x1088   : > { %6043 = vmatmul.msk.bf16.vlgmr.msra.gmra.mxu1 %vm1300_vm5, %v3803_v32  ;;  %v4133_v20 = vpack.c.bf16 %v6054_v16, %v6054_v16 }
0x1089   : > { %4044 = vmatpush.bf16.msra.mxu1 %v4036_v23  ;;  %v6061_v23 = vld [vmem:[%s8475_s14 + $0x1c0] sm:$0xff] }
0x108d   : > { %4045 = vmatpush.bf16.msra.mxu1 %v4035_v60 }
0x1091   : > { %4046 = vmatpush.bf16.msra.mxu1 %v4034_v30  ;;  %v4184_v30 = vunpack.c.l.b16 %v4132_v18 }
0x1095   : > { %4047 = vmatpush.bf16.msra.mxu1 %v4033_v41 }
0x10f1   : > { %v3825_v42 = vpop.f32.mrf.mxu0 }
0x10f2   : > { %v3886_v11 = vpack.c.bf16 %v3825_v42, %v3825_v42 }
0x10f4   : > { %6046 = vmatmul.msk.bf16.vlgmr.msrb.gmra.mxu0 %vm1300_vm5, %v3886_v11 }
0x10f9   : > { %v3827_v43 = vpop.f32.mrf.mxu0 }
0x1103   : > { %v3863_v44 = vpop.f32.mrf.mxu2 }
0x1104   : > { %v3888_v45 = vpack.c.bf16 %v3863_v44, %v3863_v44  ;;  %v3882_v46 = vpop.f32.mrf.mxu3 }
0x1105   : > { %v3889_v47 = vpack.c.bf16 %v3882_v46, %v3882_v46  ;;  %v3844_v48 = vpop.f32.mrf.mxu1 }
0x1106   : > { %v3887_v50 = vpack.c.bf16 %v3844_v48, %v3844_v48  ;;  %6048 = vmatmul.msk.bf16.vlgmr.msrb.gmra.mxu2 %vm1300_vm5, %v3888_v45 }
0x1107   : > { %6049 = vmatmul.msk.bf16.vlgmr.msrb.gmra.mxu3 %vm1300_vm5, %v3889_v47 }
0x1108   : > { %6047 = vmatmul.msk.bf16.vlgmr.msrb.gmra.mxu1 %vm1300_vm5, %v3887_v50 }
0x110b   : > { %v3865_v52 = vpop.f32.mrf.mxu2 }
0x110c   : > { %v3884_v49 = vpop.f32.mrf.mxu3  ;;  %v6055_v52 = vld [vmem:[%s8475_s14 + $0x190] sm:$0xff] }
0x110d   : > { %v3846_v54 = vpop.f32.mrf.mxu1  ;;  %v6056_v49 = vld [vmem:[%s8475_s14 + $0x198] sm:$0xff] }
0x110e   : > { %v6059_v54 = vld [vmem:[%s8475_s14 + $0x1b0] sm:$0xff] }
0x1171   : > { %v3909_v55 = vpop.f32.mrf.mxu0 }
0x1172   : > { %v3970_v59 = vsel %vm912_vm0, %v3909_v55, 0.0  ;;  %v4134_v55 = vpack.c.bf16 %v6055_v52, %v6055_v52  ;;  %v6076_v52 = vld [vmem:[%s8475_s14 + $0x238] sm:$0xff] }
0x1179   : > { %v3911_v25 = vpop.f32.mrf.mxu0 }
0x117a   : > { %v4135_v25 = vpack.c.bf16 %v6056_v49, %v6056_v49 }
0x1185   : > { %v3928_v62 = vpop.f32.mrf.mxu1 }
0x1186   : > { %v3971_v58 = vsel %vm912_vm0, %v3928_v62, 0.0  ;;  %v6060_v62 = vld [vmem:[%s8475_s14 + $0x1b8] sm:$0xff] }
0x1187   : > { %v3972_v61 = vadd.f32 %v3971_v58, %v3970_v59  ;;  %v4138_v58 = vpack.c.bf16 %v6059_v54, %v6059_v54  ;;  %v6063_v59 = vld [vmem:[%s8475_s14 + $0x1d0] sm:$0xff] }
0x1188   : > { %v6079_v54 = vld [vmem:[%s8475_s14 + $0x250] sm:$0xff] }
0x1189   : > { %v3947_v63 = vpop.f32.mrf.mxu2 }
0x118a   : > { %v3973_v1 = vsel %vm912_vm0, %v3947_v63, 0.0  ;;  %v3966_v2 = vpop.f32.mrf.mxu3  ;;  %v4139_v63 = vpack.c.bf16 %v6060_v62, %v6060_v62  ;;  %v4155_v62 = vpack.c.bf16 %v6076_v52, %v6076_v52  ;;  %v6095_v52 = vld [vmem:[%s8475_s14 + $0x2d0] sm:$0xff] }
0x118b   : > { %v3974_v3 = vadd.f32 %v3973_v1, %v3972_v61  ;;  %v3975_v5 = vsel %vm912_vm0, %v3966_v2, 0.0  ;;  %v6064_v61 = vld [vmem:[%s8475_s14 + $0x1d8] sm:$0xff]  ;;  %v4142_v1 = vpack.c.bf16 %v6063_v59, %v6063_v59 }
0x118c   : > { %v4143_v2 = vpack.c.bf16 %v6064_v61, %v6064_v61  ;;  %v6083_v61 = vld [vmem:[%s8475_s14 + $0x270] sm:$0xff] }
0x118d   : > { %v3976_v6 = vadd.f32 %v3975_v5, %v3974_v3  ;;  %v3930_v7 = vpop.f32.mrf.mxu1  ;;  %v6067_v3 = vld [vmem:[%s8475_s14 + $0x1f0] sm:$0xff]  ;;  %v6068_v5 = vld [vmem:[%s8475_s14 + $0x1f8] sm:$0xff] }
0x118e   : > { %v4187_v7 = vunpack.c.l.b16 %v4135_v25  ;;  %v4147_v14 = vpack.c.bf16 %v6068_v5, %v6068_v5 }
0x118f   : > { %v3977_v8 = vadd.f32 %v3976_v6, %v7517_v10  ;;  %v3979_v10 = vld [vmem:[%s8482_s21] sm:$0xff]  ;;  %v4186_v6 = vunpack.c.l.b16 %v4134_v55  ;;  %v6080_v55 = vld [vmem:[%s8475_s14 + $0x258] sm:$0xff] }
0x1190   : > { %v4013_v19 = vpack.c.bf16 %v3980_v17, %v3979_v10  ;;  %v6057_v10 = vld [vmem:[%s8475_s14 + $0x1a0] sm:$0xff]  ;;  %v4159_v59 = vpack.c.bf16 %v6080_v55, %v6080_v55 }
0x1191   : > { %v3949_v9 = vpop.f32.mrf.mxu2  ;;  %v3991_v12 = vmul.f32 %v3977_v8, %v3977_v8  ;;  %v4189_v17 = vpack.c.b16 %v4187_v7, %v4186_v6  ;;  %v4136_v57 = vpack.c.bf16 %v6057_v10, %v6057_v10  ;;  %v6070_v7 = vld [vmem:[%s8475_s14 + $0x208] sm:$0xff]  ;;  %v6073_v10 = vld [vmem:[%s8475_s14 + $0x220] sm:$0xff] }
0x1192   : > { %v3968_v13 = vpop.f32.mrf.mxu3  ;;  %4025 = vmatpush.bf16.msra.mxu0 %v4013_v19  ;;  %v4146_v9 = vpack.c.bf16 %v6067_v3, %v6067_v3 }
0x1193   : > { %v3992_v4 = vsel %vm912_vm0, %v3991_v12, 0.0  ;;  %v4215_v12 = vunpack.c.l.b16 %v4139_v63  ;;  %v4239_v13 = vunpack.c.l.b16 %v4142_v1  ;;  %4201 = vmatpush.bf16.msra.mxu2 %v4189_v17  ;;  %v6084_v63 = vld [vmem:[%s8475_s14 + $0x278] sm:$0xff]  ;;  %v6069_v1 = vld [vmem:[%s8475_s14 + $0x200] sm:$0xff]  ;;  %v6074_v17 = vld [vmem:[%s8475_s14 + $0x228] sm:$0xff] }
0x1194   : > { %3993 = vadd.xlane.f32.xlu0 %v3992_v4  ;;  %v4240_v4 = vunpack.c.l.b16 %v4143_v2  ;;  %v4264_v19 = vunpack.c.l.b16 %v4146_v9  ;;  %v4163_v15 = vpack.c.bf16 %v6084_v63, %v6084_v63  ;;  %v4148_v16 = vpack.c.bf16 %v6069_v1, %v6069_v1 }
0x1195   : > { %v4174_v63 = vpack.c.bf16 %v6095_v52, %v6095_v52 }
0x1196   : > { %v4242_v60 = vpack.c.b16 %v4240_v4, %v4239_v13  ;;  %v4162_v13 = vpack.c.bf16 %v6083_v61, %v6083_v61 }
0x1198   : > { %4251 = vmatpush.bf16.msrb.mxu0 %v4242_v60  ;;  %v6082_v60 = vld [vmem:[%s8475_s14 + $0x268] sm:$0xff] }
0x1207   : > { %v3994_v26 = vpop.xlane.xlu0 %3993 }
0x1208   : > { %v3995_v27 = vmul.f32 %v3994_v26, %v6725_v51 }
0x120a   : > { %v3996_v29 = vadd.f32 1e-06, %v3995_v27  ;;  %v4265_v27 = vunpack.c.l.b16 %v4147_v14 }
0x120c   : > { %6365 = vrsqrt.f32 %v3996_v29  ;;  %vm4003_vm15 = vweird.f32 %v3996_v29 }
0x1212   : > { %v6366_v31 = vpop.eup %6365 }
0x1213   : > { %v3998_v32 = vmul.f32 %v6366_v31, %v3996_v29  ;;  %vm4004_vm14 = vweird.f32 %v6366_v31  ;;  %v6066_v29 = vld [vmem:[%s8475_s14 + $0x1e8] sm:$0xff] }
0x1214   : > { %vm4005_vm1 = vmor %vm4003_vm15, %vm4004_vm14  ;;  %vm5712_vm15 = vcmask 7168  }
0x1215   : > { %v3999_v21 = vmul.f32 %v6366_v31, %v3998_v32  ;;  %v4137_v32 = vpack.c.bf16 %v6058_v22, %v6058_v22  ;;  %v4364_v22 = vunpack.c.l.b16 %v4162_v13 }
0x1217   : > { %v4000_v53 = vmul.f32 0.5, %v3999_v21  ;;  %v4140_v21 = vpack.c.bf16 %v6061_v23, %v6061_v23  ;;  %v4149_v23 = vpack.c.bf16 %v6070_v7, %v6070_v7  ;;  %v6085_v7 = vld [vmem:[%s8475_s14 + $0x280] sm:$0xff] }
0x1219   : > { %v4001_v33 = vsub.f32 1.5, %v4000_v53  ;;  %v4267_v53 = vpack.c.b16 %v4265_v27, %v4264_v19  ;;  %v6077_v19 = vld [vmem:[%s8475_s14 + $0x240] sm:$0xff]  ;;  %v4365_v27 = vunpack.c.l.b16 %v4163_v15  ;;  %v6090_v15 = vld [vmem:[%s8475_s14 + $0x2a8] sm:$0xff] }
0x121b   : > { %v4002_v34 = vmul.f32 %v6366_v31, %v4001_v33  ;;  %v4212_v33 = vunpack.c.l.b16 %v4136_v57  ;;  %4276 = vmatpush.bf16.msrb.mxu1 %v4267_v53  ;;  %v4287_v57 = vunpack.c.l.b16 %v4148_v16 }
0x121d   : > { %v4006_v0 = vsel %vm4005_vm1, %v6366_v31, %v4002_v34  ;;  %v4185_v31 = vunpack.c.l.b16 %v4133_v20  ;;  %v4141_v34 = vpack.c.bf16 %v6062_v24, %v6062_v24  ;;  %v6078_v24 = vld [vmem:[%s8475_s14 + $0x248] sm:$0xff] }
0x121e   : > { %v4007_v37 = vmul.f32 %v4006_v0, %v3977_v8 }
0x121f   : > { %v4188_v0 = vpack.c.b16 %v4185_v31, %v4184_v30  ;;  %v4238_v40 = vunpack.c.l.b16 %v4141_v34  ;;  %v4153_v30 = vpack.c.bf16 %v6074_v17, %v6074_v17  ;;  %v4156_v31 = vpack.c.bf16 %v6077_v19, %v6077_v19 }
0x1220   : > { %v4011_v38 = vmul.f32 %v6280_v35, %v4007_v37  ;;  %v4144_v35 = vpack.c.bf16 %v6065_v28, %v6065_v28  ;;  %v4213_v37 = vunpack.c.l.b16 %v4137_v32  ;;  %v4288_v28 = vunpack.c.l.b16 %v4149_v23 }
0x1221   : > { %4202 = vmatpush.bf16.msra.mxu2 %v4188_v0  ;;  %v4367_v32 = vpack.c.b16 %v4365_v27, %v4364_v22  ;;  %v4313_v0 = vunpack.c.l.b16 %v4153_v30  ;;  %v4439_v17 = vunpack.c.l.b16 %v4174_v63  ;;  %v6097_v22 = vld [vmem:[%s8475_s14 + $0x2e0] sm:$0xff]  ;;  %v6098_v27 = vld [vmem:[%s8475_s14 + $0x2e8] sm:$0xff]  ;;  %v4169_v30 = vpack.c.bf16 %v6090_v15, %v6090_v15 }
0x1222   : > { %v4012_v39 = vpack.c.bf16 %v4011_v38, %v4011_v38  ;;  %v4237_v38 = vunpack.c.l.b16 %v4140_v21  ;;  %v4262_v36 = vunpack.c.l.b16 %v4144_v35  ;;  %v4216_v41 = vpack.c.b16 %v4213_v37, %v4212_v33 }
0x1223   : > { %v4157_v21 = vpack.c.bf16 %v6078_v24, %v6078_v24  ;;  %v4161_v33 = vpack.c.bf16 %v6082_v60, %v6082_v60  ;;  %v4291_v34 = vpack.c.b16 %v4288_v28, %v4287_v57  ;;  %v4337_v37 = vunpack.c.l.b16 %v4156_v31 }
0x1224   : > { %6050 = vmatmul.msk.bf16.vlgmr.msra.gmra.mxu0 %vm912_vm0, %v4012_v39  ;;  %v4145_v39 = vpack.c.bf16 %v6066_v29, %v6066_v29  ;;  %v4152_v29 = vpack.c.bf16 %v6073_v10, %v6073_v10 }
0x1226   : > { %v4312_v35 = vunpack.c.l.b16 %v4152_v29 }
0x12a1   : > { %v4027_v42 = vpop.f32.mrf.mxu0 }
0x12a2   : > { %v4031_v11 = vmax.f32 %v4027_v42, 0.0  ;;  %v4263_v42 = vunpack.c.l.b16 %v4145_v39 }
0x12a4   : > { %v4032_v43 = vpack.c.bf16 %v4031_v11, %v4031_v11  ;;  %v4241_v11 = vpack.c.b16 %v4238_v40, %v4237_v38  ;;  %v4338_v38 = vunpack.c.l.b16 %v4157_v21  ;;  %v4363_v40 = vunpack.c.l.b16 %v4161_v33 }
0x12a5   : > { %v4176_v21 = vpack.c.bf16 %v6097_v22, %v6097_v22 }
0x12a6   : > { %6051 = vmatmul.msk.bf16.vlgmr.msra.gmra.mxu1 %vm1657_vm10, %v4032_v43  ;;  %v4266_v43 = vpack.c.b16 %v4263_v42, %v4262_v36  ;;  %4252 = vmatpush.bf16.msrb.mxu0 %v4241_v11  ;;  %v4316_v36 = vpack.c.b16 %v4313_v0, %v4312_v35  ;;  %v4341_v42 = vpack.c.b16 %v4338_v38, %v4337_v37 }
0x12a8   : > { %4277 = vmatpush.bf16.msrb.mxu1 %v4266_v43 }
0x12a9   : > { %v4029_v44 = vpop.f32.mrf.mxu0 }
0x12aa   : > { %v6071_v44 = vld [vmem:[%s8475_s14 + $0x210] sm:$0xff] }
0x12ac   : > { %4376 = vmatpush.bf16.msra.mxu1 %v4367_v32 }
0x1323   : > { %v4049_v45 = vpop.f32.mrf.mxu1 }
0x1324   : > { %v7817_v46 = vadd.f32 %v4049_v45, %v3977_v8  ;;  %v4214_v8 = vunpack.c.l.b16 %v4138_v58  ;;  %v6072_v45 = vld [vmem:[%s8475_s14 + $0x218] sm:$0xff]  ;;  %v4158_v58 = vpack.c.bf16 %v6079_v54, %v6079_v54 }
0x1326   : > { %v4110_v47 = vmul.f32 %v7817_v46, %v7817_v46  ;;  %v4217_v26 = vpack.c.b16 %v4215_v12, %v4214_v8  ;;  %v4315_v8 = vunpack.c.l.b16 %v4155_v62  ;;  %v4339_v9 = vunpack.c.l.b16 %v4158_v58  ;;  %v6099_v62 = vld [vmem:[%s8475_s14 + $0x2f0] sm:$0xff]  ;;  %v6100_v58 = vld [vmem:[%s8475_s14 + $0x2f8] sm:$0xff] }
0x1327   : > { %v4340_v12 = vunpack.c.l.b16 %v4159_v59 }
0x1328   : > { %v4111_v48 = vsel %vm912_vm0, %v4110_v47, 0.0  ;;  %4226 = vmatpush.bf16.msra.mxu3 %v4217_v26  ;;  %v6075_v47 = vld [vmem:[%s8475_s14 + $0x230] sm:$0xff]  ;;  %v6081_v26 = vld [vmem:[%s8475_s14 + $0x260] sm:$0xff] }
0x1329   : > { %4112 = vadd.xlane.f32.xlu1 %v4111_v48  ;;  %v4150_v48 = vpack.c.bf16 %v6071_v44, %v6071_v44  ;;  %v4154_v49 = vpack.c.bf16 %v6075_v47, %v6075_v47  ;;  %v4342_v20 = vpack.c.b16 %v4340_v12, %v4339_v9  ;;  %v4160_v53 = vpack.c.bf16 %v6081_v26, %v6081_v26  ;;  %v6088_v47 = vld [vmem:[%s8475_s14 + $0x298] sm:$0xff] }
0x132a   : > { %v4164_v26 = vpack.c.bf16 %v6085_v7, %v6085_v7 }
0x132b   : > { %v4051_v50 = vpop.f32.mrf.mxu1  ;;  %v4289_v3 = vunpack.c.l.b16 %v4150_v48  ;;  %v4314_v6 = vunpack.c.l.b16 %v4154_v49  ;;  %4351 = vmatpush.bf16.msra.mxu0 %v4342_v20  ;;  %v4362_v39 = vunpack.c.l.b16 %v4160_v53  ;;  %v6091_v48 = vld [vmem:[%s8475_s14 + $0x2b0] sm:$0xff]  ;;  %v6096_v49 = vld [vmem:[%s8475_s14 + $0x2d8] sm:$0xff]  ;;  %v6094_v20 = vld [vmem:[%s8475_s14 + $0x2c8] sm:$0xff] }
0x132c   : > { %4227 = vmatpush.bf16.msra.mxu3 %v4216_v41  ;;  %v4151_v50 = vpack.c.bf16 %v6072_v45, %v6072_v45  ;;  %v6087_v45 = vld [vmem:[%s8475_s14 + $0x290] sm:$0xff]  ;;  %v4170_v59 = vpack.c.bf16 %v6091_v48, %v6091_v48  ;;  %v4175_v1 = vpack.c.bf16 %v6096_v49, %v6096_v49  ;;  %v4173_v32 = vpack.c.bf16 %v6094_v20, %v6094_v20 }
0x132d   : > { %v4317_v18 = vpack.c.b16 %v4315_v8, %v4314_v6  ;;  %v4366_v11 = vpack.c.b16 %v4363_v40, %v4362_v39  ;;  %v4166_v55 = vpack.c.bf16 %v6087_v45, %v6087_v45  ;;  %v4179_v6 = vpack.c.bf16 %v6100_v58, %v6100_v58  ;;  %v6086_v8 = vld [vmem:[%s8475_s14 + $0x288] sm:$0xff] }
0x132e   : > { %v4290_v5 = vunpack.c.l.b16 %v4151_v50  ;;  %v6092_v50 = vld [vmem:[%s8475_s14 + $0x2b8] sm:$0xff]  ;;  %v4414_v16 = vunpack.c.l.b16 %v4170_v59  ;;  %v4440_v19 = vunpack.c.l.b16 %v4175_v1  ;;  %v4165_v60 = vpack.c.bf16 %v6086_v8, %v6086_v8 }
0x132f   : > { %4352 = vmatpush.bf16.msra.mxu0 %v4341_v42  ;;  %4377 = vmatpush.bf16.msra.mxu1 %v4366_v11  ;;  %v4171_v61 = vpack.c.bf16 %v6092_v50, %v6092_v50  ;;  %v4389_v13 = vunpack.c.l.b16 %v4166_v55  ;;  %v4465_v28 = vunpack.c.l.b16 %v4179_v6  ;;  %v4387_v37 = vunpack.c.l.b16 %v4164_v26 }
0x1330   : > { %v4292_v14 = vpack.c.b16 %v4290_v5, %v4289_v3  ;;  %4326 = vmatpush.bf16.msrb.mxu3 %v4317_v18  ;;  %v4178_v3 = vpack.c.bf16 %v6099_v62, %v6099_v62  ;;  %v6281_v5 = vld [vmem:[%s8474_s13 + $0x1] ss:$0 sm:$0xff]  ;;  %v4442_v0 = vpack.c.b16 %v4440_v19, %v4439_v17  ;;  %v4388_v38 = vunpack.c.l.b16 %v4165_v60 }
0x1331   : > { %v4415_v10 = vunpack.c.l.b16 %v4171_v61  ;;  %v6093_v18 = vld [vmem:[%s8475_s14 + $0x2c0] sm:$0xff]  ;;  %v4438_v11 = vunpack.c.l.b16 %v4173_v32 }
0x1332   : > { %4301 = vmatpush.bf16.msrb.mxu2 %v4292_v14  ;;  %v4464_v24 = vunpack.c.l.b16 %v4178_v3  ;;  %v4172_v31 = vpack.c.bf16 %v6093_v18, %v6093_v18  ;;  %v4391_v45 = vpack.c.b16 %v4388_v38, %v4387_v37 }
0x1333   : > { %v4417_v35 = vpack.c.b16 %v4415_v10, %v4414_v16 }
0x1334   : > { %4327 = vmatpush.bf16.msrb.mxu3 %v4316_v36  ;;  %v4467_v40 = vpack.c.b16 %v4465_v28, %v4464_v24  ;;  %v4437_v42 = vunpack.c.l.b16 %v4172_v31 }
0x1336   : > { %4302 = vmatpush.bf16.msrb.mxu2 %v4291_v34  ;;  %v4177_v34 = vpack.c.bf16 %v6098_v27, %v6098_v27  ;;  %v4441_v48 = vpack.c.b16 %v4438_v11, %v4437_v42  ;;  %v6413_v42 = vld [vmem:[%s8554_s24] sm:$0xff] }
0x139c   : > { %v4113_v25 = vpop.xlane.xlu1 %4112 }
0x139d   : > { %v4114_v2 = vmul.f32 %v4113_v25, %v6725_v51  ;;  %v4167_v25 = vpack.c.bf16 %v6088_v47, %v6088_v47 }
0x139f   : > { %v7901_v4 = vadd.f32 1e-06, %v4114_v2  ;;  %v4390_v14 = vunpack.c.l.b16 %v4167_v25 }
0x13a1   : > { %6367 = vrsqrt.f32 %v7901_v4  ;;  %vm4122_vm3 = vweird.f32 %v7901_v4  ;;  %v4392_v33 = vpack.c.b16 %v4390_v14, %v4389_v13 }
0x13a7   : > { %v6368_v41 = vpop.eup %6367 }
0x13a8   : > { %v4117_v43 = vmul.f32 %v6368_v41, %v7901_v4  ;;  %vm4123_vm2 = vweird.f32 %v6368_v41  ;;  %v6089_v4 = vld [vmem:[%s8475_s14 + $0x2a0] sm:$0xff] }
0x13a9   : > { %vm7958_vm4 = vmor %vm4122_vm3, %vm4123_vm2  ;;  %v4168_v29 = vpack.c.bf16 %v6089_v4, %v6089_v4 }
0x13aa   : > { %v4118_v44 = vmul.f32 %v6368_v41, %v4117_v43  ;;  %v4462_v43 = vunpack.c.l.b16 %v4176_v21 }
0x13ab   : > { %v4412_v36 = vunpack.c.l.b16 %v4168_v29 }
0x13ac   : > { %v4119_v54 = vmul.f32 0.5, %v4118_v44  ;;  %v4463_v44 = vunpack.c.l.b16 %v4177_v34 }
0x13ae   : > { %v4120_v2 = vsub.f32 1.5, %v4119_v54  ;;  %v4466_v50 = vpack.c.b16 %v4463_v44, %v4462_v43  ;;  %v6414_v43 = vld [vmem:[%s8554_s24 + $0x8] sm:$0xff] }
0x13b0   : > { %v4121_v9 = vmul.f32 %v6368_v41, %v4120_v2 }
0x13b2   : > { %v4125_v23 = vsel %vm7958_vm4, %v6368_v41, %v4121_v9  ;;  %v4413_v41 = vunpack.c.l.b16 %v4169_v30 }
0x13b3   : > { %v4126_v57 = vmul.f32 %v4125_v23, %v7817_v46 }
0x13b4   : > { %v4416_v47 = vpack.c.b16 %v4413_v41, %v4412_v36 }
0x13b5   : > { %v4130_v53 = vmul.f32 %v6281_v5, %v4126_v57 }
0x13b7   : > { %v4131_v39 = vpack.c.bf16 %v4130_v53, %v4130_v53 }
0x13b9   : > { %6105 = vmatmul.msk.bf16.vlgmr.msra.gmra.mxu2 %vm912_vm0, %v4131_v39  ;;  %6106 = vmatmul.msk.bf16.vlgmr.msra.gmra.mxu3 %vm912_vm0, %v4131_v39 }
0x13ba   : > { %6107 = vmatmul.msk.bf16.vlgmr.msrb.gmra.mxu0 %vm912_vm0, %v4131_v39  ;;  %6108 = vmatmul.msk.bf16.vlgmr.msrb.gmra.mxu1 %vm912_vm0, %v4131_v39 }
0x13bb   : > { %4401 = vmatpush.bf16.msra.mxu2 %v4392_v33  ;;  %4426 = vmatpush.bf16.msra.mxu3 %v4417_v35 }
0x13bc   : > { %4451 = vmatpush.bf16.msrb.mxu0 %v4442_v0  ;;  %4476 = vmatpush.bf16.msrb.mxu1 %v4467_v40  ;;  %v6412_v0 = vld [vmem:[%s8554_s24 + $0x10] sm:$0xff] }
0x13bf   : > { %4402 = vmatpush.bf16.msra.mxu2 %v4391_v45  ;;  %4427 = vmatpush.bf16.msra.mxu3 %v4416_v47 }
0x13c0   : > { %4452 = vmatpush.bf16.msrb.mxu0 %v4441_v48  ;;  %4477 = vmatpush.bf16.msrb.mxu1 %v4466_v50  ;;  %v6415_v48 = vld [vmem:[%s8554_s24 + $0x18] sm:$0xff] }
0x13c9   : > { %6109 = vmatmul.msk.bf16.vlgmr.msrb.gmra.mxu2 %vm912_vm0, %v4131_v39  ;;  %6110 = vmatmul.msk.bf16.vlgmr.msrb.gmra.mxu3 %vm912_vm0, %v4131_v39 }
0x13ca   : > { %6111 = vmatmul.msk.bf16.vlgmr.msra.gmra.mxu0 %vm912_vm0, %v4131_v39  ;;  %6112 = vmatmul.msk.bf16.vlgmr.msra.gmra.mxu1 %vm912_vm0, %v4131_v39 }
0x13d9   : > { %6113 = vmatmul.msk.bf16.vlgmr.msra.gmra.mxu2 %vm912_vm0, %v4131_v39  ;;  %6114 = vmatmul.msk.bf16.vlgmr.msra.gmra.mxu3 %vm912_vm0, %v4131_v39 }
0x13da   : > { %6115 = vmatmul.msk.bf16.vlgmr.msrb.gmra.mxu0 %vm912_vm0, %v4131_v39  ;;  %6116 = vmatmul.msk.bf16.vlgmr.msrb.gmra.mxu1 %vm912_vm0, %v4131_v39 }
0x1437   : > { %v4254_v52 = vpop.f32.mrf.mxu0  ;;  %v4279_v49 = vpop.f32.mrf.mxu1 }
0x1438   : > { %v4485_v15 = vpack.c.bf16 %v4254_v52, %v4254_v52  ;;  %v4486_v16 = vpack.c.bf16 %v4279_v49, %v4279_v49 }
0x143c   : > { %v4204_v54 = vpop.f32.mrf.mxu2  ;;  %v4229_v55 = vpop.f32.mrf.mxu3 }
0x143d   : > { %v4483_v19 = vpack.c.bf16 %v4204_v54, %v4204_v54  ;;  %v4484_v18 = vpack.c.bf16 %v4229_v55, %v4229_v55 }
0x143f   : > { %v4256_v25 = vpop.f32.mrf.mxu0  ;;  %v4281_v62 = vpop.f32.mrf.mxu1 }
0x1444   : > { %v4206_v58 = vpop.f32.mrf.mxu2  ;;  %v4231_v59 = vpop.f32.mrf.mxu3 }
0x1447   : > { %v4354_v61 = vpop.f32.mrf.mxu0  ;;  %v4379_v63 = vpop.f32.mrf.mxu1 }
0x1448   : > { %v4489_v1 = vpack.c.bf16 %v4354_v61, %v4354_v61  ;;  %v4490_v2 = vpack.c.bf16 %v4379_v63, %v4379_v63 }
0x144a   : > { %v4533_v3 = vsel %vm1300_vm5, %v4489_v1, 0  ;;  %v4552_v5 = vsel %vm1300_vm5, %v4490_v2, 0 }
0x144b   : > { %4542 = vmatpush.bf16.xpose.msra.mxu0 %v4533_v3  ;;  %4561 = vmatpush.bf16.xpose.msra.mxu1 %v4552_v5 }
0x144c   : > { %v4304_v6 = vpop.f32.mrf.mxu2  ;;  %v4329_v7 = vpop.f32.mrf.mxu3 }
0x144d   : > { %v4487_v8 = vpack.c.bf16 %v4304_v6, %v4304_v6  ;;  %v4488_v9 = vpack.c.bf16 %v4329_v7, %v4329_v7 }
0x144f   : > { %v4495_v12 = vsel %vm1300_vm5, %v4487_v8, 0  ;;  %v4514_v13 = vsel %vm1300_vm5, %v4488_v9, 0  ;;  %v4356_v14 = vpop.f32.mrf.mxu0  ;;  %v4381_v4 = vpop.f32.mrf.mxu1 }
0x1450   : > { %4504 = vmatpush.bf16.xpose.msrb.mxu2 %v4495_v12  ;;  %4523 = vmatpush.bf16.xpose.msrb.mxu3 %v4514_v13 }
0x1452   : > { %6119 = vmatmul.msk.bf16.vlgmr.msra.gmra.mxu0 %vm1300_vm5, %v4485_v15  ;;  %6120 = vmatmul.msk.bf16.vlgmr.msra.gmra.mxu1 %vm1300_vm5, %v4486_v16 }
0x1454   : > { %v4306_v10 = vpop.f32.mrf.mxu2  ;;  %v4331_v17 = vpop.f32.mrf.mxu3 }
0x1457   : > { %v4454_v20 = vpop.f32.mrf.mxu0  ;;  %v4479_v22 = vpop.f32.mrf.mxu1  ;;  %6117 = vmatmul.msk.bf16.vlgmr.msrb.gmra.mxu2 %vm1300_vm5, %v4483_v19  ;;  %6118 = vmatmul.msk.bf16.vlgmr.msrb.gmra.mxu3 %vm1300_vm5, %v4484_v18 }
0x1458   : > { %v4617_v23 = vpack.c.bf16 %v4454_v20, %v4454_v20  ;;  %v4618_v24 = vpack.c.bf16 %v4479_v22, %v4479_v22 }
0x145a   : > { %v4661_v26 = vsel %vm1432_vm6, %v4617_v23, 0  ;;  %v4680_v60 = vsel %vm1432_vm6, %v4618_v24, 0 }
0x145b   : > { %4670 = vmatpush.bf16.msrb.mxu0 %v4661_v26  ;;  %4689 = vmatpush.bf16.msrb.mxu1 %v4680_v60 }
0x145c   : > { %v4404_v27 = vpop.f32.mrf.mxu2  ;;  %v4429_v57 = vpop.f32.mrf.mxu3 }
0x145d   : > { %v4615_v28 = vpack.c.bf16 %v4404_v27, %v4404_v27  ;;  %v4616_v29 = vpack.c.bf16 %v4429_v57, %v4429_v57 }
0x145f   : > { %v4623_v30 = vsel %vm1432_vm6, %v4615_v28, 0  ;;  %v4642_v31 = vsel %vm1432_vm6, %v4616_v29, 0  ;;  %v4456_v32 = vpop.f32.mrf.mxu0  ;;  %v4481_v21 = vpop.f32.mrf.mxu1 }
0x1460   : > { %4632 = vmatpush.bf16.msra.mxu2 %v4623_v30  ;;  %4651 = vmatpush.bf16.msra.mxu3 %v4642_v31  ;;  %v6103_v31 = vld [vmem:[%s8476_s15 + $0x30] sm:$0xff] }
0x1461   : > { %v4701_v32 = vpack.c.bf16 %v6103_v31, %v6103_v31 }
0x1463   : > { %v4745_v21 = vsel %vm1432_vm6, %v4701_v32, 0 }
0x1464   : > { %v4406_v53 = vpop.f32.mrf.mxu2  ;;  %v4431_v33 = vpop.f32.mrf.mxu3  ;;  %4754 = vmatpush.bf16.msra.mxu0 %v4745_v21  ;;  %v6130_v21 = vld [vmem:[%s8478_s17 + $0x80] sm:$0xff] }
0x1465   : > { %v6101_v53 = vld [vmem:[%s8476_s15 + $0x20] sm:$0xff]  ;;  %v6102_v33 = vld [vmem:[%s8476_s15 + $0x28] sm:$0xff] }
0x14cf   : > { %v4544_v34 = vpop.f32.mrf.mxu0  ;;  %v4563_v35 = vpop.f32.mrf.mxu1 }
0x14d0   : > { %v4545_v37 = vadd.f32 %v6412_v0, %v4544_v34  ;;  %v4564_v50 = vadd.f32 %v6415_v48, %v4563_v35  ;;  %v4699_v34 = vpack.c.bf16 %v6101_v53, %v6101_v53  ;;  %v4700_v35 = vpack.c.bf16 %v6102_v33, %v6102_v33  ;;  %v6131_v53 = vld [vmem:[%s8478_s17 + $0x88] sm:$0xff]  ;;  %v6134_v33 = vld [vmem:[%s8478_s17 + $0xa0] sm:$0xff] }
0x14d2   : > { %v4573_v38 = vsel %vm1300_vm5, %v4545_v37, -inf  ;;  %v4576_v54 = vsel %vm1300_vm5, %v4564_v50, -inf  ;;  %v4707_v0 = vsel %vm1432_vm6, %v4699_v34, 0 }
0x14d3   : > { %4574 = vmax.xlane.f32.xlu1 %v4573_v38  ;;  %4716 = vmatpush.bf16.msrb.mxu2 %v4707_v0  ;;  %v6104_v38 = vld [vmem:[%s8476_s15 + $0x38] sm:$0xff]  ;;  %v4866_v0 = vpack.c.bf16 %v6130_v21, %v6130_v21 }
0x14d7   : > { %v4546_v39 = vpop.f32.mrf.mxu0  ;;  %v4565_v40 = vpop.f32.mrf.mxu1 }
0x14d8   : > { %v4702_v39 = vpack.c.bf16 %v6104_v38, %v6104_v38  ;;  %v6135_v38 = vld [vmem:[%s8478_s17 + $0xa8] sm:$0xff] }
0x14da   : > { %v4506_v36 = vpop.f32.mrf.mxu2  ;;  %v4525_v41 = vpop.f32.mrf.mxu3  ;;  %v4764_v40 = vsel %vm1432_vm6, %v4702_v39, 0  ;;  %v6138_v39 = vld [vmem:[%s8478_s17 + $0xc0] sm:$0xff] }
0x14db   : > { %v4507_v11 = vadd.f32 %v6413_v42, %v4506_v36  ;;  %v4526_v44 = vadd.f32 %v6414_v43, %v4525_v41  ;;  %4773 = vmatpush.bf16.msra.mxu1 %v4764_v40  ;;  %v6139_v40 = vld [vmem:[%s8478_s17 + $0xc8] sm:$0xff] }
0x14dd   : > { %v4570_v45 = vsel %vm1300_vm5, %v4526_v44, -inf  ;;  %v4567_v47 = vsel %vm1300_vm5, %v4507_v11, -inf }
0x14de   : > { %4571 = vmax.xlane.f32.xlu0 %v4570_v45  ;;  %4568 = vmax.xlane.f32.xlu2 %v4567_v47 }
0x14e2   : > { %v4508_v52 = vpop.f32.mrf.mxu2  ;;  %v4527_v49 = vpop.f32.mrf.mxu3 }
0x14e6   : > { %4577 = vmax.xlane.f32.xlu2 %v4576_v54 }
0x1546   : > { %v4575_v55 = vpop.xlane.xlu1 %4574 }
0x1547   : > { %v4581_v25 = vsub.f32 %v4545_v37, %v4575_v55  ;;  %v4726_v37 = vsel %vm1432_vm6, %v4700_v35, 0 }
0x1548   : > { %4735 = vmatpush.bf16.msrb.mxu3 %v4726_v37  ;;  %v4867_v37 = vpack.c.bf16 %v6131_v53, %v6131_v53 }
0x1549   : > { %v4587_v62 = vmul.f32 1.442695, %v4581_v25 }
0x154b   : > { %6369 = vpow2.f32 %v4587_v62 }
0x1551   : > { %v6370_v58 = vpop.eup %6369  ;;  %v4572_v59 = vpop.xlane.xlu0 %4571 }
0x1552   : > { %v4569_v61 = vpop.xlane.xlu2 %4568  ;;  %v4580_v63 = vsub.f32 %v4526_v44, %v4572_v59  ;;  %v4597_v2 = vsel %vm1300_vm5, %v6370_v58, 0.0 }
0x1553   : > { %v4579_v1 = vsub.f32 %v4507_v11, %v4569_v61  ;;  %4598 = vadd.xlane.f32.xlu2 %v4597_v2 }
0x1554   : > { %v4585_v3 = vmul.f32 1.442695, %v4580_v63 }
0x1555   : > { %v4583_v5 = vmul.f32 1.442695, %v4579_v1 }
0x1556   : > { %6371 = vpow2.f32 %v4585_v3 }
0x1557   : > { %6373 = vpow2.f32 %v4583_v5 }
0x155a   : > { %v4578_v6 = vpop.xlane.xlu2 %4577 }
0x155b   : > { %v4582_v7 = vsub.f32 %v4564_v50, %v4578_v6 }
0x155c   : > { %v6372_v8 = vpop.eup %6371 }
0x155d   : > { %v4589_v9 = vmul.f32 1.442695, %v4582_v7  ;;  %v6374_v12 = vpop.eup %6373  ;;  %v4594_v13 = vsel %vm1300_vm5, %v6372_v8, 0.0 }
0x155e   : > { %4595 = vadd.xlane.f32.xlu1 %v4594_v13  ;;  %v4591_v14 = vsel %vm1300_vm5, %v6374_v12, 0.0 }
0x155f   : > { %6375 = vpow2.f32 %v4589_v9  ;;  %4592 = vadd.xlane.f32.xlu0 %v4591_v14  ;;  %v6132_v14 = vld [vmem:[%s8478_s17 + $0x90] sm:$0xff] }
0x1565   : > { %v6376_v4 = vpop.eup %6375 }
0x1566   : > { %v4600_v15 = vsel %vm1300_vm5, %v6376_v4, 0.0 }
0x1567   : > { %4601 = vadd.xlane.f32.xlu0 %v4600_v15  ;;  %v6136_v15 = vld [vmem:[%s8478_s17 + $0xb0] sm:$0xff] }
0x15c6   : > { %v4599_v16 = vpop.xlane.xlu2 %4598 }
0x15c7   : > { %6377 = vrcp.f32 %v4599_v16 }
0x15cd   : > { %v6378_v10 = vpop.eup %6377 }
0x15ce   : > { %v4609_v17 = vmul.f32 %v6378_v10, %v6370_v58  ;;  %v6137_v10 = vld [vmem:[%s8478_s17 + $0xb8] sm:$0xff] }
0x15d0   : > { %v4613_v19 = vpack.c.bf16 %v4609_v17, %v4609_v17  ;;  %v4872_v17 = vpack.c.bf16 %v6136_v15, %v6136_v15  ;;  %v6156_v15 = vld [vmem:[%s8479_s18 + $0x150] sm:$0xff] }
0x15d1   : > { %v4596_v18 = vpop.xlane.xlu1 %4595 }
0x15d2   : > { %6379 = vrcp.f32 %v4596_v18  ;;  %v4593_v20 = vpop.xlane.xlu0 %4592  ;;  %6123 = vmatmul.msk.bf16.vlgmr.msrb.gmra.mxu0 %vm1300_vm5, %v4613_v19  ;;  %v6140_v19 = vld [vmem:[%s8478_s17 + $0xd0] sm:$0xff]  ;;  %v6141_v18 = vld [vmem:[%s8478_s17 + $0xd8] sm:$0xff] }
0x15d3   : > { %6381 = vrcp.f32 %v4593_v20  ;;  %v4873_v20 = vpack.c.bf16 %v6137_v10, %v6137_v10 }
0x15d8   : > { %v6380_v22 = vpop.eup %6379 }
0x15d9   : > { %v6382_v23 = vpop.eup %6381  ;;  %v4608_v24 = vmul.f32 %v6380_v22, %v6372_v8  ;;  %v4876_v22 = vpack.c.bf16 %v6140_v19, %v6140_v19 }
0x15da   : > { %v4607_v26 = vmul.f32 %v6382_v23, %v6374_v12  ;;  %v4602_v60 = vpop.xlane.xlu0 %4601  ;;  %v4877_v23 = vpack.c.bf16 %v6141_v18, %v6141_v18  ;;  %v6160_v18 = vld [vmem:[%s8479_s18 + $0x170] sm:$0xff] }
0x15db   : > { %v4612_v27 = vpack.c.bf16 %v4608_v24, %v4608_v24  ;;  %6383 = vrcp.f32 %v4602_v60  ;;  %v6144_v24 = vld [vmem:[%s8478_s17 + $0xf0] sm:$0xff] }
0x15dc   : > { %v4611_v57 = vpack.c.bf16 %v4607_v26, %v4607_v26  ;;  %v6145_v26 = vld [vmem:[%s8478_s17 + $0xf8] sm:$0xff]  ;;  %v4942_v31 = vunpack.c.l.b16 %v4877_v23 }
0x15dd   : > { %6122 = vmatmul.msk.bf16.vlgmr.msra.gmra.mxu3 %vm1300_vm5, %v4612_v27  ;;  %v4881_v32 = vpack.c.bf16 %v6145_v26, %v6145_v26 }
0x15de   : > { %6121 = vmatmul.msk.bf16.vlgmr.msra.gmra.mxu2 %vm1300_vm5, %v4611_v57  ;;  %v4916_v57 = vunpack.c.l.b16 %v4872_v17  ;;  %v4995_v17 = vpack.c.bf16 %v6156_v15, %v6156_v15 }
0x15e1   : > { %v6384_v28 = vpop.eup %6383 }
0x15e2   : > { %v4610_v29 = vmul.f32 %v6384_v28, %v6376_v4  ;;  %v6133_v4 = vld [vmem:[%s8478_s17 + $0x98] sm:$0xff]  ;;  %v4880_v28 = vpack.c.bf16 %v6144_v24, %v6144_v24 }
0x15e3   : > { %v4869_v16 = vpack.c.bf16 %v6133_v4, %v6133_v4 }
0x15e4   : > { %v4614_v30 = vpack.c.bf16 %v4610_v29, %v4610_v29  ;;  %v4917_v29 = vunpack.c.l.b16 %v4873_v20  ;;  %v4966_v35 = vunpack.c.l.b16 %v4880_v28  ;;  %v6161_v20 = vld [vmem:[%s8479_s18 + $0x178] sm:$0xff]  ;;  %v5073_v28 = vunpack.c.l.b16 %v4995_v17 }
0x15e5   : > { %v4889_v27 = vunpack.c.l.b16 %v4869_v16  ;;  %v5000_v21 = vpack.c.bf16 %v6161_v20, %v6161_v20  ;;  %v6177_v17 = vld [vmem:[%s8479_s18 + $0x1f8] sm:$0xff] }
0x15e6   : > { %6124 = vmatmul.msk.bf16.vlgmr.msrb.gmra.mxu1 %vm1300_vm5, %v4614_v30  ;;  %v4941_v30 = vunpack.c.l.b16 %v4876_v22  ;;  %v6146_v22 = vld [vmem:[%s8479_s18 + $0x100] sm:$0xff] }
0x15e7   : > { %v4985_v53 = vpack.c.bf16 %v6146_v22, %v6146_v22 }
0x164f   : > { %v4672_v36 = vpop.f32.mrf.mxu0 }
0x1650   : > { %v4697_v41 = vpack.c.bf16 %v4672_v36, %v4672_v36  ;;  %v4919_v36 = vpack.c.b16 %v4917_v29, %v4916_v57 }
0x1652   : > { %6127 = vmatmul.msk.bf16.vlgmr.msra.gmra.mxu0 %vm1300_vm5, %v4697_v41  ;;  %v4944_v41 = vpack.c.b16 %v4942_v31, %v4941_v30  ;;  %4928 = vmatpush.bf16.msra.mxu3 %v4919_v36  ;;  %v4999_v30 = vpack.c.bf16 %v6160_v18, %v6160_v18  ;;  %v6158_v36 = vld [vmem:[%s8479_s18 + $0x160] sm:$0xff] }
0x1654   : > { %4953 = vmatpush.bf16.msrb.mxu0 %v4944_v41  ;;  %v6159_v41 = vld [vmem:[%s8479_s18 + $0x168] sm:$0xff] }
0x1657   : > { %v4674_v42 = vpop.f32.mrf.mxu0 }
0x1658   : > { %v4967_v42 = vunpack.c.l.b16 %v4881_v32 }
0x1660   : > { %v4653_v11 = vpop.f32.mrf.mxu3 }
0x1661   : > { %v4634_v43 = vpop.f32.mrf.mxu2  ;;  %v4696_v44 = vpack.c.bf16 %v4653_v11, %v4653_v11  ;;  %v4870_v11 = vpack.c.bf16 %v6134_v33, %v6134_v33  ;;  %v6150_v33 = vld [vmem:[%s8479_s18 + $0x120] sm:$0xff] }
0x1662   : > { %v4695_v45 = vpack.c.bf16 %v4634_v43, %v4634_v43  ;;  %v6142_v43 = vld [vmem:[%s8478_s17 + $0xe0] sm:$0xff] }
0x1663   : > { %v4691_v47 = vpop.f32.mrf.mxu1  ;;  %6126 = vmatmul.msk.bf16.vlgmr.msrb.gmra.mxu3 %vm1300_vm5, %v4696_v44  ;;  %v6143_v44 = vld [vmem:[%s8478_s17 + $0xe8] sm:$0xff] }
0x1664   : > { %v4698_v48 = vpack.c.bf16 %v4691_v47, %v4691_v47  ;;  %6125 = vmatmul.msk.bf16.vlgmr.msrb.gmra.mxu2 %vm1300_vm5, %v4695_v45  ;;  %v4886_v45 = vunpack.c.l.b16 %v4866_v0  ;;  %v4887_v47 = vunpack.c.l.b16 %v4867_v37 }
0x1666   : > { %6128 = vmatmul.msk.bf16.vlgmr.msra.gmra.mxu1 %vm1300_vm5, %v4698_v48  ;;  %v4871_v48 = vpack.c.bf16 %v6135_v38, %v6135_v38  ;;  %v5098_v38 = vunpack.c.l.b16 %v4999_v30 }
0x1668   : > { %v4655_v50 = vpop.f32.mrf.mxu3 }
0x1669   : > { %v4636_v52 = vpop.f32.mrf.mxu2  ;;  %v4874_v50 = vpack.c.bf16 %v6138_v39, %v6138_v39 }
0x166a   : > { %v4969_v52 = vpack.c.b16 %v4967_v42, %v4966_v35  ;;  %v6154_v35 = vld [vmem:[%s8479_s18 + $0x140] sm:$0xff]  ;;  %v5099_v42 = vunpack.c.l.b16 %v5000_v21  ;;  %v6167_v21 = vld [vmem:[%s8479_s18 + $0x1a8] sm:$0xff] }
0x166b   : > { %v4693_v49 = vpop.f32.mrf.mxu1 }
0x166c   : > { %v4914_v49 = vunpack.c.l.b16 %v4870_v11  ;;  %4978 = vmatpush.bf16.msrb.mxu1 %v4969_v52  ;;  %v5021_v11 = vunpack.c.l.b16 %v4985_v53  ;;  %v4997_v52 = vpack.c.bf16 %v6158_v36, %v6158_v36 }
0x16cf   : > { %v4756_v54 = vpop.f32.mrf.mxu0 }
0x16d0   : > { %v4782_v1 = vsel %vm912_vm0, %v4756_v54, 0.0  ;;  %v4875_v54 = vpack.c.bf16 %v6139_v40, %v6139_v40  ;;  %v6155_v40 = vld [vmem:[%s8479_s18 + $0x148] sm:$0xff] }
0x16d7   : > { %v4758_v55 = vpop.f32.mrf.mxu0 }
0x16d8   : > { %v4878_v55 = vpack.c.bf16 %v6142_v43, %v6142_v43 }
0x16e3   : > { %v4775_v25 = vpop.f32.mrf.mxu1 }
0x16e4   : > { %v4784_v5 = vsel %vm912_vm0, %v4775_v25, 0.0  ;;  %v4890_v25 = vpack.c.b16 %v4887_v47, %v4886_v45  ;;  %v4993_v47 = vpack.c.bf16 %v6154_v35, %v6154_v35 }
0x16e6   : > { %v4737_v62 = vpop.f32.mrf.mxu3 }
0x16e7   : > { %v4718_v58 = vpop.f32.mrf.mxu2  ;;  %v4780_v59 = vsel %vm912_vm0, %v4737_v62, 0.0  ;;  %v4915_v62 = vunpack.c.l.b16 %v4871_v48  ;;  %v5101_v48 = vpack.c.b16 %v5099_v42, %v5098_v38  ;;  %v6174_v38 = vld [vmem:[%s8479_s18 + $0x1e0] sm:$0xff]  ;;  %v6175_v42 = vld [vmem:[%s8479_s18 + $0x1e8] sm:$0xff] }
0x16e8   : > { %v4779_v61 = vsel %vm912_vm0, %v4718_v58, 0.0  ;;  %v4939_v58 = vunpack.c.l.b16 %v4874_v50  ;;  %v4994_v50 = vpack.c.bf16 %v6155_v40, %v6155_v40 }
0x16e9   : > { %v4781_v63 = vadd.f32 %v4780_v59, %v4779_v61  ;;  %v4879_v59 = vpack.c.bf16 %v6143_v44, %v6143_v44  ;;  %v4940_v61 = vunpack.c.l.b16 %v4875_v54  ;;  %v4989_v44 = vpack.c.bf16 %v6150_v33, %v6150_v33 }
0x16eb   : > { %v4783_v2 = vadd.f32 %v4782_v1, %v4781_v63  ;;  %v4777_v3 = vpop.f32.mrf.mxu1  ;;  %v4964_v63 = vunpack.c.l.b16 %v4878_v55  ;;  %v4918_v1 = vpack.c.b16 %v4915_v62, %v4914_v49  ;;  %v4998_v49 = vpack.c.bf16 %v6159_v41, %v6159_v41 }
0x16ec   : > { %v4943_v3 = vpack.c.b16 %v4940_v61, %v4939_v58  ;;  %v5046_v55 = vunpack.c.l.b16 %v4989_v44  ;;  %v5071_v62 = vunpack.c.l.b16 %v4993_v47  ;;  %v5072_v58 = vunpack.c.l.b16 %v4994_v50 }
0x16ed   : > { %v4785_v6 = vadd.f32 %v4784_v5, %v4783_v2  ;;  %v4965_v2 = vunpack.c.l.b16 %v4879_v59  ;;  %4929 = vmatpush.bf16.msra.mxu3 %v4918_v1  ;;  %v5096_v59 = vunpack.c.l.b16 %v4997_v52  ;;  %v5097_v61 = vunpack.c.l.b16 %v4998_v49 }
0x16ee   : > { %v4739_v7 = vpop.f32.mrf.mxu3  ;;  %4954 = vmatpush.bf16.msrb.mxu0 %v4943_v3  ;;  %v5013_v50 = vpack.c.bf16 %v6174_v38, %v6174_v38 }
0x16ef   : > { %v4720_v8 = vpop.f32.mrf.mxu2  ;;  %v8056_v9 = vadd.f32 %v4785_v6, %v7817_v46  ;;  %v4868_v46 = vpack.c.bf16 %v6132_v14, %v6132_v14  ;;  %v4968_v5 = vpack.c.b16 %v4965_v2, %v4964_v63  ;;  %v6148_v6 = vld [vmem:[%s8479_s18 + $0x110] sm:$0xff]  ;;  %v6149_v7 = vld [vmem:[%s8479_s18 + $0x118] sm:$0xff]  ;;  %v5075_v2 = vpack.c.b16 %v5072_v58, %v5071_v62 }
0x16f0   : > { %v6152_v8 = vld [vmem:[%s8479_s18 + $0x130] sm:$0xff]  ;;  %v6153_v14 = vld [vmem:[%s8479_s18 + $0x138] sm:$0xff]  ;;  %v5100_v3 = vpack.c.b16 %v5097_v61, %v5096_v59 }
0x16f1   : > { %v4844_v12 = vmul.f32 %v8056_v9, %v8056_v9  ;;  %v4888_v60 = vunpack.c.l.b16 %v4868_v46  ;;  %4979 = vmatpush.bf16.msrb.mxu1 %v4968_v5  ;;  %v4991_v4 = vpack.c.bf16 %v6152_v8, %v6152_v8  ;;  %v6157_v46 = vld [vmem:[%s8479_s18 + $0x158] sm:$0xff]  ;;  %v4992_v10 = vpack.c.bf16 %v6153_v14, %v6153_v14  ;;  %v6172_v14 = vld [vmem:[%s8479_s18 + $0x1d0] sm:$0xff] }
0x16f2   : > { %v4996_v19 = vpack.c.bf16 %v6157_v46, %v6157_v46  ;;  %v6165_v8 = vld [vmem:[%s8479_s18 + $0x198] sm:$0xff]  ;;  %v5011_v20 = vpack.c.bf16 %v6172_v14, %v6172_v14 }
0x16f3   : > { %v4845_v13 = vsel %vm912_vm0, %v4844_v12, 0.0  ;;  %v4891_v34 = vpack.c.b16 %v4889_v27, %v4888_v60  ;;  %v4987_v12 = vpack.c.bf16 %v6148_v6, %v6148_v6  ;;  %v5048_v60 = vunpack.c.l.b16 %v4991_v4  ;;  %v6147_v27 = vld [vmem:[%s8479_s18 + $0x108] sm:$0xff]  ;;  %v6173_v4 = vld [vmem:[%s8479_s18 + $0x1d8] sm:$0xff] }
0x16f4   : > { %4846 = vadd.xlane.f32.xlu1 %v4845_v13  ;;  %v4988_v13 = vpack.c.bf16 %v6149_v7, %v6149_v7  ;;  %v5049_v57 = vunpack.c.l.b16 %v4992_v10  ;;  %v5074_v29 = vunpack.c.l.b16 %v4996_v19  ;;  %v4986_v39 = vpack.c.bf16 %v6147_v27, %v6147_v27  ;;  %v6164_v7 = vld [vmem:[%s8479_s18 + $0x190] sm:$0xff]  ;;  %v6162_v27 = vld [vmem:[%s8479_s18 + $0x180] sm:$0xff] }
0x16f5   : > { %4903 = vmatpush.bf16.msra.mxu2 %v4891_v34  ;;  %v5023_v24 = vunpack.c.l.b16 %v4987_v12  ;;  %v6151_v34 = vld [vmem:[%s8479_s18 + $0x128] sm:$0xff]  ;;  %5110 = vmatpush.bf16.msra.mxu1 %v5101_v48  ;;  %v6168_v12 = vld [vmem:[%s8479_s18 + $0x1b0] sm:$0xff]  ;;  %v5003_v46 = vpack.c.bf16 %v6164_v7, %v6164_v7  ;;  %v5012_v22 = vpack.c.bf16 %v6173_v4, %v6173_v4  ;;  %v5001_v36 = vpack.c.bf16 %v6162_v27, %v6162_v27 }
0x16f6   : > { %v5024_v26 = vunpack.c.l.b16 %v4988_v13  ;;  %v5051_v0 = vpack.c.b16 %v5049_v57, %v5048_v60  ;;  %v5076_v37 = vpack.c.b16 %v5074_v29, %v5073_v28  ;;  %v5022_v43 = vunpack.c.l.b16 %v4986_v39  ;;  %v6169_v13 = vld [vmem:[%s8479_s18 + $0x1b8] sm:$0xff]  ;;  %v6176_v10 = vld [vmem:[%s8479_s18 + $0x1f0] sm:$0xff]  ;;  %v6163_v57 = vld [vmem:[%s8479_s18 + $0x188] sm:$0xff] }
0x16f7   : > { %v4990_v45 = vpack.c.bf16 %v6151_v34, %v6151_v34  ;;  %v5007_v19 = vpack.c.bf16 %v6168_v12, %v6168_v12  ;;  %v5008_v18 = vpack.c.bf16 %v6169_v13, %v6169_v13  ;;  %v5016_v60 = vpack.c.bf16 %v6177_v17, %v6177_v17 }
0x16f8   : > { %v5026_v32 = vpack.c.b16 %v5024_v26, %v5023_v24  ;;  %5060 = vmatpush.bf16.msrb.mxu3 %v5051_v0  ;;  %5085 = vmatpush.bf16.msra.mxu0 %v5076_v37  ;;  %v5025_v54 = vpack.c.b16 %v5022_v43, %v5021_v11  ;;  %v5015_v24 = vpack.c.bf16 %v6176_v10, %v6176_v10  ;;  %v6282_v26 = vld [vmem:[%s8477_s16 + $0x1] ss:$0 sm:$0xff]  ;;  %v5123_v30 = vunpack.c.l.b16 %v5003_v46  ;;  %v6171_v37 = vld [vmem:[%s8479_s18 + $0x1c8] sm:$0xff] }
0x16f9   : > { %4904 = vmatpush.bf16.msra.mxu2 %v4890_v25  ;;  %v5047_v25 = vunpack.c.l.b16 %v4990_v45  ;;  %5111 = vmatpush.bf16.msra.mxu1 %v5100_v3  ;;  %v5148_v53 = vunpack.c.l.b16 %v5007_v19  ;;  %v5149_v33 = vunpack.c.l.b16 %v5008_v18  ;;  %v5173_v34 = vunpack.c.l.b16 %v5011_v20  ;;  %v6170_v0 = vld [vmem:[%s8479_s18 + $0x1c0] sm:$0xff] }
0x16fa   : > { %v5174_v35 = vunpack.c.l.b16 %v5012_v22  ;;  %v5198_v40 = vunpack.c.l.b16 %v5015_v24  ;;  %v5002_v41 = vpack.c.bf16 %v6163_v57, %v6163_v57  ;;  %v5199_v43 = vunpack.c.l.b16 %v5016_v60 }
0x16fb   : > { %v5050_v63 = vpack.c.b16 %v5047_v25, %v5046_v55  ;;  %v5006_v45 = vpack.c.bf16 %v6167_v21, %v6167_v21  ;;  %v5009_v47 = vpack.c.bf16 %v6170_v0, %v6170_v0  ;;  %v5010_v48 = vpack.c.bf16 %v6171_v37, %v6171_v37 }
0x16fc   : > { %5086 = vmatpush.bf16.msra.mxu0 %v5075_v2  ;;  %v5151_v55 = vpack.c.b16 %v5149_v33, %v5148_v53  ;;  %v5176_v25 = vpack.c.b16 %v5174_v35, %v5173_v34  ;;  %v5121_v62 = vunpack.c.l.b16 %v5001_v36  ;;  %v5122_v58 = vunpack.c.l.b16 %v5002_v41 }
0x16fd   : > { %5035 = vmatpush.bf16.msrb.mxu2 %v5026_v32  ;;  %5061 = vmatpush.bf16.msrb.mxu3 %v5050_v63  ;;  %v5201_v61 = vpack.c.b16 %v5199_v43, %v5198_v40  ;;  %v5171_v2 = vunpack.c.l.b16 %v5009_v47  ;;  %v5172_v3 = vunpack.c.l.b16 %v5010_v48 }
0x16fe   : > { %v5125_v7 = vpack.c.b16 %v5122_v58, %v5121_v62 }
0x16ff   : > { %v5175_v12 = vpack.c.b16 %v5172_v3, %v5171_v2 }
0x1701   : > { %5036 = vmatpush.bf16.msrb.mxu2 %v5025_v54  ;;  %v5014_v54 = vpack.c.bf16 %v6175_v42, %v6175_v42 }
0x1767   : > { %v4847_v16 = vpop.xlane.xlu1 %4846 }
0x1768   : > { %v4848_v23 = vmul.f32 %v4847_v16, %v6725_v51  ;;  %v5004_v16 = vpack.c.bf16 %v6165_v8, %v6165_v8 }
0x176a   : > { %v8140_v31 = vadd.f32 1e-06, %v4848_v23  ;;  %v5124_v32 = vunpack.c.l.b16 %v5004_v16 }
0x176c   : > { %6385 = vrsqrt.f32 %v8140_v31  ;;  %vm4856_vm8 = vweird.f32 %v8140_v31  ;;  %v5126_v49 = vpack.c.b16 %v5124_v32, %v5123_v30 }
0x1772   : > { %v6386_v1 = vpop.eup %6385 }
0x1773   : > { %v4851_v5 = vmul.f32 %v6386_v1, %v8140_v31  ;;  %vm4857_vm7 = vweird.f32 %v6386_v1  ;;  %v6166_v31 = vld [vmem:[%s8479_s18 + $0x1a0] sm:$0xff] }
0x1774   : > { %vm8197_vm9 = vmor %vm4856_vm8, %vm4857_vm7  ;;  %v5005_v44 = vpack.c.bf16 %v6166_v31, %v6166_v31 }
0x1775   : > { %v4852_v6 = vmul.f32 %v6386_v1, %v4851_v5  ;;  %v5196_v5 = vunpack.c.l.b16 %v5013_v50 }
0x1776   : > { %v5146_v63 = vunpack.c.l.b16 %v5005_v44 }
0x1777   : > { %v4853_v15 = vmul.f32 0.5, %v4852_v6  ;;  %v5197_v6 = vunpack.c.l.b16 %v5014_v54 }
0x1779   : > { %v4854_v23 = vsub.f32 1.5, %v4853_v15  ;;  %v5200_v13 = vpack.c.b16 %v5197_v6, %v5196_v5 }
0x177b   : > { %v4855_v28 = vmul.f32 %v6386_v1, %v4854_v23 }
0x177d   : > { %v4859_v39 = vsel %vm8197_vm9, %v6386_v1, %v4855_v28  ;;  %v5147_v1 = vunpack.c.l.b16 %v5006_v45 }
0x177e   : > { %v4860_v11 = vmul.f32 %v4859_v39, %v8056_v9 }
0x177f   : > { %v5150_v8 = vpack.c.b16 %v5147_v1, %v5146_v63 }
0x1780   : > { %v4864_v52 = vmul.f32 %v6282_v26, %v4860_v11 }
0x1782   : > { %v4865_v59 = vpack.c.bf16 %v4864_v52, %v4864_v52 }
0x1784   : > { %6182 = vmatmul.msk.bf16.vlgmr.msra.gmra.mxu2 %vm912_vm0, %v4865_v59  ;;  %6183 = vmatmul.msk.bf16.vlgmr.msra.gmra.mxu3 %vm912_vm0, %v4865_v59 }
0x1785   : > { %6184 = vmatmul.msk.bf16.vlgmr.msrb.gmra.mxu0 %vm912_vm0, %v4865_v59  ;;  %6185 = vmatmul.msk.bf16.vlgmr.msrb.gmra.mxu1 %vm912_vm0, %v4865_v59 }
0x1786   : > { %5135 = vmatpush.bf16.msra.mxu2 %v5126_v49  ;;  %5160 = vmatpush.bf16.msra.mxu3 %v5151_v55  ;;  %v6416_v55 = vld [vmem:[%s6678_s9] ss:$0 sm:$0xff]  ;;  %s8410_s9 = sshll.u32 %s818_s27, 3 }
0x1787   : > { %5185 = vmatpush.bf16.msrb.mxu0 %v5176_v25  ;;  %5210 = vmatpush.bf16.msrb.mxu1 %v5201_v61  ;;  %s820_s0 = scalar_lea.vmem [#allocation2], %s8410_s9 }
0x1788   : > { %s5759_s30 = sshll.u32 %s820_s0, 4  ;;  %s5760_s30 = int_to_ptr.vmem [resolvable:$true] %s5759_s30 }
0x178a   : > { %5136 = vmatpush.bf16.msra.mxu2 %v5125_v7  ;;  %5161 = vmatpush.bf16.msra.mxu3 %v5150_v8 }
0x178b   : > { %5186 = vmatpush.bf16.msrb.mxu0 %v5175_v12  ;;  %5211 = vmatpush.bf16.msrb.mxu1 %v5200_v13 }
0x1794   : > { %6186 = vmatmul.msk.bf16.vlgmr.msrb.gmra.mxu2 %vm912_vm0, %v7706_v56  ;;  %6187 = vmatmul.msk.bf16.vlgmr.msrb.gmra.mxu3 %vm912_vm0, %v7706_v56 }
0x1795   : > { %6188 = vmatmul.msk.bf16.vlgmr.msra.gmra.mxu0 %vm912_vm0, %v7706_v56  ;;  %6189 = vmatmul.msk.bf16.vlgmr.msra.gmra.mxu1 %vm912_vm0, %v7706_v56 }
0x17a4   : > { %6190 = vmatmul.msk.bf16.vlgmr.msra.gmra.mxu2 %vm912_vm0, %v7706_v56  ;;  %6191 = vmatmul.msk.bf16.vlgmr.msra.gmra.mxu3 %vm912_vm0, %v7706_v56 }
0x17a5   : > { %6192 = vmatmul.msk.bf16.vlgmr.msrb.gmra.mxu0 %vm912_vm0, %v7706_v56  ;;  %6193 = vmatmul.msk.bf16.vlgmr.msrb.gmra.mxu1 %vm912_vm0, %v7706_v56 }
0x1802   : > { %v4956_v14 = vpop.f32.mrf.mxu0  ;;  %v4981_v4 = vpop.f32.mrf.mxu1 }
0x1803   : > { %v5219_v31 = vpack.c.bf16 %v4956_v14, %v4956_v14  ;;  %v5220_v21 = vpack.c.bf16 %v4981_v4, %v4981_v4 }
0x1807   : > { %v4906_v15 = vpop.f32.mrf.mxu2  ;;  %v4931_v46 = vpop.f32.mrf.mxu3 }
0x1808   : > { %v5217_v34 = vpack.c.bf16 %v4906_v15, %v4906_v15  ;;  %v5218_v35 = vpack.c.bf16 %v4931_v46, %v4931_v46 }
0x180a   : > { %v4958_v16 = vpop.f32.mrf.mxu0  ;;  %v4983_v10 = vpop.f32.mrf.mxu1 }
0x180f   : > { %v4908_v17 = vpop.f32.mrf.mxu2  ;;  %v4933_v19 = vpop.f32.mrf.mxu3 }
0x1812   : > { %v5088_v18 = vpop.f32.mrf.mxu0  ;;  %v5113_v20 = vpop.f32.mrf.mxu1 }
0x1813   : > { %v5223_v22 = vpack.c.bf16 %v5088_v18, %v5088_v18  ;;  %v5224_v23 = vpack.c.bf16 %v5113_v20, %v5113_v20 }
0x1815   : > { %v5267_v24 = vsel %vm1300_vm5, %v5223_v22, 0  ;;  %v5286_v26 = vsel %vm1300_vm5, %v5224_v23, 0 }
0x1816   : > { %5276 = vmatpush.bf16.xpose.msra.mxu0 %v5267_v24  ;;  %5295 = vmatpush.bf16.xpose.msra.mxu1 %v5286_v26 }
0x1817   : > { %v5038_v60 = vpop.f32.mrf.mxu2  ;;  %v5063_v56 = vpop.f32.mrf.mxu3 }
0x1818   : > { %v5221_v27 = vpack.c.bf16 %v5038_v60, %v5038_v60  ;;  %v5222_v57 = vpack.c.bf16 %v5063_v56, %v5063_v56 }
0x181a   : > { %v5229_v28 = vsel %vm1300_vm5, %v5221_v27, 0  ;;  %v5248_v29 = vsel %vm1300_vm5, %v5222_v57, 0  ;;  %v5090_v30 = vpop.f32.mrf.mxu0  ;;  %v5115_v32 = vpop.f32.mrf.mxu1 }
0x181b   : > { %5238 = vmatpush.bf16.xpose.msrb.mxu2 %v5229_v28  ;;  %5257 = vmatpush.bf16.xpose.msrb.mxu3 %v5248_v29 }
0x181d   : > { %6196 = vmatmul.msk.bf16.vlgmr.msra.gmra.mxu0 %vm1300_vm5, %v5219_v31  ;;  %6197 = vmatmul.msk.bf16.vlgmr.msra.gmra.mxu1 %vm1300_vm5, %v5220_v21 }
0x181f   : > { %v5040_v53 = vpop.f32.mrf.mxu2  ;;  %v5065_v33 = vpop.f32.mrf.mxu3 }
0x1822   : > { %v5188_v0 = vpop.f32.mrf.mxu0  ;;  %v5213_v37 = vpop.f32.mrf.mxu1  ;;  %6194 = vmatmul.msk.bf16.vlgmr.msrb.gmra.mxu2 %vm1300_vm5, %v5217_v34  ;;  %6195 = vmatmul.msk.bf16.vlgmr.msrb.gmra.mxu3 %vm1300_vm5, %v5218_v35 }
0x1823   : > { %v5351_v38 = vpack.c.bf16 %v5188_v0, %v5188_v0  ;;  %v5352_v39 = vpack.c.bf16 %v5213_v37, %v5213_v37 }
0x1825   : > { %v5395_v40 = vsel %vm1432_vm6, %v5351_v38, 0  ;;  %v5414_v36 = vsel %vm1432_vm6, %v5352_v39, 0 }
0x1826   : > { %5404 = vmatpush.bf16.msrb.mxu0 %v5395_v40  ;;  %5423 = vmatpush.bf16.msrb.mxu1 %v5414_v36 }
0x1827   : > { %v5138_v41 = vpop.f32.mrf.mxu2  ;;  %v5163_v42 = vpop.f32.mrf.mxu3 }
0x1828   : > { %v5349_v11 = vpack.c.bf16 %v5138_v41, %v5138_v41  ;;  %v5350_v43 = vpack.c.bf16 %v5163_v42, %v5163_v42  ;;  %v6180_v42 = vld [vmem:[%s8480_s19 + $0x30] sm:$0xff] }
0x182a   : > { %v5357_v44 = vsel %vm1432_vm6, %v5349_v11, 0  ;;  %v5376_v45 = vsel %vm1432_vm6, %v5350_v43, 0  ;;  %v5190_v47 = vpop.f32.mrf.mxu0  ;;  %v5215_v48 = vpop.f32.mrf.mxu1  ;;  %v5435_v11 = vpack.c.bf16 %v6180_v42, %v6180_v42 }
0x182b   : > { %5366 = vmatpush.bf16.msra.mxu2 %v5357_v44  ;;  %5385 = vmatpush.bf16.msra.mxu3 %v5376_v45  ;;  %v6178_v44 = vld [vmem:[%s8480_s19 + $0x20] sm:$0xff]  ;;  %v6179_v45 = vld [vmem:[%s8480_s19 + $0x28] sm:$0xff] }
0x182c   : > { %v5479_v43 = vsel %vm1432_vm6, %v5435_v11, 0  ;;  %v5433_v47 = vpack.c.bf16 %v6178_v44, %v6178_v44  ;;  %v5434_v48 = vpack.c.bf16 %v6179_v45, %v6179_v45  ;;  %v6283_v44 = vld [vmem:[%s8481_s20 + $0x1] ss:$0 sm:$0xff] }
0x182d   : > { %5488 = vmatpush.bf16.msra.mxu0 %v5479_v43 }
0x182f   : > { %v5140_v50 = vpop.f32.mrf.mxu2  ;;  %v5165_v52 = vpop.f32.mrf.mxu3 }
0x1830   : > { %v5441_v50 = vsel %vm1432_vm6, %v5433_v47, 0  ;;  %v5460_v52 = vsel %vm1432_vm6, %v5434_v48, 0 }
0x1831   : > { %5450 = vmatpush.bf16.msrb.mxu2 %v5441_v50  ;;  %5469 = vmatpush.bf16.msrb.mxu3 %v5460_v52  ;;  %v6211_v52 = vld [vmem:[%s8483_s22 + $0x40] sm:$0xff] }
0x189a   : > { %v5278_v49 = vpop.f32.mrf.mxu0  ;;  %v5297_v54 = vpop.f32.mrf.mxu1 }
0x189b   : > { %v5279_v25 = vadd.f32 %v6416_v55, %v5278_v49  ;;  %v5298_v6 = vadd.f32 %v6416_v55, %v5297_v54  ;;  %v6181_v49 = vld [vmem:[%s8480_s19 + $0x38] sm:$0xff] }
0x189c   : > { %v5436_v54 = vpack.c.bf16 %v6181_v49, %v6181_v49  ;;  %v6212_v49 = vld [vmem:[%s8483_s22 + $0x48] sm:$0xff] }
0x189d   : > { %v5307_v62 = vsel %vm1300_vm5, %v5279_v25, -inf  ;;  %v5310_v12 = vsel %vm1300_vm5, %v5298_v6, -inf }
0x189e   : > { %5308 = vmax.xlane.f32.xlu1 %v5307_v62 }
0x18a2   : > { %v5280_v58 = vpop.f32.mrf.mxu0  ;;  %v5299_v59 = vpop.f32.mrf.mxu1 }
0x18a5   : > { %v5240_v61 = vpop.f32.mrf.mxu2  ;;  %v5259_v63 = vpop.f32.mrf.mxu3 }
0x18a6   : > { %v5241_v1 = vadd.f32 %v6416_v55, %v5240_v61  ;;  %v5260_v2 = vadd.f32 %v6416_v55, %v5259_v63  ;;  %v5498_v55 = vsel %vm1432_vm6, %v5436_v54, 0  ;;  %v5579_v54 = vpack.c.bf16 %v6212_v49, %v6211_v52 }
0x18a7   : > { %5507 = vmatpush.bf16.msra.mxu1 %v5498_v55 }
0x18a8   : > { %v5304_v3 = vsel %vm1300_vm5, %v5260_v2, -inf  ;;  %v5301_v5 = vsel %vm1300_vm5, %v5241_v1, -inf }
0x18a9   : > { %5305 = vmax.xlane.f32.xlu0 %v5304_v3  ;;  %5302 = vmax.xlane.f32.xlu2 %v5301_v5 }
0x18ad   : > { %v5242_v7 = vpop.f32.mrf.mxu2  ;;  %v5261_v8 = vpop.f32.mrf.mxu3 }
0x18b1   : > { %5311 = vmax.xlane.f32.xlu2 %v5310_v12 }
0x1911   : > { %v5309_v13 = vpop.xlane.xlu1 %5308 }
0x1912   : > { %v5315_v14 = vsub.f32 %v5279_v25, %v5309_v13 }
0x1914   : > { %v5321_v4 = vmul.f32 1.442695, %v5315_v14 }
0x1916   : > { %6387 = vpow2.f32 %v5321_v4 }
0x191c   : > { %v6388_v15 = vpop.eup %6387  ;;  %v5306_v46 = vpop.xlane.xlu0 %5305 }
0x191d   : > { %v5303_v16 = vpop.xlane.xlu2 %5302  ;;  %v5314_v10 = vsub.f32 %v5260_v2, %v5306_v46  ;;  %v5331_v19 = vsel %vm1300_vm5, %v6388_v15, 0.0 }
0x191e   : > { %v5313_v17 = vsub.f32 %v5241_v1, %v5303_v16  ;;  %5332 = vadd.xlane.f32.xlu2 %v5331_v19 }
0x191f   : > { %v5319_v18 = vmul.f32 1.442695, %v5314_v10 }
0x1920   : > { %v5317_v20 = vmul.f32 1.442695, %v5313_v17 }
0x1921   : > { %6389 = vpow2.f32 %v5319_v18 }
0x1922   : > { %6391 = vpow2.f32 %v5317_v20 }
0x1925   : > { %v5312_v22 = vpop.xlane.xlu2 %5311 }
0x1926   : > { %v5316_v23 = vsub.f32 %v5298_v6, %v5312_v22 }
0x1927   : > { %v6390_v24 = vpop.eup %6389 }
0x1928   : > { %v5323_v26 = vmul.f32 1.442695, %v5316_v23  ;;  %v6392_v60 = vpop.eup %6391  ;;  %v5328_v56 = vsel %vm1300_vm5, %v6390_v24, 0.0 }
0x1929   : > { %v5325_v27 = vsel %vm1300_vm5, %v6392_v60, 0.0  ;;  %5329 = vadd.xlane.f32.xlu1 %v5328_v56  ;;  %v6209_v56 = vld [vmem:[%s8482_s21 + $0x30] sm:$0xff] }
0x192a   : > { %6393 = vpow2.f32 %v5323_v26  ;;  %5326 = vadd.xlane.f32.xlu0 %v5325_v27  ;;  %v6210_v27 = vld [vmem:[%s8482_s21 + $0x38] sm:$0xff] }
0x1930   : > { %v6394_v57 = vpop.eup %6393 }
0x1931   : > { %v5334_v28 = vsel %vm1300_vm5, %v6394_v57, 0.0 }
0x1932   : > { %5335 = vadd.xlane.f32.xlu0 %v5334_v28  ;;  %v6208_v28 = vld [vmem:[%s8482_s21 + $0x28] sm:$0xff] }
0x1991   : > { %v5333_v29 = vpop.xlane.xlu2 %5332 }
0x1992   : > { %6395 = vrcp.f32 %v5333_v29 }
0x1998   : > { %v6396_v30 = vpop.eup %6395 }
0x1999   : > { %v5343_v32 = vmul.f32 %v6396_v30, %v6388_v15  ;;  %v6217_v30 = vld [vmem:[%s8483_s22 + $0x70] sm:$0xff] }
0x199b   : > { %v5347_v31 = vpack.c.bf16 %v5343_v32, %v5343_v32  ;;  %v6218_v32 = vld [vmem:[%s8483_s22 + $0x78] sm:$0xff] }
0x199c   : > { %v5330_v21 = vpop.xlane.xlu1 %5329 }
0x199d   : > { %v5327_v53 = vpop.xlane.xlu0 %5326  ;;  %6200 = vmatmul.msk.bf16.vlgmr.msrb.gmra.mxu0 %vm1300_vm5, %v5347_v31  ;;  %6397 = vrcp.f32 %v5330_v21  ;;  %v6215_v31 = vld [vmem:[%s8483_s22 + $0x60] sm:$0xff]  ;;  %v5582_v21 = vpack.c.bf16 %v6218_v32, %v6217_v30  ;;  %v5623_v32 = vld [vmem:[%s8561_s5 + $0x8] sm:$0xff] }
0x199e   : > { %6399 = vrcp.f32 %v5327_v53  ;;  %v6216_v53 = vld [vmem:[%s8483_s22 + $0x68] sm:$0xff]  ;;  %v5622_v30 = vld [vmem:[%s8561_s5] sm:$0xff] }
0x19a3   : > { %v6398_v33 = vpop.eup %6397 }
0x19a4   : > { %v6400_v34 = vpop.eup %6399  ;;  %v5342_v35 = vmul.f32 %v6398_v33, %v6390_v24 }
0x19a5   : > { %v5341_v0 = vmul.f32 %v6400_v34, %v6392_v60  ;;  %v5336_v37 = vpop.xlane.xlu0 %5335  ;;  %v5581_v34 = vpack.c.bf16 %v6216_v53, %v6215_v31  ;;  %v5639_v31 = vpack.c.bf16 %v5623_v32, %v5622_v30  ;;  %v5697_v53 = vld [vmem:[%s840_s8] sm:$0xff]  ;;  %s8567_s8 = sld [smem:[#allocation28_spill]] }
0x19a6   : > { %v5346_v38 = vpack.c.bf16 %v5342_v35, %v5342_v35  ;;  %6401 = vrcp.f32 %v5336_v37  ;;  %v6214_v37 = vld [vmem:[%s8483_s22 + $0x58] sm:$0xff] }
0x19a7   : > { %v5345_v39 = vpack.c.bf16 %v5341_v0, %v5341_v0  ;;  %v6213_v0 = vld [vmem:[%s8483_s22 + $0x50] sm:$0xff] }
0x19a8   : > { %6199 = vmatmul.msk.bf16.vlgmr.msra.gmra.mxu3 %vm1300_vm5, %v5346_v38 }
0x19a9   : > { %6198 = vmatmul.msk.bf16.vlgmr.msra.gmra.mxu2 %vm1300_vm5, %v5345_v39  ;;  %5590 = vmatpush.bf16.msra.mxu3 %v5582_v21  ;;  %v5580_v39 = vpack.c.bf16 %v6214_v37, %v6213_v0  ;;  %v5651_v21 = vsel %vm912_vm0, %v5639_v31, 0 }
0x19ab   : > { %s5757_s6 = scalar_lea.hbm %s8567_s8, %s6224_s23  ;;  %s6437_s9 = scalar_lea.hbm %s8567_s8, 16 }
0x19ac   : > { %v6402_v40 = vpop.eup %6401 }
0x19ad   : > { %v5344_v36 = vmul.f32 %v6402_v40, %v6394_v57  ;;  %v5560_v57 = vpack.c.bf16 %v6210_v27, %v6209_v56  ;;  %5591 = vmatpush.bf16.msra.mxu3 %v5581_v34 }
0x19af   : > { %v5348_v41 = vpack.c.bf16 %v5344_v36, %v5344_v36  ;;  %5570 = vmatpush.bf16.msra.mxu2 %v5560_v57  ;;  %v5624_v57 = vld [vmem:[%s8561_s5 + $0x10] sm:$0xff] }
0x19b1   : > { %6201 = vmatmul.msk.bf16.vlgmr.msrb.gmra.mxu1 %vm1300_vm5, %v5348_v41  ;;  %5592 = vmatpush.bf16.msra.mxu3 %v5580_v39 }
0x19b5   : > { %5593 = vmatpush.bf16.msra.mxu3 %v5579_v54 }
0x1a1a   : > { %v5406_v25 = vpop.f32.mrf.mxu0 }
0x1a1b   : > { %v5431_v62 = vpack.c.bf16 %v5406_v25, %v5406_v25 }
0x1a1d   : > { %6204 = vmatmul.msk.bf16.vlgmr.msra.gmra.mxu0 %vm1300_vm5, %v5431_v62 }
0x1a22   : > { %v5408_v58 = vpop.f32.mrf.mxu0 }
0x1a2b   : > { %v5387_v59 = vpop.f32.mrf.mxu3 }
0x1a2c   : > { %v5368_v61 = vpop.f32.mrf.mxu2  ;;  %v5430_v63 = vpack.c.bf16 %v5387_v59, %v5387_v59  ;;  %v5636_v59 = vld [vmem:[%s8561_s5 + $0x70] sm:$0xff] }
0x1a2d   : > { %v5429_v1 = vpack.c.bf16 %v5368_v61, %v5368_v61  ;;  %v5637_v61 = vld [vmem:[%s8561_s5 + $0x78] sm:$0xff] }
0x1a2e   : > { %v5425_v2 = vpop.f32.mrf.mxu1  ;;  %6203 = vmatmul.msk.bf16.vlgmr.msrb.gmra.mxu3 %vm1300_vm5, %v5430_v63  ;;  %v5646_v63 = vpack.c.bf16 %v5637_v61, %v5636_v59 }
0x1a2f   : > { %v5432_v3 = vpack.c.bf16 %v5425_v2, %v5425_v2  ;;  %6202 = vmatmul.msk.bf16.vlgmr.msrb.gmra.mxu2 %vm1300_vm5, %v5429_v1  ;;  %v5634_v1 = vld [vmem:[%s8561_s5 + $0x60] sm:$0xff]  ;;  %v5635_v2 = vld [vmem:[%s8561_s5 + $0x68] sm:$0xff] }
0x1a31   : > { %6205 = vmatmul.msk.bf16.vlgmr.msra.gmra.mxu1 %vm1300_vm5, %v5432_v3  ;;  %v5672_v3 = vsel %vm912_vm0, %v5646_v63, 0 }
0x1a32   : > { %5674 = vmatpush.bf16.xpose.msrb.mxu0 %v5672_v3 }
0x1a33   : > { %v5389_v5 = vpop.f32.mrf.mxu3 }
0x1a34   : > { %v5370_v6 = vpop.f32.mrf.mxu2  ;;  %v5645_v5 = vpack.c.bf16 %v5635_v2, %v5634_v1 }
0x1a36   : > { %v5427_v7 = vpop.f32.mrf.mxu1  ;;  %v5669_v6 = vsel %vm912_vm0, %v5645_v5, 0 }
0x1a37   : > { %v5632_v7 = vld [vmem:[%s8561_s5 + $0x50] sm:$0xff] }
0x1a3a   : > { %5675 = vmatpush.bf16.xpose.msrb.mxu0 %v5669_v6 }
0x1a9a   : > { %v5490_v8 = vpop.f32.mrf.mxu0 }
0x1a9b   : > { %v5516_v10 = vsel %vm912_vm0, %v5490_v8, 0.0  ;;  %v5633_v8 = vld [vmem:[%s8561_s5 + $0x58] sm:$0xff] }
0x1aa2   : > { %v5492_v12 = vpop.f32.mrf.mxu0 }
0x1aa3   : > { %v5644_v12 = vpack.c.bf16 %v5633_v8, %v5632_v7 }
0x1aae   : > { %v5509_v13 = vpop.f32.mrf.mxu1 }
0x1aaf   : > { %v5518_v18 = vsel %vm912_vm0, %v5509_v13, 0.0  ;;  %v5666_v13 = vsel %vm912_vm0, %v5644_v12, 0 }
0x1ab0   : > { %5676 = vmatpush.bf16.xpose.msrb.mxu0 %v5666_v13 }
0x1ab1   : > { %v5471_v14 = vpop.f32.mrf.mxu3 }
0x1ab2   : > { %v5452_v4 = vpop.f32.mrf.mxu2  ;;  %v5514_v15 = vsel %vm912_vm0, %v5471_v14, 0.0  ;;  %v5630_v14 = vld [vmem:[%s8561_s5 + $0x40] sm:$0xff] }
0x1ab3   : > { %v5513_v46 = vsel %vm912_vm0, %v5452_v4, 0.0  ;;  %v5631_v4 = vld [vmem:[%s8561_s5 + $0x48] sm:$0xff] }
0x1ab4   : > { %v5515_v16 = vadd.f32 %v5514_v15, %v5513_v46  ;;  %v5643_v15 = vpack.c.bf16 %v5631_v4, %v5630_v14 }
0x1ab6   : > { %v5517_v17 = vadd.f32 %v5516_v10, %v5515_v16  ;;  %v5511_v19 = vpop.f32.mrf.mxu1  ;;  %v5663_v10 = vsel %vm912_vm0, %v5643_v15, 0 }
0x1ab7   : > { %v5629_v19 = vld [vmem:[%s8561_s5 + $0x38] sm:$0xff] }
0x1ab8   : > { %v5519_v20 = vadd.f32 %v5518_v18, %v5517_v17  ;;  %v5628_v17 = vld [vmem:[%s8561_s5 + $0x30] sm:$0xff]  ;;  %5677 = vmatpush.bf16.xpose.msrb.mxu0 %v5663_v10 }
0x1ab9   : > { %v5473_v22 = vpop.f32.mrf.mxu3 }
0x1aba   : > { %v5454_v23 = vpop.f32.mrf.mxu2  ;;  %v8292_v24 = vadd.f32 %v5519_v20, %v8056_v9  ;;  %v6207_v9 = vld [vmem:[%s8482_s21 + $0x20] sm:$0xff]  ;;  %v5642_v22 = vpack.c.bf16 %v5629_v19, %v5628_v17 }
0x1abb   : > { %v5559_v29 = vpack.c.bf16 %v6208_v28, %v6207_v9  ;;  %v5625_v9 = vld [vmem:[%s8561_s5 + $0x18] sm:$0xff] }
0x1abc   : > { %v5537_v26 = vmul.f32 %v8292_v24, %v8292_v24  ;;  %v5640_v28 = vpack.c.bf16 %v5625_v9, %v5624_v57 }
0x1abd   : > { %5571 = vmatpush.bf16.msra.mxu2 %v5559_v29 }
0x1abe   : > { %v5538_v60 = vsel %vm912_vm0, %v5537_v26, 0.0  ;;  %v5660_v26 = vsel %vm912_vm0, %v5642_v22, 0  ;;  %v5654_v29 = vsel %vm912_vm0, %v5640_v28, 0 }
0x1abf   : > { %5539 = vadd.xlane.f32.xlu1 %v5538_v60  ;;  %v5627_v60 = vld [vmem:[%s8561_s5 + $0x28] sm:$0xff] }
0x1ac0   : > { %5678 = vmatpush.bf16.xpose.msrb.mxu0 %v5660_v26 }
0x1b32   : > { %v5540_v33 = vpop.xlane.xlu1 %5539 }
0x1b33   : > { %v5541_v35 = vmul.f32 %v5540_v33, %v6725_v51  ;;  %v6482_v33 = vmov 0  }
0x1b34   : > { %6269 = vset.pattern.permute.xlu1 %v6482_v33  ;;  %6271 = vset.pattern.permute.xlu0 %v6482_v33 }
0x1b35   : > { %v5542_v38 = vadd.f32 1e-06, %v5541_v35  ;;  %5701 = vperm.xlu1 %6269, %v5697_v53   ;;  %6270 = vset.pattern.permute.xlu2 %v6482_v33 }
0x1b37   : > { %6403 = vrsqrt.f32 %v5542_v38  ;;  %vm5549_vm6 = vweird.f32 %v5542_v38 }
0x1b3d   : > { %v6404_v40 = vpop.eup %6403 }
0x1b3e   : > { %v5544_v36 = vmul.f32 %v6404_v40, %v5542_v38  ;;  %vm5550_vm5 = vweird.f32 %v6404_v40 }
0x1b3f   : > { %vm5551_vm11 = vmor %vm5549_vm6, %vm5550_vm5 }
0x1b40   : > { %v5545_v41 = vmul.f32 %v6404_v40, %v5544_v36 }
0x1b42   : > { %v5546_v42 = vmul.f32 0.5, %v5545_v41 }
0x1b44   : > { %v5547_v11 = vsub.f32 1.5, %v5546_v42  ;;  %v6284_v42 = vld [vmem:[%s8564_s4] ss:$0 sm:$0xff]  ;;  %s5761_s4 = sshll.u32 %s5757_s6, 4  ;;  %s5762_s4 = int_to_ptr.hbm [resolvable:$true] %s5761_s4 }
0x1b45   : > { %s6431_s2 = sshra.s32 %s5762_s4, 4  ;;  %s6432_s2 = int_to_ptr.hbm [resolvable:$true] %s6431_s2 }
0x1b46   : > { %v5548_v43 = vmul.f32 %v6404_v40, %v5547_v11  ;;  %p6438_p0 = scmp.lt.s32.totalorder %s6432_s2, %s8567_s8 }
0x1b48   : > { %v5552_v45 = vsel %vm5551_vm11, %v6404_v40, %v5548_v43 }
0x1b49   : > { %v5553_v47 = vmul.f32 %v5552_v45, %v8292_v24  ;;  %v5698_v45 = vlaneseq }
0x1b4b   : > { %v5557_v48 = vmul.f32 %v6283_v44, %v5553_v47 }
0x1b4d   : > { %v5558_v50 = vpack.c.bf16 %v5557_v48, %v5557_v48  ;;  %v8412_v48 = vand.u32 127, %v5698_v45 }
0x1b4f   : > { %6219 = vmatmul.msk.bf16.vlgmr.msra.gmra.mxu2 %vm912_vm0, %v5558_v50 }
0x1ba7   : > { %v5702_v50 = vpop.permute.xlu1 %5701 }
0x1ba8   : > { %vm5703_vm14 = vcmp.eq.s32.totalorder %v8412_v48, %v5702_v50 }
0x1bd2   : > { %v5573_v55 = vpop.f32.mrf.mxu2 }
0x1bd3   : > { %v5577_v25 = vmax.f32 %v5573_v55, 0.0 }
0x1bd5   : > { %v5578_v62 = vpack.c.bf16 %v5577_v25, %v5577_v25 }
0x1bd7   : > { %6220 = vmatmul.msk.bf16.vlgmr.msra.gmra.mxu3 %vm1657_vm10, %v5578_v62 }
0x1bda   : > { %v5575_v58 = vpop.f32.mrf.mxu2 }
0x1bdb   : > { %v6483_v58 = vmov 0.0  }
0x1c5a   : > { %v5595_v46 = vpop.f32.mrf.mxu3 }
0x1c5b   : > { %v5599_v16 = vadd.f32 %v5595_v46, %v8292_v24  ;;  %v5626_v24 = vld [vmem:[%s8561_s5 + $0x20] sm:$0xff]  ;;  %s6433_s5 = scalar_lea.hbm %s6432_s2, 8 }
0x1c5c   : > { %v5641_v56 = vpack.c.bf16 %v5627_v60, %v5626_v24  ;;  %p6434_p11 = scmp.ne.s32.totalorder %s6432_s2, %s6433_s5  ;;  %p6439_p1 = scmp.lt.s32.totalorder %s6437_s9, %s6433_s5 }
0x1c5d   : > { %v5600_v18 = vmul.f32 %v5599_v16, %v5599_v16 }
0x1c5e   : > { %v5657_v27 = vsel %vm912_vm0, %v5641_v56, 0  ;;  %p6435_p12 = pnand %p6434_p11, %p6657_p5  ;;  %p6440_p2 = por %p6439_p1, %p6438_p0 }
0x1c5f   : > { %v5601_v20 = vsel %vm912_vm0, %v5600_v18, 0.0  ;;  %5679 = vmatpush.bf16.xpose.msrb.mxu0 %v5657_v27 }
0x1c60   : > { %5602 = vadd.xlane.f32.xlu2 %v5601_v20  ;;  %p6436_p13 = pneg %p6435_p12 }
0x1c62   : > { %v5597_v23 = vpop.f32.mrf.mxu3  ;;  %p6441_p3 = pnand %p6440_p2, %p6436_p13 }
0x1c67   : > { %5680 = vmatpush.bf16.xpose.msrb.mxu0 %v5654_v29 }
0x1c6f   : > { %5681 = vmatpush.bf16.xpose.msrb.mxu0 %v5651_v21 }
0x1cd3   : > { %v5603_v34 = vpop.xlane.xlu2 %5602 }
0x1cd4   : > { %v5604_v35 = vmul.f32 %v5603_v34, %v6725_v51 }
0x1cd6   : > { %v5605_v0 = vadd.f32 1e-06, %v5604_v35 }
0x1cd8   : > { %6405 = vrsqrt.f32 %v5605_v0  ;;  %vm5612_vm12 = vweird.f32 %v5605_v0 }
0x1cde   : > { %v6406_v37 = vpop.eup %6405 }
0x1cdf   : > { %v5607_v38 = vmul.f32 %v6406_v37, %v5605_v0  ;;  %vm5613_vm10 = vweird.f32 %v6406_v37 }
0x1ce0   : > { %vm5614_vm13 = vmor %vm5612_vm12, %vm5613_vm10 }
0x1ce1   : > { %v5608_v39 = vmul.f32 %v6406_v37, %v5607_v38 }
0x1ce3   : > { %v5609_v40 = vmul.f32 0.5, %v5608_v39 }
0x1ce5   : > { %v5610_v36 = vsub.f32 1.5, %v5609_v40 }
0x1ce7   : > { %v5611_v41 = vmul.f32 %v6406_v37, %v5610_v36 }
0x1ce9   : > { %v5615_v11 = vsel %vm5614_vm13, %v6406_v37, %v5611_v41 }
0x1cea   : > { %v5616_v43 = vmul.f32 %v5615_v11, %v5599_v16 }
0x1cec   : > { %v5621_v51 = vmul.f32 %v6284_v42, %v5616_v43 }
0x1cee   : > { %v5638_v44 = vpack.c.bf16 %v5621_v51, %v5621_v51 }
0x1cf0   : > { %6221 = vmatmul.msk.bf16.vlgmr.msrb.gmra.mxu0 %vm912_vm0, %v5638_v44  ;;  %vm5707_vm0 = vcmp.ne.s32.totalorder %v5697_v53, 4294967196 }
0x1cf1   : > { %v6222_v59 = vsel %vm5707_vm0, 1.0, %v6483_v58 }
0x1cf2   : > { %v5720_v61 = vsel %vm5712_vm15, %v6222_v59, 0.0 }
0x1cf3   : > { %v5721_v63 = vrot.slane %v5720_v61, 4 }
0x1cf5   : > { %v5722_v1 = vadd.f32 %v5721_v63, %v5720_v61 }
0x1cf7   : > { %v5723_v2 = vrot.slane %v5722_v1, 2 }
0x1cf9   : > { %v5724_v3 = vadd.f32 %v5723_v2, %v5722_v1 }
0x1cfb   : > { %v5725_v5 = vrot.slane %v5724_v3, 1 }
0x1cfd   : > { %v5726_v7 = vadd.f32 %v5725_v5, %v5724_v3 }
0x1d6d   : > { %v5683_v47 = vpop.f32.mrf.mxu0 }
0x1d6e   : > { %5687 = vmax.xlane.f32.xlu0 %v5683_v47  ;;  %5727 = vst [vmem:[%s820_s0] sm:$0xff] %v5683_v47  ;;  %v5704_v49 = vsel %vm5703_vm14, %v5683_v47, 0.0 }
0x1d75   : > { %v5685_v52 = vpop.f32.mrf.mxu0 }
0x1d76   : > { %5705 = vadd.xlane.f32.xlu0 %v5704_v49 }
0x1de1   : > { %v5688_v54 = vpop.xlane.xlu0 %5687 }
0x1de2   : > { %v5689_v55 = vsub.f32 %v5683_v47, %v5688_v54 }
0x1de4   : > { %v5690_v25 = vmul.f32 1.442695, %v5689_v55 }
0x1de6   : > { %6407 = vpow2.f32 %v5690_v25 }
0x1de9   : > { %v5706_v14 = vpop.xlane.xlu0 %5705 }
0x1dec   : > { %v6408_v62 = vpop.eup %6407 }
0x1ded   : > { %5692 = vadd.xlane.f32.xlu2 %v6408_v62 }
0x1e05   : > { %5732 = vperm.xlu2 %6270, %v5726_v7  }
0x1e60   : > { %v5693_v6 = vpop.xlane.xlu2 %5692 }
0x1e61   : > { %6409 = vlog2.f32 %v5693_v6 }
0x1e67   : > { %v6410_v8 = vpop.eup %6409 }
0x1e68   : > { %v5695_v12 = vmul.f32 0.6931472, %v6410_v8 }
0x1e6a   : > { %v5696_v13 = vadd.f32 %v5695_v12, %v5688_v54 }
0x1e6c   : > { %v5710_v4 = vsub.f32 %v5696_v13, %v5706_v14 }
0x1e6e   : > { %v5711_v15 = vmul.f32 %v6222_v59, %v5710_v4 }
0x1e70   : > { %v5713_v46 = vsel %vm5712_vm15, %v5711_v15, 0.0 }
0x1e71   : > { %v5714_v16 = vrot.slane %v5713_v46, 4 }
0x1e72   : > { %6444 = shalt.err (!%p6441_p3)
}
0x1e73   : > { %s8568_s26 = sld [smem:[#allocation14_spill]]  ;;  %v5715_v10 = vadd.f32 %v5714_v16, %v5713_v46  ;;  %vm5729_vm1 = vcmp.eq.s32.totalorder %v8412_v48, 1  ;;  %v5733_v22 = vpop.permute.xlu2 %5732  ;;  %vm5728_vm2 = vcmp.eq.s32.totalorder %v8412_v48, 0 }
0x1e74   : > { %6227 = dma.vmem_to_hbm [thread:$0]  (%p6657_p5), %s5760_s30, 128, %s5762_s4, %s5744_s1   ;;  %v5735_v23 = vsel %vm5729_vm1, %v5733_v22, 0.0 }
0x1e75   : > { %v5716_v17 = vrot.slane %v5715_v10, 2  ;;  %s8569_s27 = sld [smem:[#allocation29_spill]] }
0x1e77   : > { %v5717_v19 = vadd.f32 %v5716_v17, %v5715_v10 }
0x1e79   : > { %v5718_v18 = vrot.slane %v5717_v19, 1 }
0x1e7b   : > { %v5719_v20 = vadd.f32 %v5718_v18, %v5717_v19  ;;  %s843_s3 = scalar_lea.vmem %s8569_s27, %s8568_s26 }
0x1e7d   : > { %5738 = vperm.xlu0 %6271, %v5719_v20  }
0x1eef   : > { %v5739_v26 = vpop.permute.xlu0 %5738 }
0x1ef0   : > { %v5741_v24 = vsel %vm5728_vm2, %v5739_v26, %v5735_v23 }
0x1ef1   : > { %5742 = vst [vmem:[%s843_s3] sm:$0x1] %v5741_v24 }
0x1ef2 PF: > { %s8570_s1 = sld [smem:[#allocation8_spill]] }
0x1ef3   : > { %s8571_s7 = sld [smem:[#allocation5_spill]] }
0x1ef8   : > { %p6233_p4 = scmp.ge.s32.totalorder %s8570_s1, 2 }
0x1ef9   : > { %s5776_s30 = sand.u32 1, %s8571_s7  }
0x1efa   : > { %p6230_p5 = pnand %p6233_p4, %p6661_p6  ;;  %s5777_s4 = scalar_lea.sflag [#allocation3], %s5776_s30 }
0x1efc   : > { %p6231_p7 = pneg %p6230_p5 }
0x1efe   : > { %6462 = dma.done.wait (%p6231_p7), %s5777_s4, 128  }
0x1eff   : > { %6464 = vsyncadd (%p6231_p7), %s5777_s4, 4294967168  ;;  %s8573_s28 = sld [smem:[#allocation10_spill]] }
0x1f00   : > { %s8574_s27 = sld [smem:[#allocation6_spill]] }
0x1f01   : > { %s8575_s3 = sld [smem:[#allocation7_spill]] }
0x1f02   : > { %s8576_s7 = sld [smem:[#allocation11_spill]] }
0x1f05   : > { %p37_p8 = scmp.ge.s32.totalorder %s8573_s28, 4  }
0x1f07   :  { %39 = sbr.rel (!%p37_p8) target bundleno = 19 (0x13), region = 192 }
0x1f0c   :  { %5789 = vsyncpa [#allocation3], 1 }
0x1f0d   :  { %5791 = vsyncpa [#allocation3 + $0x1], 1 }

</bundles_post_ra>
